<compile_context>
chip_gen: v6e
topology: v6e:2x2x1
jax: 0.10.0
libtpu: 0.0.40
codegen_flags: <defaults>
</compile_context>

<pallas_src>
import functools

import jax
import jax.numpy as jnp
from jax.experimental import pallas as pl
from jax.experimental.pallas import tpu as pltpu

EPS = 1e-3
MOMENTUM = 0.1


def bn_relu_kernel(x_ref, gamma_ref, beta_ref, rm_ref, rv_ref,
                   y_ref, new_rm_ref, new_rv_ref, *, eps, momentum):
    # x_ref:  (N, C_blk, HW)   gamma/beta/rm/rv refs: (1, C_blk, 1) float32
    n, _, hw = x_ref.shape
    count = n * hw
    inv_count = 1.0 / count

    # ---- Stats pass: stream x once for sum and sum-of-squares (lane reductions). ----
    xf = x_ref[...].astype(jnp.float32)
    s = jnp.sum(xf, axis=(0, 2), keepdims=True)          # (1, C_blk, 1)
    ss = jnp.sum(xf * xf, axis=(0, 2), keepdims=True)    # (1, C_blk, 1)

    mean = s * inv_count
    # Biased variance (what PyTorch normalizes with); clamp rounding negatives.
    var = jnp.maximum(ss * inv_count - mean * mean, 0.0)

    inv = jax.lax.rsqrt(var + eps)                        # EUP, effectively free
    scale = inv * gamma_ref[...]                          # (1, C_blk, 1)
    bias = beta_ref[...] - mean * scale                   # (1, C_blk, 1)

    # ---- Normalize + ReLU pass: re-read x from VMEM (don't keep the big tile live). ----
    y = x_ref[...].astype(jnp.float32) * scale + bias
    y_ref[...] = jnp.maximum(y, 0.0).astype(y_ref.dtype)

    # ---- Running-stats update (PyTorch: unbiased variance goes into running_var). ----
    corr = float(count) / float(max(count - 1, 1))
    new_rm_ref[...] = (1.0 - momentum) * rm_ref[...] + momentum * mean
    new_rv_ref[...] = (1.0 - momentum) * rv_ref[...] + momentum * (var * corr)


def _num_tensorcores_per_chip():
    # Only v7x has 2 TensorCores per chip; elsewhere a channel grid just adds
    # per-step overhead to a launch-bound kernel.
    try:
        kind = (jax.devices()[0].device_kind or "").lower()
    except Exception:
        return 1
    return 2 if "v7" in kind else 1


def _channel_blocks(c):
    n = _num_tensorcores_per_chip()
    if n > 1 and c % (n * 8) == 0:
        return n
    return 1


def batchnorm_relu(x_nchw, gamma, beta, running_mean, running_var,
                   *, eps=EPS, momentum=MOMENTUM):
    """Training-mode BN(+affine)+ReLU. Returns (y, new_running_mean, new_running_var)."""
    N, C, H, W = x_nchw.shape
    HW = H * W

    x3d = x_nchw.reshape(N, C, HW)                       # free reshape (merge last dims)
    g = gamma.reshape(1, C, 1).astype(jnp.float32)
    b = beta.reshape(1, C, 1).astype(jnp.float32)
    rm = running_mean.reshape(1, C, 1).astype(jnp.float32)
    rv = running_var.reshape(1, C, 1).astype(jnp.float32)

    nblk = _channel_blocks(C)
    cblk = C // nblk

    kernel = functools.partial(bn_relu_kernel, eps=eps, momentum=momentum)

    x_spec = pl.BlockSpec((N, cblk, HW), lambda c: (0, c, 0))
    vec_spec = pl.BlockSpec((1, cblk, 1), lambda c: (0, c, 0))

    y3d, new_rm, new_rv = pl.pallas_call(
        kernel,
        grid=(nblk,),
        out_shape=(
            jax.ShapeDtypeStruct((N, C, HW), x_nchw.dtype),
            jax.ShapeDtypeStruct((1, C, 1), jnp.float32),
            jax.ShapeDtypeStruct((1, C, 1), jnp.float32),
        ),
        in_specs=[x_spec, vec_spec, vec_spec, vec_spec, vec_spec],
        out_specs=(x_spec, vec_spec, vec_spec),
        compiler_params=pltpu.CompilerParams(dimension_semantics=("parallel",)),
    )(x3d, g, b, rm, rv)

    return (y3d.reshape(N, C, H, W),
            new_rm.reshape(C),
            new_rv.reshape(C))


if __name__ == "__main__":
    key = jax.random.PRNGKey(0)
    kx, kg, kb = jax.random.split(key, 3)

    # Shape implied by the module: (1, 336, 14, 14)
    N, C, H, W = 1, 336, 14, 14
    x = jax.random.normal(kx, (N, C, H, W), dtype=jnp.float32)
    gamma = 1.0 + 0.1 * jax.random.normal(kg, (C,), dtype=jnp.float32)
    beta = 0.1 * jax.random.normal(kb, (C,), dtype=jnp.float32)
    running_mean = jnp.zeros((C,), dtype=jnp.float32)    # PyTorch defaults
    running_var = jnp.ones((C,), dtype=jnp.float32)

    y, new_rm, new_rv = batchnorm_relu(x, gamma, beta, running_mean, running_var)
    y = jax.block_until_ready(y)
    new_rm = jax.block_until_ready(new_rm)
    new_rv = jax.block_until_ready(new_rv)

    # Pure-JAX reference of the same math (training-mode BN + ReLU + running-stat update).
    xf = x.astype(jnp.float32)
    mean = jnp.mean(xf, axis=(0, 2, 3))
    var_b = jnp.mean((xf - mean[None, :, None, None]) ** 2, axis=(0, 2, 3))
    ref_y = jnp.maximum(
        (xf - mean[None, :, None, None]) * jax.lax.rsqrt(var_b + EPS)[None, :, None, None]
        * gamma[None, :, None, None] + beta[None, :, None, None],
        0.0,
    )
    count = N * H * W
    ref_rm = (1.0 - MOMENTUM) * running_mean + MOMENTUM * mean
    ref_rv = (1.0 - MOMENTUM) * running_var + MOMENTUM * (var_b * count / (count - 1))

    assert y.shape == (N, C, H, W)
    assert jnp.max(jnp.abs(y - ref_y)) < 1e-4
    assert jnp.max(jnp.abs(new_rm - ref_rm)) < 1e-4
    assert jnp.max(jnp.abs(new_rv - ref_rv)) < 1e-4

    print("KERNEL_OK")
</pallas_src>

<mosaic_0001>
module attributes {stable_mosaic.version = 11 : i64} {
  func.func @bn_relu_kernel(%arg0: i32, %arg1: memref<1x336x196xf32, #tpu.memory_space<vmem>>, %arg2: memref<1x336x1xf32, #tpu.memory_space<vmem>>, %arg3: memref<1x336x1xf32, #tpu.memory_space<vmem>>, %arg4: memref<1x336x1xf32, #tpu.memory_space<vmem>>, %arg5: memref<1x336x1xf32, #tpu.memory_space<vmem>>, %arg6: memref<1x336x196xf32, #tpu.memory_space<vmem>>, %arg7: memref<1x336x1xf32, #tpu.memory_space<vmem>>, %arg8: memref<1x336x1xf32, #tpu.memory_space<vmem>>) attributes {dimension_semantics = [#tpu.dimension_semantics<parallel>], iteration_bounds = array<i64: 1>, scalar_prefetch = 0 : i64, scratch_operands = 0 : i64, tpu.core_type = #tpu.core_type<tc>, window_params = [{transform_indices = @transform_0, window_bounds = array<i64: 1, 336, 196>}, {transform_indices = @transform_1, window_bounds = array<i64: 1, 336, 1>}, {transform_indices = @transform_2, window_bounds = array<i64: 1, 336, 1>}, {transform_indices = @transform_3, window_bounds = array<i64: 1, 336, 1>}, {transform_indices = @transform_4, window_bounds = array<i64: 1, 336, 1>}, {transform_indices = @transform_5, window_bounds = array<i64: 1, 336, 196>}, {transform_indices = @transform_6, window_bounds = array<i64: 1, 336, 1>}, {transform_indices = @transform_7, window_bounds = array<i64: 1, 336, 1>}]} {
    %c0 = arith.constant 0 : index
    %c0_0 = arith.constant 0 : index
    %c0_1 = arith.constant 0 : index
    %0 = vector.load %arg1[%c0, %c0_0, %c0_1] : memref<1x336x196xf32, #tpu.memory_space<vmem>>, vector<1x336x196xf32>
    %cst = arith.constant dense<0.000000e+00> : vector<336xf32>
    %1 = vector.multi_reduction <add>, %0, %cst [0, 2] : vector<1x336x196xf32> to vector<336xf32>
    %2 = vector.shape_cast %1 : vector<336xf32> to vector<1x336x1xf32>
    %3 = arith.mulf %0, %0 : vector<1x336x196xf32>
    %cst_2 = arith.constant dense<0.000000e+00> : vector<336xf32>
    %4 = vector.multi_reduction <add>, %3, %cst_2 [0, 2] : vector<1x336x196xf32> to vector<336xf32>
    %5 = vector.shape_cast %4 : vector<336xf32> to vector<1x336x1xf32>
    %cst_3 = arith.constant 0.00510204071 : f32
    %6 = vector.broadcast %cst_3 : f32 to vector<1x336x1xf32>
    %7 = arith.mulf %2, %6 : vector<1x336x1xf32>
    %cst_4 = arith.constant 0.00510204071 : f32
    %8 = vector.broadcast %cst_4 : f32 to vector<1x336x1xf32>
    %9 = arith.mulf %5, %8 : vector<1x336x1xf32>
    %10 = arith.mulf %7, %7 : vector<1x336x1xf32>
    %11 = arith.subf %9, %10 : vector<1x336x1xf32>
    %cst_5 = arith.constant 0.000000e+00 : f32
    %12 = vector.broadcast %cst_5 : f32 to vector<1x336x1xf32>
    %13 = arith.maximumf %11, %12 : vector<1x336x1xf32>
    %cst_6 = arith.constant 1.000000e-03 : f32
    %14 = vector.broadcast %cst_6 : f32 to vector<1x336x1xf32>
    %15 = arith.addf %13, %14 : vector<1x336x1xf32>
    %16 = math.rsqrt %15 : vector<1x336x1xf32>
    %c0_7 = arith.constant 0 : index
    %c0_8 = arith.constant 0 : index
    %c0_9 = arith.constant 0 : index
    %17 = vector.load %arg2[%c0_7, %c0_8, %c0_9] : memref<1x336x1xf32, #tpu.memory_space<vmem>>, vector<1x336x1xf32>
    %18 = arith.mulf %16, %17 : vector<1x336x1xf32>
    %c0_10 = arith.constant 0 : index
    %c0_11 = arith.constant 0 : index
    %c0_12 = arith.constant 0 : index
    %19 = vector.load %arg3[%c0_10, %c0_11, %c0_12] : memref<1x336x1xf32, #tpu.memory_space<vmem>>, vector<1x336x1xf32>
    %20 = arith.mulf %7, %18 : vector<1x336x1xf32>
    %21 = arith.subf %19, %20 : vector<1x336x1xf32>
    %c0_13 = arith.constant 0 : index
    %c0_14 = arith.constant 0 : index
    %c0_15 = arith.constant 0 : index
    %22 = vector.load %arg1[%c0_13, %c0_14, %c0_15] : memref<1x336x196xf32, #tpu.memory_space<vmem>>, vector<1x336x196xf32>
    %23 = vector.broadcast %18 : vector<1x336x1xf32> to vector<1x336x196xf32>
    %24 = arith.mulf %22, %23 : vector<1x336x196xf32>
    %25 = vector.broadcast %21 : vector<1x336x1xf32> to vector<1x336x196xf32>
    %26 = arith.addf %24, %25 : vector<1x336x196xf32>
    %cst_16 = arith.constant 0.000000e+00 : f32
    %27 = vector.broadcast %cst_16 : f32 to vector<1x336x196xf32>
    %28 = arith.maximumf %26, %27 : vector<1x336x196xf32>
    %c0_17 = arith.constant 0 : index
    %c0_18 = arith.constant 0 : index
    %c0_19 = arith.constant 0 : index
    %29 = vector.load %arg6[%c0_17, %c0_18, %c0_19] : memref<1x336x196xf32, #tpu.memory_space<vmem>>, vector<1x336x196xf32>
    tpu.vector_store %arg6[%c0_17, %c0_18, %c0_19], %28 {strides = array<i32>} : memref<1x336x196xf32, #tpu.memory_space<vmem>>, vector<1x336x196xf32>,
    %c0_20 = arith.constant 0 : index
    %c0_21 = arith.constant 0 : index
    %c0_22 = arith.constant 0 : index
    %30 = vector.load %arg4[%c0_20, %c0_21, %c0_22] : memref<1x336x1xf32, #tpu.memory_space<vmem>>, vector<1x336x1xf32>
    %cst_23 = arith.constant 0.899999976 : f32
    %31 = vector.broadcast %cst_23 : f32 to vector<1x336x1xf32>
    %32 = arith.mulf %31, %30 : vector<1x336x1xf32>
    %cst_24 = arith.constant 1.000000e-01 : f32
    %33 = vector.broadcast %cst_24 : f32 to vector<1x336x1xf32>
    %34 = arith.mulf %33, %7 : vector<1x336x1xf32>
    %35 = arith.addf %32, %34 : vector<1x336x1xf32>
    %c0_25 = arith.constant 0 : index
    %c0_26 = arith.constant 0 : index
    %c0_27 = arith.constant 0 : index
    %36 = vector.load %arg7[%c0_25, %c0_26, %c0_27] : memref<1x336x1xf32, #tpu.memory_space<vmem>>, vector<1x336x1xf32>
    tpu.vector_store %arg7[%c0_25, %c0_26, %c0_27], %35 {strides = array<i32>} : memref<1x336x1xf32, #tpu.memory_space<vmem>>, vector<1x336x1xf32>,
    %c0_28 = arith.constant 0 : index
    %c0_29 = arith.constant 0 : index
    %c0_30 = arith.constant 0 : index
    %37 = vector.load %arg5[%c0_28, %c0_29, %c0_30] : memref<1x336x1xf32, #tpu.memory_space<vmem>>, vector<1x336x1xf32>
    %cst_31 = arith.constant 0.899999976 : f32
    %38 = vector.broadcast %cst_31 : f32 to vector<1x336x1xf32>
    %39 = arith.mulf %38, %37 : vector<1x336x1xf32>
    %cst_32 = arith.constant 1.00512826 : f32
    %40 = vector.broadcast %cst_32 : f32 to vector<1x336x1xf32>
    %41 = arith.mulf %13, %40 : vector<1x336x1xf32>
    %cst_33 = arith.constant 1.000000e-01 : f32
    %42 = vector.broadcast %cst_33 : f32 to vector<1x336x1xf32>
    %43 = arith.mulf %42, %41 : vector<1x336x1xf32>
    %44 = arith.addf %39, %43 : vector<1x336x1xf32>
    %c0_34 = arith.constant 0 : index
    %c0_35 = arith.constant 0 : index
    %c0_36 = arith.constant 0 : index
    %45 = vector.load %arg8[%c0_34, %c0_35, %c0_36] : memref<1x336x1xf32, #tpu.memory_space<vmem>>, vector<1x336x1xf32>
    tpu.vector_store %arg8[%c0_34, %c0_35, %c0_36], %44 {strides = array<i32>} : memref<1x336x1xf32, #tpu.memory_space<vmem>>, vector<1x336x1xf32>,
    return
  }
  func.func @transform_0(%arg0: i32) -> (i32, i32, i32) {
    %c0_i32 = arith.constant 0 : i32
    %c0_i32_0 = arith.constant 0 : i32
    %c0_i32_1 = arith.constant 0 : i32
    return %c0_i32, %arg0, %c0_i32_0 : i32, i32, i32
  }
  func.func @transform_1(%arg0: i32) -> (i32, i32, i32) {
    %c0_i32 = arith.constant 0 : i32
    %c0_i32_0 = arith.constant 0 : i32
    %c0_i32_1 = arith.constant 0 : i32
    return %c0_i32, %arg0, %c0_i32_0 : i32, i32, i32
  }
  func.func @transform_2(%arg0: i32) -> (i32, i32, i32) {
    %c0_i32 = arith.constant 0 : i32
    %c0_i32_0 = arith.constant 0 : i32
    %c0_i32_1 = arith.constant 0 : i32
    return %c0_i32, %arg0, %c0_i32_0 : i32, i32, i32
  }
  func.func @transform_3(%arg0: i32) -> (i32, i32, i32) {
    %c0_i32 = arith.constant 0 : i32
    %c0_i32_0 = arith.constant 0 : i32
    %c0_i32_1 = arith.constant 0 : i32
    return %c0_i32, %arg0, %c0_i32_0 : i32, i32, i32
  }
  func.func @transform_4(%arg0: i32) -> (i32, i32, i32) {
    %c0_i32 = arith.constant 0 : i32
    %c0_i32_0 = arith.constant 0 : i32
    %c0_i32_1 = arith.constant 0 : i32
    return %c0_i32, %arg0, %c0_i32_0 : i32, i32, i32
  }
  func.func @transform_5(%arg0: i32) -> (i32, i32, i32) {
    %c0_i32 = arith.constant 0 : i32
    %c0_i32_0 = arith.constant 0 : i32
    %c0_i32_1 = arith.constant 0 : i32
    return %c0_i32, %arg0, %c0_i32_0 : i32, i32, i32
  }
  func.func @transform_6(%arg0: i32) -> (i32, i32, i32) {
    %c0_i32 = arith.constant 0 : i32
    %c0_i32_0 = arith.constant 0 : i32
    %c0_i32_1 = arith.constant 0 : i32
    return %c0_i32, %arg0, %c0_i32_0 : i32, i32, i32
  }
  func.func @transform_7(%arg0: i32) -> (i32, i32, i32) {
    %c0_i32 = arith.constant 0 : i32
    %c0_i32_0 = arith.constant 0 : i32
    %c0_i32_1 = arith.constant 0 : i32
    return %c0_i32, %arg0, %c0_i32_0 : i32, i32, i32
  }
}

</mosaic_0001>

<bundles_post_ra>
// kernel: tpu_custom_call.1
= control target key start
LH: loop header
LB: loop body
LE: loop exit
PB: predicated region body
PF: predicated region fallthrough
CT: control target
= control target key end

     0   :  { %vm107_vm0 = vcmask 556032   ;;  %vm1956_vm1 = vcmask 7168   ;;  %s5592_s0 = inlined_call_operand.vmem [shape: f32[1,336,196], index: 0, kind: input, shape index: {}]   ;;  %s5593_s3 = inlined_call_operand.vmem [shape: f32[1,336,1], index: 3, kind: input, shape index: {}]   ;;  %s5594_s6 = inlined_call_operand.vmem [shape: f32[1,336,1], index: 6, kind: output, shape index: {1}]   ;;  %s5595_s4 = inlined_call_operand.vmem [shape: f32[1,336,1], index: 4, kind: input, shape index: {}]   ;;  %s5596_s7 = inlined_call_operand.vmem [shape: f32[1,336,1], index: 7, kind: output, shape index: {2}]   ;;  %s5597_s1 = inlined_call_operand.vmem [shape: f32[1,336,1], index: 1, kind: input, shape index: {}]   ;;  %s5598_s2 = inlined_call_operand.vmem [shape: f32[1,336,1], index: 2, kind: input, shape index: {}]   ;;  %s5599_s5 = inlined_call_operand.vmem [shape: f32[1,336,196], index: 5, kind: output, shape index: {0}]  }
   0x1   :  { %v2478_v0 = vld [vmem:[%s5592_s0 + $0x20] sm:$0xff]  ;;  %v2483_v1 = vld [vmem:[%s5592_s0 + $0x28] sm:$0xff]  ;;  %v2500_v5 = vld [vmem:[%s5592_s0 + $0x30] sm:$0xff] }
   0x2   :  { %v2488_v2 = vld [vmem:[%s5592_s0] sm:$0xff]  ;;  %v116_v3 = vsel %vm107_vm0, %v2483_v1, 0.0  ;;  %v2495_v4 = vld [vmem:[%s5592_s0 + $0x8] sm:$0xff]  ;;  %v2505_v6 = vld [vmem:[%s5592_s0 + $0x38] sm:$0xff] }
   0x3   :  { %v117_v7 = vadd.f32 %v116_v3, %v2478_v0  ;;  %v108_v8 = vsel %vm107_vm0, %v2495_v4, 0.0  ;;  %v120_v9 = vsel %vm107_vm0, %v2505_v6, 0.0  ;;  %v2515_v10 = vld [vmem:[%s5592_s0 + $0x10] sm:$0xff]  ;;  %v2520_v11 = vld [vmem:[%s5592_s0 + $0x18] sm:$0xff]  ;;  %v2533_v15 = vld [vmem:[%s5592_s0 + $0x48] sm:$0xff] }
   0x4   :  { %v109_v12 = vadd.f32 %v108_v8, %v2488_v2  ;;  %v112_v13 = vsel %vm107_vm0, %v2520_v11, 0.0  ;;  %v2528_v14 = vld [vmem:[%s5592_s0 + $0x58] sm:$0xff]  ;;  %v121_v16 = vadd.f32 %v120_v9, %v2500_v5  ;;  %v2540_v18 = vld [vmem:[%s5592_s0 + $0x50] sm:$0xff]  ;;  %v2547_v20 = vld [vmem:[%s5592_s0 + $0x40] sm:$0xff]  ;;  %v124_v21 = vsel %vm107_vm0, %v2533_v15, 0.0 }
   0x5   :  { %118 = vadd.xlane.f32.xlu1 %v117_v7  ;;  %v113_v17 = vadd.f32 %v112_v13, %v2515_v10  ;;  %v128_v19 = vsel %vm107_vm0, %v2528_v14, 0.0  ;;  %v2554_v22 = vld [vmem:[%s5592_s0 + $0x78] sm:$0xff]  ;;  %v2559_v23 = vld [vmem:[%s5592_s0 + $0x68] sm:$0xff]  ;;  %v125_v25 = vadd.f32 %v124_v21, %v2547_v20  ;;  %v2566_v26 = vld [vmem:[%s5592_s0 + $0x70] sm:$0xff] }
   0x6   :  { %110 = vadd.xlane.f32.xlu0 %v109_v12  ;;  %v129_v24 = vadd.f32 %v128_v19, %v2540_v18  ;;  %v136_v27 = vsel %vm107_vm0, %v2554_v22, 0.0  ;;  %v2573_v28 = vld [vmem:[%s5592_s0 + $0x60] sm:$0xff]  ;;  %v132_v29 = vsel %vm107_vm0, %v2559_v23, 0.0  ;;  %v2580_v30 = vld [vmem:[%s5592_s0 + $0x98] sm:$0xff]  ;;  %v2585_v31 = vld [vmem:[%s5592_s0 + $0x88] sm:$0xff] }
   0x7   :  { %v137_v32 = vadd.f32 %v136_v27, %v2566_v26  ;;  %v133_v33 = vadd.f32 %v132_v29, %v2573_v28  ;;  %v2592_v34 = vld [vmem:[%s5592_s0 + $0x90] sm:$0xff]  ;;  %v144_v35 = vsel %vm107_vm0, %v2580_v30, 0.0  ;;  %v2599_v36 = vld [vmem:[%s5592_s0 + $0x80] sm:$0xff]  ;;  %v140_v37 = vsel %vm107_vm0, %v2585_v31, 0.0  ;;  %v2606_v38 = vld [vmem:[%s5592_s0 + $0xb8] sm:$0xff] }
   0x8   :  { %v2611_v39 = vld [vmem:[%s5592_s0 + $0xa8] sm:$0xff]  ;;  %v145_v40 = vadd.f32 %v144_v35, %v2592_v34  ;;  %v141_v41 = vadd.f32 %v140_v37, %v2599_v36  ;;  %v2618_v42 = vld [vmem:[%s5592_s0 + $0xb0] sm:$0xff]  ;;  %v152_v43 = vsel %vm107_vm0, %v2606_v38, 0.0  ;;  %v2625_v44 = vld [vmem:[%s5592_s0 + $0xa0] sm:$0xff] }
   0x9   :  { %122 = vadd.xlane.f32.xlu1 %v121_v16  ;;  %v148_v45 = vsel %vm107_vm0, %v2611_v39, 0.0  ;;  %v2632_v46 = vld [vmem:[%s5592_s0 + $0xd8] sm:$0xff]  ;;  %v2637_v47 = vld [vmem:[%s5592_s0 + $0xc8] sm:$0xff]  ;;  %v153_v48 = vadd.f32 %v152_v43, %v2618_v42  ;;  %v2644_v50 = vld [vmem:[%s5592_s0 + $0xd0] sm:$0xff] }
   0xa   :  { %114 = vadd.xlane.f32.xlu0 %v113_v17  ;;  %v149_v49 = vadd.f32 %v148_v45, %v2625_v44  ;;  %v160_v51 = vsel %vm107_vm0, %v2632_v46, 0.0  ;;  %v2651_v52 = vld [vmem:[%s5592_s0 + $0xc0] sm:$0xff]  ;;  %v156_v53 = vsel %vm107_vm0, %v2637_v47, 0.0  ;;  %v2658_v54 = vld [vmem:[%s5592_s0 + $0xf8] sm:$0xff]  ;;  %v2663_v55 = vld [vmem:[%s5592_s0 + $0xe8] sm:$0xff] }
   0xb   :  { %v161_v56 = vadd.f32 %v160_v51, %v2644_v50  ;;  %v157_v57 = vadd.f32 %v156_v53, %v2651_v52  ;;  %v2670_v58 = vld [vmem:[%s5592_s0 + $0xf0] sm:$0xff]  ;;  %v168_v59 = vsel %vm107_vm0, %v2658_v54, 0.0  ;;  %v2677_v60 = vld [vmem:[%s5592_s0 + $0xe0] sm:$0xff]  ;;  %v164_v61 = vsel %vm107_vm0, %v2663_v55, 0.0  ;;  %v2684_v62 = vld [vmem:[%s5592_s0 + $0x118] sm:$0xff] }
   0xc   :  { %v2689_v63 = vld [vmem:[%s5592_s0 + $0x108] sm:$0xff]  ;;  %v169_v3 = vadd.f32 %v168_v59, %v2670_v58  ;;  %v165_v7 = vadd.f32 %v164_v61, %v2677_v60  ;;  %v2696_v8 = vld [vmem:[%s5592_s0 + $0x110] sm:$0xff]  ;;  %v176_v9 = vsel %vm107_vm0, %v2684_v62, 0.0  ;;  %v2703_v12 = vld [vmem:[%s5592_s0 + $0x100] sm:$0xff] }
   0xd   :  { %130 = vadd.xlane.f32.xlu1 %v129_v24  ;;  %v172_v13 = vsel %vm107_vm0, %v2689_v63, 0.0  ;;  %v2710_v16 = vld [vmem:[%s5592_s0 + $0x138] sm:$0xff]  ;;  %v2715_v17 = vld [vmem:[%s5592_s0 + $0x128] sm:$0xff]  ;;  %v177_v19 = vadd.f32 %v176_v9, %v2696_v8  ;;  %v2722_v24 = vld [vmem:[%s5592_s0 + $0x130] sm:$0xff] }
   0xe   :  { %126 = vadd.xlane.f32.xlu0 %v125_v25  ;;  %v173_v21 = vadd.f32 %v172_v13, %v2703_v12  ;;  %v184_v25 = vsel %vm107_vm0, %v2710_v16, 0.0  ;;  %v2729_v27 = vld [vmem:[%s5592_s0 + $0x120] sm:$0xff]  ;;  %v180_v29 = vsel %vm107_vm0, %v2715_v17, 0.0 }
   0xf   :  { %v185_v35 = vadd.f32 %v184_v25, %v2722_v24  ;;  %v181_v37 = vadd.f32 %v180_v29, %v2729_v27  ;;  %v2755_v43 = vld [vmem:[%s5592_s0 + $0x140] sm:$0xff] }
  0x10   :  { %v2781_v59 = vld [vmem:[%s5592_s0 + $0x160] sm:$0xff] }
  0x11   :  { %138 = vadd.xlane.f32.xlu1 %v137_v32  ;;  %v2736_v32 = vld [vmem:[%s5592_s0 + $0x158] sm:$0xff]  ;;  %v2807_v25 = vld [vmem:[%s5592_s0 + $0x180] sm:$0xff] }
  0x12   :  { %134 = vadd.xlane.f32.xlu0 %v133_v33  ;;  %v2741_v33 = vld [vmem:[%s5592_s0 + $0x148] sm:$0xff]  ;;  %5686 = vst [vmem:[#allocation3_spill] sm:$0xff] %v2807_v25 }
  0x13   :  { %v188_v45 = vsel %vm107_vm0, %v2741_v33, 0.0 }
  0x14   :  { %v189_v53 = vadd.f32 %v188_v45, %v2755_v43 }
  0x15   :  { %146 = vadd.xlane.f32.xlu1 %v145_v40  ;;  %v2748_v40 = vld [vmem:[%s5592_s0 + $0x150] sm:$0xff] }
  0x16   :  { %142 = vadd.xlane.f32.xlu0 %v141_v41  ;;  %v192_v41 = vsel %vm107_vm0, %v2736_v32, 0.0 }
  0x17   :  { %v193_v51 = vadd.f32 %v192_v41, %v2748_v40 }
  0x19   :  { %154 = vadd.xlane.f32.xlu1 %v153_v48  ;;  %v2762_v48 = vld [vmem:[%s5592_s0 + $0x178] sm:$0xff] }
  0x1a   :  { %150 = vadd.xlane.f32.xlu0 %v149_v49  ;;  %v2767_v49 = vld [vmem:[%s5592_s0 + $0x168] sm:$0xff] }
  0x1b   :  { %v196_v61 = vsel %vm107_vm0, %v2767_v49, 0.0 }
  0x1c   :  { %v197_v13 = vadd.f32 %v196_v61, %v2781_v59 }
  0x1d   :  { %162 = vadd.xlane.f32.xlu1 %v161_v56  ;;  %v2774_v56 = vld [vmem:[%s5592_s0 + $0x170] sm:$0xff] }
  0x1e   :  { %158 = vadd.xlane.f32.xlu0 %v157_v57  ;;  %v200_v57 = vsel %vm107_vm0, %v2762_v48, 0.0 }
  0x1f   :  { %v201_v9 = vadd.f32 %v200_v57, %v2774_v56  ;;  %v2833_v57 = vld [vmem:[%s5592_s0 + $0x1a0] sm:$0xff] }
  0x20   :  { %5690 = vst [vmem:[#allocation7_spill] sm:$0xff] %v2833_v57 }
  0x21   :  { %170 = vadd.xlane.f32.xlu1 %v169_v3  ;;  %v2788_v3 = vld [vmem:[%s5592_s0 + $0x198] sm:$0xff] }
  0x22   :  { %166 = vadd.xlane.f32.xlu0 %v165_v7  ;;  %v2793_v7 = vld [vmem:[%s5592_s0 + $0x188] sm:$0xff] }
  0x23   :  { %v204_v29 = vsel %vm107_vm0, %v2793_v7, 0.0 }
  0x24   :  { %v205_v45 = vadd.f32 %v204_v29, %v2807_v25  ;;  %v2859_v25 = vld [vmem:[%s5592_s0 + $0x1c0] sm:$0xff] }
  0x25   :  { %178 = vadd.xlane.f32.xlu1 %v177_v19  ;;  %v2800_v19 = vld [vmem:[%s5592_s0 + $0x190] sm:$0xff]  ;;  %5694 = vst [vmem:[#allocation11_spill] sm:$0xff] %v2859_v25 }
  0x26   :  { %174 = vadd.xlane.f32.xlu0 %v173_v21  ;;  %5685 = vst [vmem:[#allocation2_spill] sm:$0xff] %v2800_v19  ;;  %v208_v21 = vsel %vm107_vm0, %v2788_v3, 0.0 }
  0x27   :  { %v209_v41 = vadd.f32 %v208_v21, %v2800_v19 }
  0x29   :  { %186 = vadd.xlane.f32.xlu1 %v185_v35  ;;  %v2814_v35 = vld [vmem:[%s5592_s0 + $0x1b8] sm:$0xff] }
  0x2a   :  { %182 = vadd.xlane.f32.xlu0 %v181_v37  ;;  %5687 = vst [vmem:[#allocation4_spill] sm:$0xff] %v2814_v35  ;;  %v2819_v37 = vld [vmem:[%s5592_s0 + $0x1a8] sm:$0xff] }
  0x2b   :  { %5688 = vst [vmem:[#allocation5_spill] sm:$0xff] %v2819_v37  ;;  %v212_v61 = vsel %vm107_vm0, %v2819_v37, 0.0  ;;  %v2852_v37 = vld [vmem:[%s5592_s0 + $0x1d0] sm:$0xff] }
  0x2c   :  { %v213_v29 = vadd.f32 %v212_v61, %v2833_v57  ;;  %5693 = vst [vmem:[#allocation10_spill] sm:$0xff] %v2852_v37 }
  0x2d   :  { %194 = vadd.xlane.f32.xlu1 %v193_v51  ;;  %v2826_v51 = vld [vmem:[%s5592_s0 + $0x1b0] sm:$0xff] }
  0x2e   :  { %190 = vadd.xlane.f32.xlu0 %v189_v53  ;;  %5689 = vst [vmem:[#allocation6_spill] sm:$0xff] %v2826_v51  ;;  %v216_v53 = vsel %vm107_vm0, %v2814_v35, 0.0 }
  0x2f   :  { %v217_v21 = vadd.f32 %v216_v53, %v2826_v51  ;;  %v2871_v53 = vld [vmem:[%s5592_s0 + $0x1e8] sm:$0xff]  ;;  %v2885_v51 = vld [vmem:[%s5592_s0 + $0x1e0] sm:$0xff] }
  0x30   :  { %5696 = vst [vmem:[#allocation13_spill] sm:$0xff] %v2871_v53  ;;  %5698 = vst [vmem:[#allocation15_spill] sm:$0xff] %v2885_v51 }
  0x31   :  { %202 = vadd.xlane.f32.xlu1 %v201_v9  ;;  %v2840_v9 = vld [vmem:[%s5592_s0 + $0x1d8] sm:$0xff] }
  0x32   :  { %198 = vadd.xlane.f32.xlu0 %v197_v13  ;;  %5691 = vst [vmem:[#allocation8_spill] sm:$0xff] %v2840_v9  ;;  %v2845_v13 = vld [vmem:[%s5592_s0 + $0x1c8] sm:$0xff]  ;;  %v224_v35 = vsel %vm107_vm0, %v2840_v9, 0.0 }
  0x33   :  { %5692 = vst [vmem:[#allocation9_spill] sm:$0xff] %v2845_v13  ;;  %v225_v61 = vadd.f32 %v224_v35, %v2852_v37  ;;  %v2892_v35 = vld [vmem:[%s5592_s0 + $0x218] sm:$0xff]  ;;  %v2911_v37 = vld [vmem:[%s5592_s0 + $0x200] sm:$0xff] }
  0x34   :  { %5699 = vst [vmem:[#allocation16_spill] sm:$0xff] %v2892_v35  ;;  %5702 = vst [vmem:[#allocation19_spill] sm:$0xff] %v2911_v37 }
  0x35   :  { %210 = vadd.xlane.f32.xlu1 %v209_v41  ;;  %v220_v41 = vsel %vm107_vm0, %v2845_v13, 0.0  ;;  %v2878_v13 = vld [vmem:[%s5592_s0 + $0x1f0] sm:$0xff] }
  0x36   :  { %206 = vadd.xlane.f32.xlu0 %v205_v45  ;;  %v2866_v45 = vld [vmem:[%s5592_s0 + $0x1f8] sm:$0xff]  ;;  %v221_v9 = vadd.f32 %v220_v41, %v2859_v25  ;;  %5697 = vst [vmem:[#allocation14_spill] sm:$0xff] %v2878_v13 }
  0x37   :  { %5695 = vst [vmem:[#allocation12_spill] sm:$0xff] %v2866_v45  ;;  %v232_v57 = vsel %vm107_vm0, %v2866_v45, 0.0  ;;  %v240_v45 = vsel %vm107_vm0, %v2892_v35, 0.0 }
  0x38   :  { %v233_v41 = vadd.f32 %v232_v57, %v2878_v13  ;;  %v2918_v57 = vld [vmem:[%s5592_s0 + $0x238] sm:$0xff]  ;;  %v2937_v13 = vld [vmem:[%s5592_s0 + $0x220] sm:$0xff] }
  0x39   :  { %218 = vadd.xlane.f32.xlu1 %v217_v21  ;;  %v228_v21 = vsel %vm107_vm0, %v2871_v53, 0.0  ;;  %v2904_v53 = vld [vmem:[%s5592_s0 + $0x210] sm:$0xff]  ;;  %5703 = vst [vmem:[#allocation20_spill] sm:$0xff] %v2918_v57  ;;  %5706 = vst [vmem:[#allocation23_spill] sm:$0xff] %v2937_v13 }
  0x3a   :  { %214 = vadd.xlane.f32.xlu0 %v213_v29  ;;  %v2897_v29 = vld [vmem:[%s5592_s0 + $0x208] sm:$0xff]  ;;  %v229_v25 = vadd.f32 %v228_v21, %v2885_v51  ;;  %5701 = vst [vmem:[#allocation18_spill] sm:$0xff] %v2904_v53  ;;  %v241_v21 = vadd.f32 %v240_v45, %v2904_v53  ;;  %v248_v51 = vsel %vm107_vm0, %v2918_v57, 0.0  ;;  %v2963_v53 = vld [vmem:[%s5592_s0 + $0x240] sm:$0xff] }
  0x3b   :  { %5700 = vst [vmem:[#allocation17_spill] sm:$0xff] %v2897_v29  ;;  %v2949_v45 = vld [vmem:[%s5592_s0 + $0x248] sm:$0xff]  ;;  %5710 = vst [vmem:[#allocation27_spill] sm:$0xff] %v2963_v53 }
  0x3c   :  { %5708 = vst [vmem:[#allocation25_spill] sm:$0xff] %v2949_v45 }
  0x3d   :  { %226 = vadd.xlane.f32.xlu1 %v225_v61  ;;  %v236_v61 = vsel %vm107_vm0, %v2897_v29, 0.0  ;;  %v2930_v29 = vld [vmem:[%s5592_s0 + $0x230] sm:$0xff] }
  0x3e   :  { %222 = vadd.xlane.f32.xlu0 %v221_v9  ;;  %v2923_v9 = vld [vmem:[%s5592_s0 + $0x228] sm:$0xff]  ;;  %v237_v35 = vadd.f32 %v236_v61, %v2911_v37  ;;  %5705 = vst [vmem:[#allocation22_spill] sm:$0xff] %v2930_v29  ;;  %v249_v61 = vadd.f32 %v248_v51, %v2930_v29  ;;  %v2970_v51 = vld [vmem:[%s5592_s0 + $0x278] sm:$0xff]  ;;  %v2989_v29 = vld [vmem:[%s5592_s0 + $0x260] sm:$0xff] }
  0x3f   :  { %5704 = vst [vmem:[#allocation21_spill] sm:$0xff] %v2923_v9  ;;  %5711 = vst [vmem:[#allocation28_spill] sm:$0xff] %v2970_v51 }
  0x40   :  { %5714 = vst [vmem:[#allocation31_spill] sm:$0xff] %v2989_v29 }
  0x41   :  { %234 = vadd.xlane.f32.xlu1 %v233_v41  ;;  %v244_v41 = vsel %vm107_vm0, %v2923_v9, 0.0  ;;  %v2956_v9 = vld [vmem:[%s5592_s0 + $0x250] sm:$0xff] }
  0x42   :  { %230 = vadd.xlane.f32.xlu0 %v229_v25  ;;  %v2944_v25 = vld [vmem:[%s5592_s0 + $0x258] sm:$0xff]  ;;  %v245_v57 = vadd.f32 %v244_v41, %v2937_v13  ;;  %5709 = vst [vmem:[#allocation26_spill] sm:$0xff] %v2956_v9  ;;  %v264_v13 = vsel %vm107_vm0, %v2970_v51, 0.0 }
  0x43   :  { %5707 = vst [vmem:[#allocation24_spill] sm:$0xff] %v2944_v25  ;;  %v256_v37 = vsel %vm107_vm0, %v2944_v25, 0.0 }
  0x44   :  { %v257_v41 = vadd.f32 %v256_v37, %v2956_v9  ;;  %v2996_v37 = vld [vmem:[%s5592_s0 + $0x298] sm:$0xff]  ;;  %v279_v9 = vmul.f32 %v2520_v11, %v2520_v11 }
  0x45   :  { %242 = vadd.xlane.f32.xlu1 %v241_v21  ;;  %v252_v21 = vsel %vm107_vm0, %v2949_v45, 0.0  ;;  %v2982_v45 = vld [vmem:[%s5592_s0 + $0x270] sm:$0xff]  ;;  %5715 = vst [vmem:[#allocation32_spill] sm:$0xff] %v2996_v37 }
  0x46   :  { %238 = vadd.xlane.f32.xlu0 %v237_v35  ;;  %v2975_v35 = vld [vmem:[%s5592_s0 + $0x268] sm:$0xff]  ;;  %v253_v25 = vadd.f32 %v252_v21, %v2963_v53  ;;  %5713 = vst [vmem:[#allocation30_spill] sm:$0xff] %v2982_v45  ;;  %v265_v21 = vadd.f32 %v264_v13, %v2982_v45  ;;  %v272_v53 = vsel %vm107_vm0, %v2996_v37, 0.0  ;;  %v278_v37 = vmul.f32 %v2515_v10, %v2515_v10 }
  0x47   :  { %5712 = vst [vmem:[#allocation29_spill] sm:$0xff] %v2975_v35  ;;  %v276_v45 = vmul.f32 %v2488_v2, %v2488_v2  ;;  %v282_v10 = vmul.f32 %v2500_v5, %v2500_v5  ;;  %v280_v2 = vmul.f32 %v2478_v0, %v2478_v0  ;;  %v286_v5 = vmul.f32 %v2540_v18, %v2540_v18 }
  0x48   :  { %v284_v0 = vmul.f32 %v2547_v20, %v2547_v20  ;;  %v290_v18 = vmul.f32 %v2566_v26, %v2566_v26  ;;  %v288_v20 = vmul.f32 %v2573_v28, %v2573_v28  ;;  %v294_v26 = vmul.f32 %v2592_v34, %v2592_v34 }
  0x49   :  { %250 = vadd.xlane.f32.xlu1 %v249_v61  ;;  %v260_v61 = vsel %vm107_vm0, %v2975_v35, 0.0  ;;  %v3008_v35 = vld [vmem:[%s5592_s0 + $0x290] sm:$0xff]  ;;  %v292_v28 = vmul.f32 %v2599_v36, %v2599_v36  ;;  %v298_v34 = vmul.f32 %v2618_v42, %v2618_v42  ;;  %v296_v36 = vmul.f32 %v2625_v44, %v2625_v44 }
  0x4a   :  { %246 = vadd.xlane.f32.xlu0 %v245_v57  ;;  %v3001_v57 = vld [vmem:[%s5592_s0 + $0x288] sm:$0xff]  ;;  %v261_v51 = vadd.f32 %v260_v61, %v2989_v29  ;;  %v273_v61 = vadd.f32 %v272_v53, %v3008_v35  ;;  %v364_v29 = vsel %vm107_vm0, %v279_v9, 0.0  ;;  %v302_v42 = vmul.f32 %v2644_v50, %v2644_v50 }
  0x4b   :  { %5716 = vst [vmem:[#allocation33_spill] sm:$0xff] %v3001_v57  ;;  %v268_v13 = vsel %vm107_vm0, %v3001_v57, 0.0  ;;  %v283_v57 = vmul.f32 %v2505_v6, %v2505_v6  ;;  %v365_v53 = vadd.f32 %v364_v29, %v278_v37  ;;  %v287_v6 = vmul.f32 %v2528_v14, %v2528_v14 }
  0x4c   :  { %v291_v14 = vmul.f32 %v2554_v22, %v2554_v22  ;;  %v295_v22 = vmul.f32 %v2580_v30, %v2580_v30  ;;  %v299_v30 = vmul.f32 %v2606_v38, %v2606_v38  ;;  %v303_v38 = vmul.f32 %v2632_v46, %v2632_v46 }
  0x4d   :  { %258 = vadd.xlane.f32.xlu1 %v257_v41  ;;  %v3017_v41 = vld [vmem:[%s5592_s0 + $0x280] sm:$0xff]  ;;  %v372_v9 = vsel %vm107_vm0, %v283_v57, 0.0  ;;  %v300_v44 = vmul.f32 %v2651_v52, %v2651_v52  ;;  %v307_v46 = vmul.f32 %v2658_v54, %v2658_v54  ;;  %v306_v50 = vmul.f32 %v2670_v58, %v2670_v58 }
  0x4e   :  { %254 = vadd.xlane.f32.xlu0 %v253_v25  ;;  %v277_v25 = vmul.f32 %v2495_v4, %v2495_v4  ;;  %v269_v11 = vadd.f32 %v268_v13, %v3017_v41  ;;  %v281_v4 = vmul.f32 %v2483_v1, %v2483_v1  ;;  %v285_v1 = vmul.f32 %v2533_v15, %v2533_v15 }
  0x4f   :  { %v373_v29 = vadd.f32 %v372_v9, %v282_v10  ;;  %v289_v15 = vmul.f32 %v2559_v23, %v2559_v23  ;;  %v293_v23 = vmul.f32 %v2585_v31, %v2585_v31  ;;  %v297_v31 = vmul.f32 %v2611_v39, %v2611_v39 }
  0x50   :  { %v360_v19 = vsel %vm107_vm0, %v277_v25, 0.0  ;;  %v376_v37 = vsel %vm107_vm0, %v285_v1, 0.0  ;;  %v388_v25 = vsel %vm107_vm0, %v291_v14, 0.0  ;;  %v301_v39 = vmul.f32 %v2637_v47, %v2637_v47 }
  0x51   :  { %266 = vadd.xlane.f32.xlu1 %v265_v21  ;;  %v368_v21 = vsel %vm107_vm0, %v281_v4, 0.0  ;;  %v377_v13 = vadd.f32 %v376_v37, %v284_v0  ;;  %v392_v10 = vsel %vm107_vm0, %v293_v23, 0.0  ;;  %v305_v47 = vmul.f32 %v2663_v55, %v2663_v55 }
  0x52   :  { %262 = vadd.xlane.f32.xlu0 %v261_v51  ;;  %v361_v51 = vadd.f32 %v360_v19, %v276_v45  ;;  %v369_v19 = vadd.f32 %v368_v21, %v280_v2  ;;  %v380_v45 = vsel %vm107_vm0, %v287_v6, 0.0  ;;  %v393_v9 = vadd.f32 %v392_v10, %v292_v28 }
  0x53   :  { %v381_v57 = vadd.f32 %v380_v45, %v286_v5  ;;  %v404_v2 = vsel %vm107_vm0, %v299_v30, 0.0  ;;  %v400_v6 = vsel %vm107_vm0, %v297_v31, 0.0  ;;  %v408_v5 = vsel %vm107_vm0, %v301_v39, 0.0 }
  0x54   :  { %v405_v21 = vadd.f32 %v404_v2, %v298_v34  ;;  %v401_v1 = vadd.f32 %v400_v6, %v296_v36  ;;  %v409_v45 = vadd.f32 %v408_v5, %v300_v44  ;;  %v420_v0 = vsel %vm107_vm0, %v307_v46, 0.0  ;;  %v5718_v2 = vld [vmem:[#allocation3_spill] sm:$0xff]  ;;  %v5719_v36 = vld [vmem:[#allocation4_spill] sm:$0xff]  ;;  %v5720_v6 = vld [vmem:[#allocation5_spill] sm:$0xff] }
  0x55   :  { %274 = vadd.xlane.f32.xlu1 %v273_v61  ;;  %v384_v61 = vsel %vm107_vm0, %v289_v15, 0.0  ;;  %v304_v52 = vmul.f32 %v2677_v60, %v2677_v60  ;;  %v311_v54 = vmul.f32 %v2684_v62, %v2684_v62  ;;  %v416_v14 = vsel %vm107_vm0, %v305_v47, 0.0  ;;  %v5722_v44 = vld [vmem:[#allocation7_spill] sm:$0xff]  ;;  %v5723_v5 = vld [vmem:[#allocation8_spill] sm:$0xff] }
  0x56   :  { %270 = vadd.xlane.f32.xlu0 %v269_v11  ;;  %v389_v11 = vadd.f32 %v388_v25, %v290_v18  ;;  %v385_v4 = vadd.f32 %v384_v61, %v288_v20  ;;  %v309_v55 = vmul.f32 %v2689_v63, %v2689_v63  ;;  %v421_v37 = vadd.f32 %v420_v0, %v306_v50  ;;  %v5724_v50 = vld [vmem:[#allocation9_spill] sm:$0xff] }
  0x57   :  { %v310_v58 = vmul.f32 %v2696_v8, %v2696_v8  ;;  %v417_v15 = vadd.f32 %v416_v14, %v304_v52  ;;  %v308_v60 = vmul.f32 %v2703_v12, %v2703_v12  ;;  %v315_v62 = vmul.f32 %v2710_v16, %v2710_v16  ;;  %v5725_v52 = vld [vmem:[#allocation10_spill] sm:$0xff]  ;;  %v5726_v14 = vld [vmem:[#allocation12_spill] sm:$0xff] }
  0x58   :  { %v424_v18 = vsel %vm107_vm0, %v309_v55, 0.0  ;;  %v313_v63 = vmul.f32 %v2715_v17, %v2715_v17  ;;  %v314_v8 = vmul.f32 %v2722_v24, %v2722_v24  ;;  %v312_v12 = vmul.f32 %v2729_v27, %v2729_v27 }
  0x59   :  { %366 = vadd.xlane.f32.xlu1 %v365_v53  ;;  %v396_v53 = vsel %vm107_vm0, %v295_v22, 0.0  ;;  %v425_v25 = vadd.f32 %v424_v18, %v308_v60  ;;  %v436_v20 = vsel %vm107_vm0, %v315_v62, 0.0  ;;  %v319_v16 = vmul.f32 %v2736_v32, %v2736_v32  ;;  %v5728_v60 = vld [vmem:[#allocation13_spill] sm:$0xff] }
  0x5a   :  { %362 = vadd.xlane.f32.xlu0 %v361_v51  ;;  %v397_v51 = vadd.f32 %v396_v53, %v294_v26  ;;  %v432_v22 = vsel %vm107_vm0, %v313_v63, 0.0  ;;  %v317_v17 = vmul.f32 %v2741_v33, %v2741_v33  ;;  %v437_v61 = vadd.f32 %v436_v20, %v314_v8  ;;  %v1790_v63 = vld [vmem:[%s5593_s3 + $0x10] sm:$0xff] }
  0x5b   :  { %v318_v24 = vmul.f32 %v2748_v40, %v2748_v40  ;;  %v316_v23 = vmul.f32 %v2755_v43, %v2755_v43  ;;  %v444_v27 = vsel %vm107_vm0, %v319_v16, 0.0  ;;  %v323_v32 = vmul.f32 %v2762_v48, %v2762_v48  ;;  %v5730_v16 = vld [vmem:[#allocation15_spill] sm:$0xff] }
  0x5c   :  { %v440_v26 = vsel %vm107_vm0, %v317_v17, 0.0  ;;  %v321_v33 = vmul.f32 %v2767_v49, %v2767_v49  ;;  %v322_v43 = vmul.f32 %v2774_v56, %v2774_v56  ;;  %v320_v48 = vmul.f32 %v2781_v59, %v2781_v59  ;;  %v5731_v17 = vld [vmem:[#allocation16_spill] sm:$0xff] }
  0x5d   :  { %374 = vadd.xlane.f32.xlu1 %v373_v29  ;;  %v412_v29 = vsel %vm107_vm0, %v303_v38, 0.0  ;;  %v445_v40 = vadd.f32 %v444_v27, %v318_v24  ;;  %v441_v53 = vadd.f32 %v440_v26, %v316_v23  ;;  %v452_v28 = vsel %vm107_vm0, %v323_v32, 0.0  ;;  %v5732_v27 = vld [vmem:[#allocation17_spill] sm:$0xff] }
  0x5e   :  { %370 = vadd.xlane.f32.xlu0 %v369_v19  ;;  %v413_v19 = vadd.f32 %v412_v29, %v302_v42  ;;  %v327_v30 = vmul.f32 %v2788_v3, %v2788_v3  ;;  %v448_v49 = vsel %vm107_vm0, %v321_v33, 0.0  ;;  %v325_v10 = vmul.f32 %v2793_v7, %v2793_v7 }
  0x5f   :  { %v453_v31 = vadd.f32 %v452_v28, %v322_v43  ;;  %v449_v34 = vadd.f32 %v448_v49, %v320_v48  ;;  %v324_v59 = vmul.f32 %v5718_v2, %v5718_v2  ;;  %v331_v3 = vmul.f32 %v5719_v36, %v5719_v36  ;;  %v5735_v48 = vld [vmem:[#allocation18_spill] sm:$0xff]  ;;  %v5737_v36 = vld [vmem:[#allocation20_spill] sm:$0xff] }
  0x60   :  { %v456_v38 = vsel %vm107_vm0, %v325_v10, 0.0  ;;  %v329_v7 = vmul.f32 %v5720_v6, %v5720_v6  ;;  %v328_v46 = vmul.f32 %v5722_v44, %v5722_v44  ;;  %v335_v47 = vmul.f32 %v5723_v5, %v5723_v5  ;;  %v1789_v10 = vld [vmem:[%s5593_s3 + $0x8] sm:$0xff]  ;;  %v5741_v5 = vld [vmem:[#allocation22_spill] sm:$0xff] }
  0x61   :  { %382 = vadd.xlane.f32.xlu1 %v381_v57  ;;  %v428_v57 = vsel %vm107_vm0, %v311_v54, 0.0  ;;  %v468_v29 = vsel %vm107_vm0, %v331_v3, 0.0  ;;  %v334_v54 = vmul.f32 %v5725_v52, %v5725_v52  ;;  %v339_v55 = vmul.f32 %v5726_v14, %v5726_v14  ;;  %v1795_v52 = vld [vmem:[%s5593_s3 + $0x38] sm:$0xff] }
  0x62   :  { %378 = vadd.xlane.f32.xlu0 %v377_v13  ;;  %v429_v13 = vadd.f32 %v428_v57, %v310_v58  ;;  %v476_v58 = vsel %vm107_vm0, %v335_v47, 0.0  ;;  %v337_v62 = vmul.f32 %v5728_v60, %v5728_v60  ;;  %v341_v32 = vmul.f32 %v5732_v27, %v5732_v27  ;;  %v5747_v27 = vld [vmem:[#allocation26_spill] sm:$0xff] }
  0x63   :  { %v477_v20 = vadd.f32 %v476_v58, %v334_v54  ;;  %v1832_v26 = vmul.f32 0.9, %v1790_v63  ;;  %v347_v3 = vmul.f32 %v5737_v36, %v5737_v36  ;;  %v346_v47 = vmul.f32 %v5741_v5, %v5741_v5  ;;  %v5742_v54 = vld [vmem:[#allocation23_spill] sm:$0xff] }
  0x64   :  { %v344_v14 = vmul.f32 %v5742_v54, %v5742_v54 }
  0x65   :  { %390 = vadd.xlane.f32.xlu1 %v389_v11  ;;  %v433_v11 = vadd.f32 %v432_v22, %v312_v12  ;;  %v484_v12 = vsel %vm107_vm0, %v339_v55, 0.0  ;;  %v336_v22 = vmul.f32 %v5730_v16, %v5730_v16  ;;  %v500_v58 = vsel %vm107_vm0, %v347_v3, 0.0 }
  0x66   :  { %386 = vadd.xlane.f32.xlu0 %v385_v4  ;;  %v2434_v4 = vmov 0  }
  0x67   :  { %2265 = vset.pattern.permute.xlu1 %v2434_v4  ;;  %2264 = vset.pattern.permute.xlu0 %v2434_v4 }
  0x69   :  { %398 = vadd.xlane.f32.xlu1 %v397_v51  ;;  %v5717_v51 = vld [vmem:[#allocation2_spill] sm:$0xff] }
  0x6a   :  { %394 = vadd.xlane.f32.xlu0 %v393_v9  ;;  %v326_v56 = vmul.f32 %v5717_v51, %v5717_v51  ;;  %v460_v9 = vsel %vm107_vm0, %v327_v30, 0.0  ;;  %v342_v30 = vmul.f32 %v5735_v48, %v5735_v48  ;;  %v5749_v48 = vld [vmem:[#allocation28_spill] sm:$0xff] }
  0x6c   :  { %v461_v39 = vadd.f32 %v460_v9, %v326_v56  ;;  %v5736_v56 = vld [vmem:[#allocation19_spill] sm:$0xff] }
  0x6d   :  { %406 = vadd.xlane.f32.xlu1 %v405_v21  ;;  %v5721_v21 = vld [vmem:[#allocation6_spill] sm:$0xff] }
  0x6e   :  { %402 = vadd.xlane.f32.xlu0 %v401_v1  ;;  %v330_v42 = vmul.f32 %v5721_v21, %v5721_v21  ;;  %v457_v1 = vadd.f32 %v456_v38, %v324_v59  ;;  %v488_v59 = vsel %vm107_vm0, %v341_v32, 0.0  ;;  %v5738_v38 = vld [vmem:[#allocation21_spill] sm:$0xff]  ;;  %v350_v32 = vmul.f32 %v5747_v27, %v5747_v27 }
  0x6f   :  { %v345_v6 = vmul.f32 %v5738_v38, %v5738_v38  ;;  %v1796_v38 = vld [vmem:[%s5593_s3 + $0x40] sm:$0xff] }
  0x70   :  { %v469_v0 = vadd.f32 %v468_v29, %v330_v42  ;;  %v1831_v29 = vmul.f32 0.9, %v1789_v10 }
  0x71   :  { %414 = vadd.xlane.f32.xlu1 %v413_v19  ;;  %v464_v19 = vsel %vm107_vm0, %v329_v7, 0.0 }
  0x72   :  { %410 = vadd.xlane.f32.xlu0 %v409_v45  ;;  %v333_v45 = vmul.f32 %v5724_v50, %v5724_v50  ;;  %v1792_v50 = vld [vmem:[%s5593_s3 + $0x20] sm:$0xff] }
  0x74   :  { %v472_v18 = vsel %vm107_vm0, %v333_v45, 0.0 }
  0x75   :  { %422 = vadd.xlane.f32.xlu1 %v421_v37  ;;  %v465_v37 = vadd.f32 %v464_v19, %v328_v46  ;;  %v1793_v46 = vld [vmem:[%s5593_s3 + $0x28] sm:$0xff] }
  0x76   :  { %418 = vadd.xlane.f32.xlu0 %v417_v15  ;;  %v5727_v15 = vld [vmem:[#allocation11_spill] sm:$0xff] }
  0x77   :  { %v332_v57 = vmul.f32 %v5727_v15, %v5727_v15  ;;  %v496_v15 = vsel %vm107_vm0, %v345_v6, 0.0 }
  0x79   :  { %430 = vadd.xlane.f32.xlu1 %v429_v13  ;;  %v5729_v13 = vld [vmem:[#allocation14_spill] sm:$0xff]  ;;  %v473_v23 = vadd.f32 %v472_v18, %v332_v57  ;;  %v5743_v57 = vld [vmem:[#allocation24_spill] sm:$0xff]  ;;  %v1835_v18 = vmul.f32 0.9, %v1793_v46 }
  0x7a   :  { %426 = vadd.xlane.f32.xlu0 %v425_v25  ;;  %v338_v8 = vmul.f32 %v5729_v13, %v5729_v13  ;;  %v1788_v25 = vld [vmem:[%s5593_s3] sm:$0xff]  ;;  %v351_v60 = vmul.f32 %v5743_v57, %v5743_v57  ;;  %v1799_v57 = vld [vmem:[%s5593_s3 + $0x58] sm:$0xff] }
  0x7c   :  { %v485_v28 = vadd.f32 %v484_v12, %v338_v8  ;;  %v5745_v8 = vld [vmem:[#allocation25_spill] sm:$0xff]  ;;  %v1834_v12 = vmul.f32 0.9, %v1792_v50 }
  0x7d   :  { %438 = vadd.xlane.f32.xlu1 %v437_v61  ;;  %v343_v61 = vmul.f32 %v5731_v17, %v5731_v17 }
  0x7e   :  { %434 = vadd.xlane.f32.xlu0 %v433_v11  ;;  %v480_v11 = vsel %vm107_vm0, %v337_v62, 0.0 }
  0x7f   :  { %v492_v51 = vsel %vm107_vm0, %v343_v61, 0.0  ;;  %v1794_v61 = vld [vmem:[%s5593_s3 + $0x30] sm:$0xff] }
  0x80   :  { %v493_v45 = vadd.f32 %v492_v51, %v342_v30  ;;  %v355_v30 = vmul.f32 %v5749_v48, %v5749_v48 }
  0x81   :  { %446 = vadd.xlane.f32.xlu1 %v445_v40  ;;  %v1830_v40 = vmul.f32 0.9, %v1788_v25  ;;  %v349_v25 = vmul.f32 %v5745_v8, %v5745_v8 }
  0x82   :  { %442 = vadd.xlane.f32.xlu0 %v441_v53  ;;  %v1791_v53 = vld [vmem:[%s5593_s3 + $0x18] sm:$0xff] }
  0x83   :  { %v504_v51 = vsel %vm107_vm0, %v349_v25, 0.0 }
  0x85   :  { %454 = vadd.xlane.f32.xlu1 %v453_v31  ;;  %v481_v31 = vadd.f32 %v480_v11, %v336_v22  ;;  %v1837_v22 = vmul.f32 0.9, %v1795_v52  ;;  %v1797_v11 = vld [vmem:[%s5593_s3 + $0x48] sm:$0xff] }
  0x86   :  { %450 = vadd.xlane.f32.xlu0 %v449_v34  ;;  %v340_v34 = vmul.f32 %v5736_v56, %v5736_v56  ;;  %v5751_v56 = vld [vmem:[#allocation29_spill] sm:$0xff]  ;;  %v1839_v36 = vmul.f32 0.9, %v1797_v11 }
  0x89   :  { %462 = vadd.xlane.f32.xlu1 %v461_v39  ;;  %v1833_v39 = vmul.f32 0.9, %v1791_v53  ;;  %v5748_v53 = vld [vmem:[#allocation27_spill] sm:$0xff] }
  0x8a   :  { %458 = vadd.xlane.f32.xlu0 %v457_v1 }
  0x8d   :  { %470 = vadd.xlane.f32.xlu1 %v469_v0  ;;  %v489_v0 = vadd.f32 %v488_v59, %v340_v34  ;;  %v353_v34 = vmul.f32 %v5751_v56, %v5751_v56 }
  0x8e   :  { %466 = vadd.xlane.f32.xlu0 %v465_v37  ;;  %v119_v24 = vpop.xlane.xlu1 %118 }
  0x8f   :  { %v3191_v33 = vmul.f32 0.0051020407, %v119_v24  ;;  %v111_v4 = vpop.xlane.xlu0 %110  ;;  %v501_v24 = vadd.f32 %v500_v58, %v346_v47  ;;  %v516_v47 = vsel %vm107_vm0, %v355_v30, 0.0  ;;  %v512_v54 = vsel %vm107_vm0, %v353_v34, 0.0 }
  0x90   :  { %v3193_v43 = vmul.f32 0.0051020407, %v111_v4  ;;  %v1838_v58 = vmul.f32 0.9, %v1796_v38 }
  0x91   :  { %5733 = vst [vmem:[#allocation2_spill] sm:$0xff] %v3191_v33  ;;  %v1874_v49 = vmul.f32 0.1, %v3191_v33  ;;  %478 = vadd.xlane.f32.xlu1 %v477_v20 }
  0x92   :  { %5734 = vst [vmem:[#allocation3_spill] sm:$0xff] %v3193_v43  ;;  %v1872_v9 = vmul.f32 0.1, %v3193_v43  ;;  %474 = vadd.xlane.f32.xlu0 %v473_v23  ;;  %v123_v2 = vpop.xlane.xlu1 %122  ;;  %v497_v23 = vadd.f32 %v496_v15, %v344_v14  ;;  %v5757_v14 = vld [vmem:[#allocation33_spill] sm:$0xff] }
  0x93   :  { %v1916_v7 = vadd.f32 %v1874_v49, %v1832_v26  ;;  %v3213_v21 = vmul.f32 0.0051020407, %v123_v2  ;;  %v115_v42 = vpop.xlane.xlu0 %114  ;;  %v1836_v2 = vmul.f32 0.9, %v1794_v61  ;;  %v1841_v61 = vmul.f32 0.9, %v1799_v57 }
  0x94   :  { %v1914_v1 = vadd.f32 %v1872_v9, %v1830_v40  ;;  %v3215_v44 = vmul.f32 0.0051020407, %v115_v42  ;;  %v508_v40 = vsel %vm107_vm0, %v351_v60, 0.0  ;;  %v5754_v42 = vld [vmem:[#allocation31_spill] sm:$0xff] }
  0x95   :  { %5739 = vst [vmem:[#allocation4_spill] sm:$0xff] %v3213_v21  ;;  %1959 = vst.msk [vmem:[%s5594_s6 + $0x10] sm:$0xff] %vm1956_vm1, %v1916_v7  ;;  %v1875_v19 = vmul.f32 0.1, %v3213_v21  ;;  %486 = vadd.xlane.f32.xlu1 %v485_v28  ;;  %v348_v28 = vmul.f32 %v5748_v53, %v5748_v53  ;;  %v509_v6 = vadd.f32 %v508_v40, %v350_v32  ;;  %v5753_v7 = vld [vmem:[#allocation30_spill] sm:$0xff] }
  0x96   :  { %5740 = vst [vmem:[#allocation5_spill] sm:$0xff] %v3215_v44  ;;  %1957 = vst.msk [vmem:[%s5594_s6] sm:$0xff] %vm1956_vm1, %v1914_v1  ;;  %v1873_v55 = vmul.f32 0.1, %v3215_v44  ;;  %482 = vadd.xlane.f32.xlu0 %v481_v31  ;;  %v131_v37 = vpop.xlane.xlu1 %130  ;;  %v352_v1 = vmul.f32 %v5754_v42, %v5754_v42 }
  0x97   :  { %v1917_v62 = vadd.f32 %v1875_v19, %v1833_v39  ;;  %v3244_v63 = vmul.f32 0.0051020407, %v131_v37  ;;  %v127_v13 = vpop.xlane.xlu0 %126  ;;  %v354_v39 = vmul.f32 %v5753_v7, %v5753_v7  ;;  %v505_v5 = vadd.f32 %v504_v51, %v348_v28  ;;  %v5755_v19 = vld [vmem:[#allocation32_spill] sm:$0xff] }
  0x98   :  { %v1915_v20 = vadd.f32 %v1873_v55, %v1831_v29  ;;  %v3248_v16 = vmul.f32 0.0051020407, %v127_v13  ;;  %v359_v50 = vmul.f32 %v5755_v19, %v5755_v19  ;;  %v357_v55 = vmul.f32 %v5757_v14, %v5757_v14 }
  0x99   :  { %5744 = vst [vmem:[#allocation6_spill] sm:$0xff] %v3244_v63  ;;  %1960 = vst.msk [vmem:[%s5594_s6 + $0x18] sm:$0xff] %vm1956_vm1, %v1917_v62  ;;  %v1877_v17 = vmul.f32 0.1, %v3244_v63  ;;  %494 = vadd.xlane.f32.xlu1 %v493_v45  ;;  %v1798_v62 = vld [vmem:[%s5593_s3 + $0x50] sm:$0xff]  ;;  %v358_v13 = vmul.f32 %v3008_v35, %v3008_v35 }
  0x9a   :  { %5746 = vst [vmem:[#allocation7_spill] sm:$0xff] %v3248_v16  ;;  %1958 = vst.msk [vmem:[%s5594_s6 + $0x8] sm:$0xff] %vm1956_vm1, %v1915_v20  ;;  %v1876_v26 = vmul.f32 0.1, %v3248_v16  ;;  %490 = vadd.xlane.f32.xlu0 %v489_v0  ;;  %v139_v4 = vpop.xlane.xlu1 %138  ;;  %v513_v20 = vadd.f32 %v512_v54, %v352_v1  ;;  %v1840_v27 = vmul.f32 0.9, %v1798_v62 }
  0x9b   :  { %v1919_v49 = vadd.f32 %v1877_v17, %v1835_v18  ;;  %v3273_v10 = vmul.f32 0.0051020407, %v139_v4  ;;  %v135_v31 = vpop.xlane.xlu0 %134  ;;  %v517_v18 = vadd.f32 %v516_v47, %v354_v39  ;;  %v1800_v4 = vld [vmem:[%s5593_s3 + $0x60] sm:$0xff]  ;;  %v1805_v47 = vld [vmem:[%s5593_s3 + $0x88] sm:$0xff] }
  0x9c   :  { %v1918_v9 = vadd.f32 %v1876_v26, %v1834_v12  ;;  %v3278_v59 = vmul.f32 0.0051020407, %v135_v31  ;;  %v524_v12 = vsel %vm107_vm0, %v359_v50, 0.0  ;;  %v1801_v26 = vld [vmem:[%s5593_s3 + $0x68] sm:$0xff]  ;;  %v1842_v34 = vmul.f32 0.9, %v1800_v4 }
  0x9d   :  { %5750 = vst [vmem:[#allocation8_spill] sm:$0xff] %v3273_v10  ;;  %1962 = vst.msk [vmem:[%s5594_s6 + $0x28] sm:$0xff] %vm1956_vm1, %v1919_v49  ;;  %v1879_v3 = vmul.f32 0.1, %v3273_v10  ;;  %502 = vadd.xlane.f32.xlu1 %v501_v24  ;;  %v525_v40 = vadd.f32 %v524_v12, %v358_v13  ;;  %v1843_v49 = vmul.f32 0.9, %v1801_v26 }
  0x9e   :  { %5752 = vst [vmem:[#allocation9_spill] sm:$0xff] %v3278_v59  ;;  %1961 = vst.msk [vmem:[%s5594_s6 + $0x20] sm:$0xff] %vm1956_vm1, %v1918_v9  ;;  %v1878_v29 = vmul.f32 0.1, %v3278_v59  ;;  %498 = vadd.xlane.f32.xlu0 %v497_v23  ;;  %v147_v46 = vpop.xlane.xlu1 %146  ;;  %v520_v23 = vsel %vm107_vm0, %v357_v55, 0.0  ;;  %v1804_v50 = vld [vmem:[%s5593_s3 + $0x80] sm:$0xff] }
  0x9f   :  { %v1921_v45 = vadd.f32 %v1879_v3, %v1837_v22  ;;  %v3300_v0 = vmul.f32 0.0051020407, %v147_v46  ;;  %v143_v52 = vpop.xlane.xlu0 %142  ;;  %v356_v22 = vmul.f32 %v3017_v41, %v3017_v41  ;;  %v1802_v3 = vld [vmem:[%s5593_s3 + $0x70] sm:$0xff]  ;;  %v1809_v55 = vld [vmem:[%s5593_s3 + $0xa8] sm:$0xff] }
  0xa0   :  { %v1920_v37 = vadd.f32 %v1878_v29, %v1836_v2  ;;  %v3305_v15 = vmul.f32 0.0051020407, %v143_v52  ;;  %v1803_v2 = vld [vmem:[%s5593_s3 + $0x78] sm:$0xff]  ;;  %v1844_v46 = vmul.f32 0.9, %v1802_v3  ;;  %v1806_v52 = vld [vmem:[%s5593_s3 + $0x90] sm:$0xff] }
  0xa1   :  { %5756 = vst [vmem:[#allocation10_spill] sm:$0xff] %v3300_v0  ;;  %1964 = vst.msk [vmem:[%s5594_s6 + $0x38] sm:$0xff] %vm1956_vm1, %v1921_v45  ;;  %v1881_v60 = vmul.f32 0.1, %v3300_v0  ;;  %510 = vadd.xlane.f32.xlu1 %v509_v6  ;;  %v521_v48 = vadd.f32 %v520_v23, %v356_v22  ;;  %v1845_v39 = vmul.f32 0.9, %v1803_v2 }
  0xa2   :  { %5758 = vst [vmem:[#allocation12_spill] sm:$0xff] %v3305_v15  ;;  %1963 = vst.msk [vmem:[%s5594_s6 + $0x30] sm:$0xff] %vm1956_vm1, %v1920_v37  ;;  %v1880_v8 = vmul.f32 0.1, %v3305_v15  ;;  %506 = vadd.xlane.f32.xlu0 %v505_v5  ;;  %v155_v25 = vpop.xlane.xlu1 %154  ;;  %v1807_v45 = vld [vmem:[%s5593_s3 + $0x98] sm:$0xff]  ;;  %v1808_v37 = vld [vmem:[%s5593_s3 + $0xa0] sm:$0xff] }
  0xa3   :  { %v1923_v17 = vadd.f32 %v1881_v60, %v1839_v36  ;;  %v3328_v24 = vmul.f32 0.0051020407, %v155_v25  ;;  %v151_v35 = vpop.xlane.xlu0 %150  ;;  %v1847_v60 = vmul.f32 0.9, %v1805_v47  ;;  %v1810_v13 = vld [vmem:[%s5593_s3 + $0xb0] sm:$0xff]  ;;  %v1815_v23 = vld [vmem:[%s5593_s3 + $0xd8] sm:$0xff] }
  0xa4   :  { %v1922_v11 = vadd.f32 %v1880_v8, %v1838_v58  ;;  %v3331_v32 = vmul.f32 0.0051020407, %v151_v35  ;;  %v1811_v58 = vld [vmem:[%s5593_s3 + $0xb8] sm:$0xff]  ;;  %v1813_v8 = vld [vmem:[%s5593_s3 + $0xc8] sm:$0xff]  ;;  %v1849_v22 = vmul.f32 0.9, %v1807_v45 }
  0xa5   :  { %5759 = vst [vmem:[#allocation11_spill] sm:$0xff] %v3328_v24  ;;  %1966 = vst.msk [vmem:[%s5594_s6 + $0x48] sm:$0xff] %vm1956_vm1, %v1923_v17  ;;  %v1883_v41 = vmul.f32 0.1, %v3328_v24  ;;  %518 = vadd.xlane.f32.xlu1 %v517_v18  ;;  %v1812_v35 = vld [vmem:[%s5593_s3 + $0xc0] sm:$0xff]  ;;  %v1819_v47 = vld [vmem:[%s5593_s3 + $0xf8] sm:$0xff] }
  0xa6   :  { %5760 = vst [vmem:[#allocation13_spill] sm:$0xff] %v3331_v32  ;;  %1965 = vst.msk [vmem:[%s5594_s6 + $0x40] sm:$0xff] %vm1956_vm1, %v1922_v11  ;;  %v1882_v53 = vmul.f32 0.1, %v3331_v32  ;;  %514 = vadd.xlane.f32.xlu0 %v513_v20  ;;  %v163_v28 = vpop.xlane.xlu1 %162  ;;  %v1846_v20 = vmul.f32 0.9, %v1804_v50 }
  0xa7   :  { %v1925_v30 = vadd.f32 %v1883_v41, %v1841_v61  ;;  %v3349_v31 = vmul.f32 0.0051020407, %v163_v28  ;;  %v159_v51 = vpop.xlane.xlu0 %158  ;;  %v1848_v61 = vmul.f32 0.9, %v1806_v52  ;;  %v1851_v26 = vmul.f32 0.9, %v1809_v55 }
  0xa8   :  { %v1924_v56 = vadd.f32 %v1882_v53, %v1840_v27  ;;  %v3351_v9 = vmul.f32 0.0051020407, %v159_v51  ;;  %v1850_v41 = vmul.f32 0.9, %v1808_v37  ;;  %v1853_v28 = vmul.f32 0.9, %v1811_v58 }
  0xa9   :  { %5761 = vst [vmem:[#allocation14_spill] sm:$0xff] %v3349_v31  ;;  %1968 = vst.msk [vmem:[%s5594_s6 + $0x58] sm:$0xff] %vm1956_vm1, %v1925_v30  ;;  %v1885_v36 = vmul.f32 0.1, %v3349_v31  ;;  %526 = vadd.xlane.f32.xlu1 %v525_v40  ;;  %v3434_v51 = vmul.f32 0.9, %v1813_v8 }
  0xaa   :  { %5762 = vst [vmem:[#allocation15_spill] sm:$0xff] %v3351_v9  ;;  %1967 = vst.msk [vmem:[%s5594_s6 + $0x50] sm:$0xff] %vm1956_vm1, %v1924_v56  ;;  %v1884_v38 = vmul.f32 0.1, %v3351_v9  ;;  %522 = vadd.xlane.f32.xlu0 %v521_v48  ;;  %v171_v6 = vpop.xlane.xlu1 %170  ;;  %v1852_v48 = vmul.f32 0.9, %v1810_v13 }
  0xab   :  { %v1927_v7 = vadd.f32 %v1885_v36, %v1843_v49  ;;  %v3369_v42 = vmul.f32 0.0051020407, %v171_v6  ;;  %v167_v1 = vpop.xlane.xlu0 %166  ;;  %v1814_v56 = vld [vmem:[%s5593_s3 + $0xd0] sm:$0xff]  ;;  %v3444_v2 = vmul.f32 0.9, %v1812_v35  ;;  %v1817_v36 = vld [vmem:[%s5593_s3 + $0xe8] sm:$0xff] }
  0xac   :  { %v1926_v29 = vadd.f32 %v1884_v38, %v1842_v34  ;;  %v3371_v5 = vmul.f32 0.0051020407, %v167_v1  ;;  %v3454_v6 = vmul.f32 0.9, %v1815_v23  ;;  %v3468_v45 = vmul.f32 0.9, %v1817_v36 }
  0xad   :  { %5763 = vst [vmem:[#allocation16_spill] sm:$0xff] %v3369_v42  ;;  %1970 = vst.msk [vmem:[%s5594_s6 + $0x68] sm:$0xff] %vm1956_vm1, %v1927_v7  ;;  %v1887_v19 = vmul.f32 0.1, %v3369_v42  ;;  %v1816_v7 = vld [vmem:[%s5593_s3 + $0xe0] sm:$0xff]  ;;  %v1818_v52 = vld [vmem:[%s5593_s3 + $0xf0] sm:$0xff] }
  0xae   :  { %5764 = vst [vmem:[#allocation17_spill] sm:$0xff] %v3371_v5  ;;  %1969 = vst.msk [vmem:[%s5594_s6 + $0x60] sm:$0xff] %vm1956_vm1, %v1926_v29  ;;  %v1886_v54 = vmul.f32 0.1, %v3371_v5  ;;  %v179_v14 = vpop.xlane.xlu1 %178  ;;  %v1821_v55 = vld [vmem:[%s5593_s3 + $0x108] sm:$0xff]  ;;  %v1822_v35 = vld [vmem:[%s5593_s3 + $0x110] sm:$0xff] }
  0xaf   :  { %v1929_v57 = vadd.f32 %v1887_v19, %v1845_v39  ;;  %v3404_v62 = vmul.f32 0.0051020407, %v179_v14  ;;  %v175_v18 = vpop.xlane.xlu0 %174  ;;  %v3478_v14 = vmul.f32 0.9, %v1816_v7  ;;  %v3529_v36 = vmul.f32 0.9, %v1822_v35 }
  0xb0   :  { %v1928_v25 = vadd.f32 %v1886_v54, %v1844_v46  ;;  %v3412_v12 = vmul.f32 0.0051020407, %v175_v18  ;;  %v3461_v46 = vmul.f32 0.9, %v1814_v56 }
  0xb1   :  { %5765 = vst [vmem:[#allocation18_spill] sm:$0xff] %v3404_v62  ;;  %1972 = vst.msk [vmem:[%s5594_s6 + $0x78] sm:$0xff] %vm1956_vm1, %v1929_v57  ;;  %v1889_v17 = vmul.f32 0.1, %v3404_v62  ;;  %v3488_v57 = vmul.f32 0.9, %v1819_v47 }
  0xb2   :  { %5766 = vst [vmem:[#allocation19_spill] sm:$0xff] %v3412_v12  ;;  %1971 = vst.msk [vmem:[%s5594_s6 + $0x70] sm:$0xff] %vm1956_vm1, %v1928_v25  ;;  %v1888_v11 = vmul.f32 0.1, %v3412_v12  ;;  %v187_v27 = vpop.xlane.xlu1 %186  ;;  %v3495_v25 = vmul.f32 0.9, %v1818_v52 }
  0xb3   :  { %v1931_v4 = vadd.f32 %v1889_v17, %v1847_v60  ;;  %v3430_v40 = vmul.f32 0.0051020407, %v187_v27  ;;  %v183_v53 = vpop.xlane.xlu0 %182  ;;  %v1820_v60 = vld [vmem:[%s5593_s3 + $0x100] sm:$0xff]  ;;  %v1825_v27 = vld [vmem:[%s5593_s3 + $0x128] sm:$0xff] }
  0xb4   :  { %v1930_v30 = vadd.f32 %v1888_v11, %v1846_v20  ;;  %v3432_v49 = vmul.f32 0.0051020407, %v183_v53  ;;  %v1823_v20 = vld [vmem:[%s5593_s3 + $0x118] sm:$0xff]  ;;  %v3512_v11 = vmul.f32 0.9, %v1820_v60  ;;  %v1824_v53 = vld [vmem:[%s5593_s3 + $0x120] sm:$0xff] }
  0xb5   :  { %5767 = vst [vmem:[#allocation20_spill] sm:$0xff] %v3430_v40  ;;  %1974 = vst.msk [vmem:[%s5594_s6 + $0x88] sm:$0xff] %vm1956_vm1, %v1931_v4  ;;  %v1891_v34 = vmul.f32 0.1, %v3430_v40  ;;  %v3522_v4 = vmul.f32 0.9, %v1823_v20 }
  0xb6   :  { %5768 = vst [vmem:[#allocation21_spill] sm:$0xff] %v3432_v49  ;;  %1973 = vst.msk [vmem:[%s5594_s6 + $0x80] sm:$0xff] %vm1956_vm1, %v1930_v30  ;;  %v1890_v3 = vmul.f32 0.1, %v3432_v49  ;;  %v195_v38 = vpop.xlane.xlu1 %194  ;;  %v3546_v47 = vmul.f32 0.9, %v1824_v53 }
  0xb7   :  { %v1933_v39 = vadd.f32 %v1891_v34, %v1849_v22  ;;  %v3459_v1 = vmul.f32 0.0051020407, %v195_v38  ;;  %v191_v29 = vpop.xlane.xlu0 %190 }
  0xb8   :  { %v1932_v19 = vadd.f32 %v1890_v3, %v1848_v61  ;;  %v3466_v50 = vmul.f32 0.0051020407, %v191_v29  ;;  %v3502_v61 = vmul.f32 0.9, %v1821_v55  ;;  %v1827_v3 = vld [vmem:[%s5593_s3 + $0x138] sm:$0xff]  ;;  %v1826_v29 = vld [vmem:[%s5593_s3 + $0x130] sm:$0xff] }
  0xb9   :  { %5769 = vst [vmem:[#allocation22_spill] sm:$0xff] %v3459_v1  ;;  %1976 = vst.msk [vmem:[%s5594_s6 + $0x98] sm:$0xff] %vm1956_vm1, %v1933_v39  ;;  %v1893_v54 = vmul.f32 0.1, %v3459_v1  ;;  %v3536_v39 = vmul.f32 0.9, %v1825_v27 }
  0xba   :  { %5770 = vst [vmem:[#allocation23_spill] sm:$0xff] %v3466_v50  ;;  %1975 = vst.msk [vmem:[%s5594_s6 + $0x90] sm:$0xff] %vm1956_vm1, %v1932_v19  ;;  %v1892_v37 = vmul.f32 0.1, %v3466_v50  ;;  %v203_v58 = vpop.xlane.xlu1 %202  ;;  %v1828_v55 = vld [vmem:[%s5593_s3 + $0x140] sm:$0xff] }
  0xbb   :  { %v1935_v18 = vadd.f32 %v1893_v54, %v1851_v26  ;;  %v3493_v13 = vmul.f32 0.0051020407, %v203_v58  ;;  %v199_v8 = vpop.xlane.xlu0 %198  ;;  %v3556_v54 = vmul.f32 0.9, %v1827_v3  ;;  %v3582_v27 = vmul.f32 0.9, %v1828_v55 }
  0xbc   :  { %v1934_v22 = vadd.f32 %v1892_v37, %v1850_v41  ;;  %v3500_v17 = vmul.f32 0.0051020407, %v199_v8  ;;  %v2000_v8 = vld [vmem:[%s5595_s4 + $0x8] sm:$0xff]  ;;  %v2003_v55 = vld [vmem:[%s5595_s4 + $0x20] sm:$0xff] }
  0xbd   :  { %5771 = vst [vmem:[#allocation24_spill] sm:$0xff] %v3493_v13  ;;  %1978 = vst.msk [vmem:[%s5594_s6 + $0xa8] sm:$0xff] %vm1956_vm1, %v1935_v18  ;;  %v1895_v23 = vmul.f32 0.1, %v3493_v13  ;;  %v3564_v18 = vmul.f32 0.9, %v1826_v29 }
  0xbe   :  { %5772 = vst [vmem:[#allocation25_spill] sm:$0xff] %v3500_v17  ;;  %1977 = vst.msk [vmem:[%s5594_s6 + $0xa0] sm:$0xff] %vm1956_vm1, %v1934_v22  ;;  %v1894_v26 = vmul.f32 0.1, %v3500_v17  ;;  %v211_v41 = vpop.xlane.xlu1 %210  ;;  %v3592_v53 = vmul.f32 0.9, %v2000_v8 }
  0xbf   :  { %v1937_v30 = vadd.f32 %v1895_v23, %v1853_v28  ;;  %v3527_v56 = vmul.f32 0.0051020407, %v211_v41  ;;  %v207_v34 = vpop.xlane.xlu0 %206  ;;  %v1999_v23 = vld [vmem:[%s5595_s4] sm:$0xff] }
  0xc0   :  { %v1936_v38 = vadd.f32 %v1894_v26, %v1852_v48  ;;  %v3534_v7 = vmul.f32 0.0051020407, %v207_v34  ;;  %v1829_v48 = vld [vmem:[%s5593_s3 + $0x148] sm:$0xff]  ;;  %v3600_v29 = vmul.f32 0.9, %v1999_v23  ;;  %v2005_v23 = vld [vmem:[%s5595_s4 + $0x30] sm:$0xff] }
  0xc1   :  { %5773 = vst [vmem:[#allocation26_spill] sm:$0xff] %v3527_v56  ;;  %1980 = vst.msk [vmem:[%s5594_s6 + $0xb8] sm:$0xff] %vm1956_vm1, %v1937_v30  ;;  %v1897_v28 = vmul.f32 0.1, %v3527_v56  ;;  %v3572_v35 = vmul.f32 0.9, %v1829_v48 }
  0xc2   :  { %5774 = vst [vmem:[#allocation27_spill] sm:$0xff] %v3534_v7  ;;  %1979 = vst.msk [vmem:[%s5594_s6 + $0xb0] sm:$0xff] %vm1956_vm1, %v1936_v38  ;;  %v1896_v19 = vmul.f32 0.1, %v3534_v7  ;;  %v219_v52 = vpop.xlane.xlu1 %218  ;;  %v2001_v30 = vld [vmem:[%s5595_s4 + $0x10] sm:$0xff] }
  0xc3   :  { %v1939_v37 = vadd.f32 %v1897_v28, %v3434_v51  ;;  %v3562_v58 = vmul.f32 0.0051020407, %v219_v52  ;;  %v215_v60 = vpop.xlane.xlu0 %214  ;;  %v2004_v28 = vld [vmem:[%s5595_s4 + $0x28] sm:$0xff] }
  0xc4   :  { %v1938_v20 = vadd.f32 %v1896_v19, %v3444_v2  ;;  %v3570_v22 = vmul.f32 0.0051020407, %v215_v60  ;;  %v2002_v2 = vld [vmem:[%s5595_s4 + $0x18] sm:$0xff] }
  0xc5   :  { %1982 = vst.msk [vmem:[%s5594_s6 + $0xc8] sm:$0xff] %vm1956_vm1, %v1939_v37  ;;  %v1899_v51 = vmul.f32 0.1, %v3562_v58  ;;  %v3608_v52 = vmul.f32 0.9, %v2002_v2 }
  0xc6   :  { %5775 = vst [vmem:[#allocation28_spill] sm:$0xff] %v3570_v22  ;;  %1981 = vst.msk [vmem:[%s5594_s6 + $0xc0] sm:$0xff] %vm1956_vm1, %v1938_v20  ;;  %v1898_v26 = vmul.f32 0.1, %v3570_v22  ;;  %v227_v41 = vpop.xlane.xlu1 %226  ;;  %v3618_v37 = vmul.f32 0.9, %v2001_v30 }
  0xc7   :  { %v1941_v34 = vadd.f32 %v1899_v51, %v3454_v6  ;;  %v3598_v3 = vmul.f32 0.0051020407, %v227_v41  ;;  %v223_v38 = vpop.xlane.xlu0 %222  ;;  %v3628_v20 = vmul.f32 0.9, %v2004_v28  ;;  %v3636_v41 = vmul.f32 0.9, %v2003_v55 }
  0xc8   :  { %v1940_v48 = vadd.f32 %v1898_v26, %v3461_v46  ;;  %v3606_v19 = vmul.f32 0.0051020407, %v223_v38  ;;  %v2006_v46 = vld [vmem:[%s5595_s4 + $0x38] sm:$0xff]  ;;  %v2008_v30 = vld [vmem:[%s5595_s4 + $0x48] sm:$0xff]  ;;  %v3654_v55 = vmul.f32 0.9, %v2005_v23 }
  0xc9   :  { %1984 = vst.msk [vmem:[%s5594_s6 + $0xd8] sm:$0xff] %vm1956_vm1, %v1941_v34  ;;  %v1901_v6 = vmul.f32 0.1, %v3598_v3  ;;  %v3644_v28 = vmul.f32 0.9, %v2006_v46 }
  0xca   :  { %5776 = vst [vmem:[#allocation29_spill] sm:$0xff] %v3606_v19  ;;  %1983 = vst.msk [vmem:[%s5594_s6 + $0xd0] sm:$0xff] %vm1956_vm1, %v1940_v48  ;;  %v1900_v60 = vmul.f32 0.1, %v3606_v19  ;;  %v235_v8 = vpop.xlane.xlu1 %234  ;;  %v2007_v48 = vld [vmem:[%s5595_s4 + $0x40] sm:$0xff] }
  0xcb   :  { %v1943_v51 = vadd.f32 %v1901_v6, %v3468_v45  ;;  %v3634_v2 = vmul.f32 0.0051020407, %v235_v8  ;;  %v231_v26 = vpop.xlane.xlu0 %230  ;;  %v2009_v8 = vld [vmem:[%s5595_s4 + $0x50] sm:$0xff] }
  0xcc   :  { %v1942_v34 = vadd.f32 %v1900_v60, %v3478_v14  ;;  %v3642_v38 = vmul.f32 0.0051020407, %v231_v26  ;;  %v2010_v14 = vld [vmem:[%s5595_s4 + $0x58] sm:$0xff]  ;;  %v3664_v60 = vmul.f32 0.9, %v2008_v30 }
  0xcd   :  { %5777 = vst [vmem:[#allocation30_spill] sm:$0xff] %v3634_v2  ;;  %1986 = vst.msk [vmem:[%s5594_s6 + $0xe8] sm:$0xff] %vm1956_vm1, %v1943_v51  ;;  %v1903_v45 = vmul.f32 0.1, %v3634_v2  ;;  %v3672_v2 = vmul.f32 0.9, %v2007_v48 }
  0xce   :  { %5778 = vst [vmem:[#allocation31_spill] sm:$0xff] %v3642_v38  ;;  %1985 = vst.msk [vmem:[%s5594_s6 + $0xe0] sm:$0xff] %vm1956_vm1, %v1942_v34  ;;  %v1902_v6 = vmul.f32 0.1, %v3642_v38  ;;  %v243_v46 = vpop.xlane.xlu1 %242  ;;  %v2012_v34 = vld [vmem:[%s5595_s4 + $0x68] sm:$0xff] }
  0xcf   :  { %5779 = vst [vmem:[#allocation32_spill] sm:$0xff] %v3664_v60  ;;  %v1945_v23 = vadd.f32 %v1903_v45, %v3488_v57  ;;  %v3670_v51 = vmul.f32 0.0051020407, %v243_v46  ;;  %v239_v26 = vpop.xlane.xlu0 %238  ;;  %v3680_v30 = vmul.f32 0.9, %v2010_v14  ;;  %v2011_v60 = vld [vmem:[%s5595_s4 + $0x60] sm:$0xff] }
  0xd0   :  { %v1944_v38 = vadd.f32 %v1902_v6, %v3495_v25  ;;  %v3678_v19 = vmul.f32 0.0051020407, %v239_v26  ;;  %v3690_v48 = vmul.f32 0.9, %v2009_v8  ;;  %v2014_v25 = vld [vmem:[%s5595_s4 + $0x78] sm:$0xff]  ;;  %v2013_v46 = vld [vmem:[%s5595_s4 + $0x70] sm:$0xff] }
  0xd1   :  { %5780 = vst [vmem:[#allocation33_spill] sm:$0xff] %v3670_v51  ;;  %1988 = vst.msk [vmem:[%s5594_s6 + $0xf8] sm:$0xff] %vm1956_vm1, %v1945_v23  ;;  %v1905_v57 = vmul.f32 0.1, %v3670_v51  ;;  %v3700_v6 = vmul.f32 0.9, %v2012_v34 }
  0xd2   :  { %5781 = vst [vmem:[#allocation34_spill] sm:$0xff] %v3678_v19  ;;  %5782 = vst [vmem:[#allocation35_spill] sm:$0xff] %v3690_v48  ;;  %v1904_v45 = vmul.f32 0.1, %v3678_v19  ;;  %v251_v14 = vpop.xlane.xlu1 %250  ;;  %v3708_v51 = vmul.f32 0.9, %v2011_v60 }
  0xd3   :  { %1987 = vst.msk [vmem:[%s5594_s6 + $0xf0] sm:$0xff] %vm1956_vm1, %v1944_v38  ;;  %5783 = vst [vmem:[#allocation36_spill] sm:$0xff] %v3700_v6  ;;  %v1947_v8 = vadd.f32 %v1905_v57, %v3502_v61  ;;  %v3706_v23 = vmul.f32 0.0051020407, %v251_v14  ;;  %v247_v26 = vpop.xlane.xlu0 %246  ;;  %v2016_v38 = vld [vmem:[%s5595_s4 + $0x88] sm:$0xff]  ;;  %v2015_v6 = vld [vmem:[%s5595_s4 + $0x80] sm:$0xff] }
  0xd4   :  { %v1946_v19 = vadd.f32 %v1904_v45, %v3512_v11  ;;  %v3714_v48 = vmul.f32 0.0051020407, %v247_v26  ;;  %v3716_v34 = vmul.f32 0.9, %v2014_v25  ;;  %v3726_v60 = vmul.f32 0.9, %v2013_v46 }
  0xd5   :  { %5784 = vst [vmem:[#allocation37_spill] sm:$0xff] %v3706_v23  ;;  %1990 = vst.msk [vmem:[%s5594_s6 + $0x108] sm:$0xff] %vm1956_vm1, %v1947_v8  ;;  %v1907_v61 = vmul.f32 0.1, %v3706_v23  ;;  %v2018_v11 = vld [vmem:[%s5595_s4 + $0x98] sm:$0xff]  ;;  %v2017_v14 = vld [vmem:[%s5595_s4 + $0x90] sm:$0xff] }
  0xd6   :  { %5785 = vst [vmem:[#allocation38_spill] sm:$0xff] %v3714_v48  ;;  %5786 = vst [vmem:[#allocation39_spill] sm:$0xff] %v3726_v60  ;;  %v1906_v57 = vmul.f32 0.1, %v3714_v48  ;;  %v259_v25 = vpop.xlane.xlu1 %258  ;;  %v3736_v45 = vmul.f32 0.9, %v2016_v38 }
  0xd7   :  { %1989 = vst.msk [vmem:[%s5594_s6 + $0x100] sm:$0xff] %vm1956_vm1, %v1946_v19  ;;  %v1949_v46 = vadd.f32 %v1907_v61, %v3522_v4  ;;  %v3742_v8 = vmul.f32 0.0051020407, %v259_v25  ;;  %v255_v26 = vpop.xlane.xlu0 %254  ;;  %v3744_v23 = vmul.f32 0.9, %v2015_v6  ;;  %v2020_v19 = vld [vmem:[%s5595_s4 + $0xa8] sm:$0xff]  ;;  %v3764_v6 = vmul.f32 %v3193_v43, %v3193_v43 }
  0xd8   :  { %5787 = vst [vmem:[#allocation40_spill] sm:$0xff] %v3736_v45  ;;  %v1948_v48 = vadd.f32 %v1906_v57, %v3529_v36  ;;  %v3750_v60 = vmul.f32 0.0051020407, %v255_v26  ;;  %v3752_v38 = vmul.f32 0.9, %v2018_v11  ;;  %v2019_v45 = vld [vmem:[%s5595_s4 + $0xa0] sm:$0xff]  ;;  %v3768_v36 = vmul.f32 %v3191_v33, %v3191_v33 }
  0xd9   :  { %5788 = vst [vmem:[#allocation41_spill] sm:$0xff] %v3742_v8  ;;  %1992 = vst.msk [vmem:[%s5594_s6 + $0x118] sm:$0xff] %vm1956_vm1, %v1949_v46  ;;  %v1909_v4 = vmul.f32 0.1, %v3742_v8  ;;  %v3770_v61 = vmul.f32 0.9, %v2017_v14  ;;  %v3782_v46 = vmul.f32 %v3215_v44, %v3215_v44  ;;  %v3786_v14 = vmul.f32 %v3213_v21, %v3213_v21 }
  0xda   :  { %5789 = vst [vmem:[#allocation42_spill] sm:$0xff] %v3750_v60  ;;  %v2022_v11 = vld [vmem:[%s5595_s4 + $0xb8] sm:$0xff]  ;;  %1991 = vst.msk [vmem:[%s5594_s6 + $0x110] sm:$0xff] %vm1956_vm1, %v1948_v48  ;;  %v1908_v57 = vmul.f32 0.1, %v3750_v60  ;;  %v267_v25 = vpop.xlane.xlu1 %266  ;;  %v2021_v33 = vld [vmem:[%s5595_s4 + $0xb0] sm:$0xff]  ;;  %v3798_v8 = vmul.f32 %v3244_v63, %v3244_v63 }
  0xdb   :  { %v3788_v26 = vmul.f32 0.9, %v2020_v19  ;;  %v1951_v43 = vadd.f32 %v1909_v4, %v3536_v39  ;;  %v3794_v48 = vmul.f32 0.0051020407, %v267_v25  ;;  %v263_v60 = vpop.xlane.xlu0 %262  ;;  %v3800_v44 = vmul.f32 0.9, %v2019_v45 }
  0xdc   :  { %v2024_v19 = vld [vmem:[%s5595_s4 + $0xc8] sm:$0xff]  ;;  %v1950_v21 = vadd.f32 %v1908_v57, %v3546_v47  ;;  %v3810_v39 = vmul.f32 %v3248_v16, %v3248_v16  ;;  %v3812_v4 = vmul.f32 0.9, %v2022_v11  ;;  %v2023_v25 = vld [vmem:[%s5595_s4 + $0xc0] sm:$0xff]  ;;  %v3824_v47 = vmul.f32 %v3273_v10, %v3273_v10  ;;  %v2026_v57 = vld [vmem:[%s5595_s4 + $0xd8] sm:$0xff] }
  0xdd   :  { %5790 = vst [vmem:[#allocation43_spill] sm:$0xff] %v3788_v26  ;;  %5791 = vst [vmem:[#allocation44_spill] sm:$0xff] %v3794_v48  ;;  %v3806_v26 = vmul.f32 0.0051020407, %v263_v60  ;;  %v1911_v45 = vmul.f32 0.1, %v3794_v48  ;;  %v3828_v60 = vmul.f32 %v3278_v59, %v3278_v59  ;;  %v3842_v10 = vmul.f32 %v3300_v0, %v3300_v0 }
  0xde   :  { %5793 = vst [vmem:[#allocation46_spill] sm:$0xff] %v3812_v4  ;;  %1994 = vst.msk [vmem:[%s5594_s6 + $0x128] sm:$0xff] %vm1956_vm1, %v1951_v43  ;;  %v3830_v11 = vmul.f32 0.9, %v2021_v33  ;;  %v275_v16 = vpop.xlane.xlu1 %274  ;;  %v3846_v33 = vmul.f32 %v3305_v15, %v3305_v15  ;;  %v3848_v59 = vmul.f32 0.9, %v2024_v19 }
  0xdf   :  { %5792 = vst [vmem:[#allocation45_spill] sm:$0xff] %v3806_v26  ;;  %1993 = vst.msk [vmem:[%s5594_s6 + $0x120] sm:$0xff] %vm1956_vm1, %v1950_v21  ;;  %v1910_v43 = vmul.f32 0.1, %v3806_v26  ;;  %v2025_v63 = vld [vmem:[%s5595_s4 + $0xd0] sm:$0xff]  ;;  %v2028_v21 = vld [vmem:[%s5595_s4 + $0xe8] sm:$0xff]  ;;  %v1953_v26 = vadd.f32 %v1911_v45, %v3556_v54  ;;  %v271_v0 = vpop.xlane.xlu0 %270  ;;  %v3873_v54 = vmul.f32 %v3331_v32, %v3331_v32 }
  0xe0   :  { %5794 = vst [vmem:[#allocation47_spill] sm:$0xff] %v3830_v11  ;;  %5795 = vst [vmem:[#allocation48_spill] sm:$0xff] %v3848_v59  ;;  %v3857_v48 = vmul.f32 0.0051020407, %v275_v16  ;;  %v3861_v11 = vmul.f32 %v3328_v24, %v3328_v24  ;;  %v3863_v15 = vmul.f32 0.9, %v2023_v25 }
  0xe1   :  { %v2027_v19 = vld [vmem:[%s5595_s4 + $0xe0] sm:$0xff]  ;;  %v1952_v59 = vadd.f32 %v1910_v43, %v3564_v18  ;;  %v3869_v4 = vmul.f32 0.0051020407, %v271_v0  ;;  %v3875_v16 = vmul.f32 0.9, %v2026_v57  ;;  %v2030_v45 = vld [vmem:[%s5595_s4 + $0xf8] sm:$0xff]  ;;  %v3887_v0 = vmul.f32 %v3349_v31, %v3349_v31 }
  0xe2   :  { %5796 = vst [vmem:[#allocation49_spill] sm:$0xff] %v3857_v48  ;;  %1996 = vst.msk [vmem:[%s5594_s6 + $0x138] sm:$0xff] %vm1956_vm1, %v1953_v26  ;;  %v1913_v25 = vmul.f32 0.1, %v3857_v48  ;;  %v3889_v18 = vmul.f32 0.9, %v2025_v63  ;;  %v367_v32 = vpop.xlane.xlu1 %366  ;;  %v3900_v26 = vmul.f32 %v3351_v9, %v3351_v9  ;;  %v3904_v31 = vmul.f32 %v3369_v42, %v3369_v42 }
  0xe3   :  { %5797 = vst [vmem:[#allocation50_spill] sm:$0xff] %v3869_v4  ;;  %v3891_v43 = vmul.f32 0.9, %v2028_v21  ;;  %1995 = vst.msk [vmem:[%s5594_s6 + $0x130] sm:$0xff] %vm1956_vm1, %v1952_v59  ;;  %v1912_v57 = vmul.f32 0.1, %v3869_v4  ;;  %v363_v48 = vpop.xlane.xlu0 %362  ;;  %v3914_v4 = vmul.f32 %v3371_v5, %v3371_v5 }
  0xe4   :  { %5798 = vst [vmem:[#allocation51_spill] sm:$0xff] %v3889_v18  ;;  %v3906_v63 = vmul.f32 0.9, %v2027_v19  ;;  %v2029_v21 = vld [vmem:[%s5595_s4 + $0xf0] sm:$0xff]  ;;  %v1955_v24 = vadd.f32 %v1913_v25, %v3572_v35  ;;  %v571_v59 = vmul.f32 0.0051020407, %v367_v32  ;;  %v3927_v32 = vmul.f32 %v3404_v62, %v3404_v62 }
  0xe5   :  { %5799 = vst [vmem:[#allocation52_spill] sm:$0xff] %v3891_v43  ;;  %v3916_v9 = vmul.f32 0.9, %v2030_v45  ;;  %v2032_v42 = vld [vmem:[%s5595_s4 + $0x108] sm:$0xff]  ;;  %v2031_v19 = vld [vmem:[%s5595_s4 + $0x100] sm:$0xff]  ;;  %v3931_v35 = vmul.f32 %v3412_v12, %v3412_v12  ;;  %v2034_v45 = vld [vmem:[%s5595_s4 + $0x118] sm:$0xff]  ;;  %v3947_v25 = vmul.f32 %v3432_v49, %v3432_v49  ;;  %v3999_v18 = vmul.f32 %v3534_v7, %v3534_v7 }
  0xe6   :  { %5800 = vst [vmem:[#allocation53_spill] sm:$0xff] %v3906_v63  ;;  %v1954_v63 = vadd.f32 %v1912_v57, %v3582_v27  ;;  %v570_v43 = vmul.f32 0.0051020407, %v363_v48  ;;  %1998 = vst.msk [vmem:[%s5594_s6 + $0x148] sm:$0xff] %vm1956_vm1, %v1955_v24  ;;  %v655_v27 = vsub.f32 %v571_v59, %v3782_v46  ;;  %v3943_v48 = vmul.f32 %v3430_v40, %v3430_v40  ;;  %v2033_v12 = vld [vmem:[%s5595_s4 + $0x110] sm:$0xff]  ;;  %v375_v46 = vpop.xlane.xlu1 %374  ;;  %v2036_v5 = vld [vmem:[%s5595_s4 + $0x128] sm:$0xff] }
  0xe7   :  { %5801 = vst [vmem:[#allocation54_spill] sm:$0xff] %v3916_v9  ;;  %v3949_v57 = vmul.f32 0.9, %v2029_v21  ;;  %v3961_v59 = vmul.f32 %v3459_v1, %v3459_v1  ;;  %v3963_v49 = vmul.f32 0.9, %v2032_v42  ;;  %v3978_v42 = vmul.f32 %v3493_v13, %v3493_v13 }
  0xe8   :  { %1997 = vst.msk [vmem:[%s5594_s6 + $0x140] sm:$0xff] %vm1956_vm1, %v1954_v63  ;;  %v654_v24 = vsub.f32 %v570_v43, %v3764_v6  ;;  %v3965_v21 = vmul.f32 0.9, %v2031_v19  ;;  %v697_v40 = vmax.f32 %v655_v27, 0.0  ;;  %v573_v62 = vmul.f32 0.0051020407, %v375_v46 }
  0xe9   :  { %5802 = vst [vmem:[#allocation55_spill] sm:$0xff] %v3949_v57  ;;  %5803 = vst [vmem:[#allocation56_spill] sm:$0xff] %v3963_v49  ;;  %v371_v57 = vpop.xlane.xlu0 %370  ;;  %v3972_v63 = vmul.f32 %v3466_v50, %v3466_v50  ;;  %v3974_v6 = vmul.f32 0.9, %v2034_v45  ;;  %v3980_v19 = vmul.f32 0.9, %v2033_v12  ;;  %v3985_v27 = vmul.f32 %v3500_v17, %v3500_v17 }
  0xea   :  { %5804 = vst [vmem:[#allocation57_spill] sm:$0xff] %v3965_v21  ;;  %v696_v43 = vmax.f32 %v654_v24, 0.0  ;;  %v572_v1 = vmul.f32 0.0051020407, %v371_v57  ;;  %v2084_v21 = vmul.f32 1.0051283, %v697_v40  ;;  %v657_v49 = vsub.f32 %v573_v62, %v3786_v14  ;;  %v383_v12 = vpop.xlane.xlu1 %382 }
  0xeb   :  { %5805 = vst [vmem:[#allocation58_spill] sm:$0xff] %v3974_v6  ;;  %5806 = vst [vmem:[#allocation59_spill] sm:$0xff] %v3980_v19  ;;  %v3987_v46 = vmul.f32 0.9, %v2036_v5  ;;  %v2035_v45 = vld [vmem:[%s5595_s4 + $0x120] sm:$0xff]  ;;  %v3995_v14 = vmul.f32 %v3527_v56, %v3527_v56 }
  0xec   :  { %v739_v57 = vadd.f32 0.001, %v697_v40  ;;  %v738_v24 = vadd.f32 0.001, %v696_v43  ;;  %v2083_v50 = vmul.f32 1.0051283, %v696_v43  ;;  %v656_v13 = vsub.f32 %v572_v1, %v3768_v36 }
  0xed   :  { %5807 = vst [vmem:[#allocation60_spill] sm:$0xff] %v3987_v46  ;;  %v2126_v19 = vmul.f32 0.1, %v2084_v21  ;;  %v699_v6 = vmax.f32 %v657_v49, 0.0  ;;  %v575_v9 = vmul.f32 0.0051020407, %v383_v12  ;;  %v379_v62 = vpop.xlane.xlu0 %378 }
  0xee   :  { %v2125_v5 = vmul.f32 0.1, %v2083_v50  ;;  %v698_v17 = vmax.f32 %v656_v13, 0.0  ;;  %v574_v46 = vmul.f32 0.0051020407, %v379_v62  ;;  %v391_v50 = vpop.xlane.xlu1 %390  ;;  %v2038_v13 = vld [vmem:[%s5595_s4 + $0x138] sm:$0xff]  ;;  %2266 = vrsqrt.f32 %v739_v57 }
  0xef   :  { %v2168_v40 = vadd.f32 %v2126_v19, %v3592_v53  ;;  %v2086_v43 = vmul.f32 1.0051283, %v699_v6  ;;  %v659_v1 = vsub.f32 %v575_v9, %v3798_v8  ;;  %v4003_v36 = vmul.f32 0.9, %v2035_v45 }
  0xf0   :  { %v2167_v49 = vadd.f32 %v2125_v5, %v3600_v29  ;;  %v740_v21 = vadd.f32 0.001, %v698_v17  ;;  %v2085_v12 = vmul.f32 1.0051283, %v698_v17  ;;  %v658_v56 = vsub.f32 %v574_v46, %v3810_v39 }
  0xf1   :  { %2210 = vst.msk [vmem:[%s5596_s7 + $0x8] sm:$0xff] %vm1956_vm1, %v2168_v40  ;;  %v2128_v9 = vmul.f32 0.1, %v2086_v43  ;;  %v4014_v53 = vmax.f32 %v659_v1, 0.0  ;;  %v577_v8 = vmul.f32 0.0051020407, %v391_v50  ;;  %v387_v29 = vpop.xlane.xlu0 %386  ;;  %2268 = vrsqrt.f32 %v738_v24 }
  0xf2   :  { %2209 = vst.msk [vmem:[%s5596_s7] sm:$0xff] %vm1956_vm1, %v2167_v49  ;;  %v2127_v17 = vmul.f32 0.1, %v2085_v12  ;;  %v700_v39 = vmax.f32 %v658_v56, 0.0  ;;  %v576_v19 = vmul.f32 0.0051020407, %v387_v29  ;;  %v399_v1 = vpop.xlane.xlu1 %398  ;;  %2270 = vrsqrt.f32 %v740_v21 }
  0xf3   :  { %v2170_v46 = vadd.f32 %v2128_v9, %v3608_v52  ;;  %v2088_v45 = vmul.f32 1.0051283, %v4014_v53  ;;  %v661_v57 = vsub.f32 %v577_v8, %v3824_v47  ;;  %v4023_v62 = vmul.f32 0.9, %v2038_v13  ;;  %v2037_v56 = vld [vmem:[%s5595_s4 + $0x130] sm:$0xff] }
  0xf4   :  { %v741_v5 = vadd.f32 0.001, %v699_v6  ;;  %v2169_v40 = vadd.f32 %v2127_v17, %v3618_v37  ;;  %v2087_v24 = vmul.f32 1.0051283, %v700_v39  ;;  %v660_v43 = vsub.f32 %v576_v19, %v3828_v60 }
  0xf5   :  { %2212 = vst.msk [vmem:[%s5596_s7 + $0x18] sm:$0xff] %vm1956_vm1, %v2170_v46  ;;  %v2130_v52 = vmul.f32 0.1, %v2088_v45  ;;  %v4034_v47 = vmax.f32 %v661_v57, 0.0  ;;  %v579_v49 = vmul.f32 0.0051020407, %v399_v1  ;;  %v395_v6 = vpop.xlane.xlu0 %394  ;;  %v4038_v37 = vmul.f32 %v3562_v58, %v3562_v58 }
  0xf6   :  { %2211 = vst.msk [vmem:[%s5596_s7 + $0x10] sm:$0xff] %vm1956_vm1, %v2169_v40  ;;  %v2129_v60 = vmul.f32 0.1, %v2087_v24  ;;  %v4044_v12 = vmax.f32 %v660_v43, 0.0  ;;  %v578_v50 = vmul.f32 0.0051020407, %v395_v6  ;;  %v407_v45 = vpop.xlane.xlu1 %406  ;;  %2272 = vrsqrt.f32 %v741_v5 }
  0xf7   :  { %v2172_v13 = vadd.f32 %v2130_v52, %v3628_v20  ;;  %v2090_v9 = vmul.f32 1.0051283, %v4034_v47  ;;  %v663_v8 = vsub.f32 %v579_v49, %v3842_v10  ;;  %v4049_v29 = vmul.f32 0.9, %v2037_v56  ;;  %v2040_v57 = vld [vmem:[%s5595_s4 + $0x148] sm:$0xff] }
  0xf8   :  { %v742_v17 = vadd.f32 0.001, %v700_v39  ;;  %v2171_v21 = vadd.f32 %v2129_v60, %v3636_v41  ;;  %v2089_v19 = vmul.f32 1.0051283, %v4044_v12  ;;  %v662_v46 = vsub.f32 %v578_v50, %v3846_v33 }
  0xf9   :  { %2214 = vst.msk [vmem:[%s5596_s7 + $0x28] sm:$0xff] %vm1956_vm1, %v2172_v13  ;;  %v2132_v10 = vmul.f32 0.1, %v2090_v9  ;;  %v705_v20 = vmax.f32 %v663_v8, 0.0  ;;  %v581_v40 = vmul.f32 0.0051020407, %v407_v45  ;;  %v403_v39 = vpop.xlane.xlu0 %402  ;;  %v4063_v41 = vmul.f32 %v3570_v22, %v3570_v22 }
  0xfa   :  { %2213 = vst.msk [vmem:[%s5596_s7 + $0x20] sm:$0xff] %vm1956_vm1, %v2171_v21  ;;  %v2131_v33 = vmul.f32 0.1, %v2089_v19  ;;  %v4069_v24 = vmax.f32 %v662_v46, 0.0  ;;  %v580_v43 = vmul.f32 0.0051020407, %v403_v39  ;;  %v415_v50 = vpop.xlane.xlu1 %414  ;;  %v4080_v13 = vmul.f32 %v3598_v3, %v3598_v3 }
  0xfb   :  { %v2174_v1 = vadd.f32 %v2132_v10, %v3644_v28  ;;  %v2092_v56 = vmul.f32 1.0051283, %v705_v20  ;;  %v665_v52 = vsub.f32 %v581_v40, %v3861_v11  ;;  %v4073_v49 = vmul.f32 0.9, %v2040_v57  ;;  %v5808_v21 = vld [vmem:[#allocation29_spill] sm:$0xff]  ;;  %v2267_v19 = vpop.eup %2266  ;;  %v823_v57 = vld [vmem:[%s5597_s1 + $0x8] sm:$0xff] }
  0xfc   :  { %v2173_v6 = vadd.f32 %v2131_v33, %v3654_v55  ;;  %v2091_v5 = vmul.f32 1.0051283, %v4069_v24  ;;  %v664_v60 = vsub.f32 %v580_v43, %v3873_v54  ;;  %v583_v9 = vmul.f32 0.0051020407, %v415_v50  ;;  %v5809_v39 = vld [vmem:[#allocation32_spill] sm:$0xff] }
  0xfd   :  { %2216 = vst.msk [vmem:[%s5596_s7 + $0x38] sm:$0xff] %vm1956_vm1, %v2174_v1  ;;  %v2134_v28 = vmul.f32 0.1, %v2092_v56  ;;  %v707_v11 = vmax.f32 %v665_v52, 0.0  ;;  %v411_v8 = vpop.xlane.xlu0 %410  ;;  %v4088_v55 = vmul.f32 %v5808_v21, %v5808_v21  ;;  %2274 = vrsqrt.f32 %v742_v17  ;;  %v822_v1 = vld [vmem:[%s5597_s1] sm:$0xff] }
  0xfe   :  { %2215 = vst.msk [vmem:[%s5596_s7 + $0x30] sm:$0xff] %vm1956_vm1, %v2173_v6  ;;  %v2133_v54 = vmul.f32 0.1, %v2091_v5  ;;  %v4094_v46 = vmax.f32 %v664_v60, 0.0  ;;  %v582_v45 = vmul.f32 0.0051020407, %v411_v8  ;;  %v2269_v10 = vpop.eup %2268  ;;  %v667_v17 = vsub.f32 %v583_v9, %v3887_v0  ;;  %v423_v60 = vpop.xlane.xlu1 %422 }
  0xff   :  { %v743_v40 = vadd.f32 0.001, %v4014_v53  ;;  %v2176_v33 = vadd.f32 %v2134_v28, %v5809_v39  ;;  %v2094_v43 = vmul.f32 1.0051283, %v707_v11  ;;  %v747_v56 = vadd.f32 0.001, %v705_v20 }
 0x100   :  { %v2175_v52 = vadd.f32 %v2133_v54, %v3672_v2  ;;  %v2093_v6 = vmul.f32 1.0051283, %v4094_v46  ;;  %v666_v5 = vsub.f32 %v582_v45, %v3900_v26  ;;  %v709_v50 = vmax.f32 %v667_v17, 0.0  ;;  %v5810_v9 = vld [vmem:[#allocation30_spill] sm:$0xff]  ;;  %v2271_v45 = vpop.eup %2270 }
 0x101   :  { %2218 = vst.msk [vmem:[%s5596_s7 + $0x48] sm:$0xff] %vm1956_vm1, %v2176_v33  ;;  %v2136_v53 = vmul.f32 0.1, %v2094_v43  ;;  %v4112_v0 = vmul.f32 %v2267_v19, %v823_v57  ;;  %v419_v28 = vpop.xlane.xlu0 %418  ;;  %v4116_v20 = vmul.f32 %v5810_v9, %v5810_v9  ;;  %v749_v2 = vadd.f32 0.001, %v707_v11  ;;  %v824_v33 = vld [vmem:[%s5597_s1 + $0x10] sm:$0xff] }
 0x102   :  { %2217 = vst.msk [vmem:[%s5596_s7 + $0x40] sm:$0xff] %vm1956_vm1, %v2175_v52  ;;  %v2135_v26 = vmul.f32 0.1, %v2093_v6  ;;  %v4122_v8 = vmax.f32 %v666_v5, 0.0  ;;  %v4124_v54 = vmul.f32 %v2269_v10, %v822_v1  ;;  %2276 = vrsqrt.f32 %v743_v40  ;;  %v5811_v43 = vld [vmem:[#allocation35_spill] sm:$0xff]  ;;  %v431_v40 = vpop.xlane.xlu1 %430  ;;  %v840_v9 = vld [vmem:[%s5597_s1 + $0x90] sm:$0xff] }
 0x103   :  { %v745_v19 = vadd.f32 0.001, %v4034_v47  ;;  %v2178_v57 = vadd.f32 %v2136_v53, %v3680_v30  ;;  %v2096_v39 = vmul.f32 1.0051283, %v709_v50  ;;  %1039 = vperm.xlu1 %2265, %v4112_v0   ;;  %v744_v11 = vadd.f32 0.001, %v4044_v12 }
 0x104   :  { %2278 = vrsqrt.f32 %v747_v56  ;;  %v2177_v17 = vadd.f32 %v2135_v26, %v5811_v43  ;;  %v2095_v10 = vmul.f32 1.0051283, %v4122_v8  ;;  %1034 = vperm.xlu0 %2264, %v4124_v54   ;;  %v585_v47 = vmul.f32 0.0051020407, %v423_v60  ;;  %v5812_v6 = vld [vmem:[#allocation31_spill] sm:$0xff]  ;;  %v2273_v26 = vpop.eup %2272 }
 0x105   :  { %2220 = vst.msk [vmem:[%s5596_s7 + $0x58] sm:$0xff] %vm1956_vm1, %v2178_v57  ;;  %v2138_v30 = vmul.f32 0.1, %v2096_v39  ;;  %v584_v1 = vmul.f32 0.0051020407, %v419_v28  ;;  %v427_v52 = vpop.xlane.xlu0 %426  ;;  %v4142_v12 = vmul.f32 %v5812_v6, %v5812_v6  ;;  %2280 = vrsqrt.f32 %v749_v2  ;;  %v5813_v57 = vld [vmem:[#allocation36_spill] sm:$0xff] }
 0x106   :  { %2219 = vst.msk [vmem:[%s5596_s7 + $0x50] sm:$0xff] %vm1956_vm1, %v2177_v17  ;;  %v2137_v56 = vmul.f32 0.1, %v2095_v10  ;;  %v4148_v5 = vmul.f32 %v2271_v45, %v824_v33  ;;  %v587_v53 = vmul.f32 0.0051020407, %v431_v40  ;;  %v669_v60 = vsub.f32 %v585_v47, %v3904_v31  ;;  %v825_v2 = vld [vmem:[%s5597_s1 + $0x18] sm:$0xff]  ;;  %v439_v33 = vpop.xlane.xlu1 %438 }
 0x107   :  { %v2180_v39 = vadd.f32 %v2138_v30, %v5813_v57  ;;  %v668_v28 = vsub.f32 %v584_v1, %v3914_v4  ;;  %v586_v43 = vmul.f32 0.0051020407, %v427_v52  ;;  %2282 = vrsqrt.f32 %v744_v11  ;;  %v5814_v17 = vld [vmem:[#allocation33_spill] sm:$0xff]  ;;  %v5815_v1 = vld [vmem:[#allocation34_spill] sm:$0xff] }
 0x108   :  { %v2179_v6 = vadd.f32 %v2137_v56, %v3708_v51  ;;  %1044 = vperm.xlu1 %2265, %v4148_v5   ;;  %v671_v45 = vsub.f32 %v587_v53, %v3927_v32  ;;  %v4161_v10 = vmul.f32 %v5814_v17, %v5814_v17  ;;  %v711_v31 = vmax.f32 %v669_v60, 0.0 }
 0x109   :  { %2222 = vst.msk [vmem:[%s5596_s7 + $0x68] sm:$0xff] %vm1956_vm1, %v2180_v39  ;;  %v4167_v4 = vmax.f32 %v668_v28, 0.0  ;;  %v670_v11 = vsub.f32 %v586_v43, %v3931_v35  ;;  %v589_v51 = vmul.f32 0.0051020407, %v439_v33  ;;  %v435_v40 = vpop.xlane.xlu0 %434  ;;  %v4174_v30 = vmul.f32 %v2273_v26, %v825_v2  ;;  %v826_v39 = vld [vmem:[%s5597_s1 + $0x20] sm:$0xff] }
 0x10a   :  { %2221 = vst.msk [vmem:[%s5596_s7 + $0x60] sm:$0xff] %vm1956_vm1, %v2179_v6  ;;  %v713_v32 = vmax.f32 %v671_v45, 0.0  ;;  %v588_v47 = vmul.f32 0.0051020407, %v435_v40  ;;  %v4178_v52 = vmul.f32 %v5815_v1, %v5815_v1  ;;  %v2275_v56 = vpop.eup %2274  ;;  %2284 = vrsqrt.f32 %v745_v19  ;;  %v447_v43 = vpop.xlane.xlu1 %446 }
 0x10b   :  { %v751_v53 = vadd.f32 0.001, %v709_v50  ;;  %v2098_v57 = vmul.f32 1.0051283, %v711_v31  ;;  %v673_v35 = vsub.f32 %v589_v51, %v3943_v48  ;;  %v746_v6 = vadd.f32 0.001, %v4069_v24 }
 0x10c   :  { %v2097_v26 = vmul.f32 1.0051283, %v4167_v4  ;;  %v2100_v60 = vmul.f32 1.0051283, %v713_v32  ;;  %1049 = vperm.xlu1 %2265, %v4174_v30   ;;  %v672_v28 = vsub.f32 %v588_v47, %v3947_v25  ;;  %v753_v2 = vadd.f32 0.001, %v711_v31 }
 0x10d   :  { %v2140_v19 = vmul.f32 0.1, %v2098_v57  ;;  %v4188_v50 = vmax.f32 %v670_v11, 0.0  ;;  %v4190_v45 = vmax.f32 %v673_v35, 0.0  ;;  %v443_v48 = vpop.xlane.xlu0 %442  ;;  %v4194_v24 = vmul.f32 %v2275_v56, %v826_v39  ;;  %v5816_v31 = vld [vmem:[#allocation39_spill] sm:$0xff]  ;;  %v5817_v11 = vld [vmem:[#allocation40_spill] sm:$0xff] }
 0x10e   :  { %v2139_v33 = vmul.f32 0.1, %v2097_v26  ;;  %v2142_v51 = vmul.f32 0.1, %v2100_v60  ;;  %v4192_v40 = vmax.f32 %v672_v28, 0.0  ;;  %2286 = vrsqrt.f32 %v751_v53  ;;  %v455_v26 = vpop.xlane.xlu1 %454  ;;  %v5818_v60 = vld [vmem:[#allocation37_spill] sm:$0xff] }
 0x10f   :  { %v2182_v1 = vadd.f32 %v2140_v19, %v3716_v34  ;;  %v755_v21 = vadd.f32 0.001, %v713_v32  ;;  %v2099_v25 = vmul.f32 1.0051283, %v4188_v50  ;;  %v2277_v47 = vpop.eup %2276  ;;  %v2102_v35 = vmul.f32 1.0051283, %v4190_v45 }
 0x110   :  { %v2181_v57 = vadd.f32 %v2139_v33, %v5816_v31  ;;  %v2184_v22 = vadd.f32 %v2142_v51, %v5817_v11  ;;  %1054 = vperm.xlu1 %2265, %v4194_v24   ;;  %v4204_v56 = vmul.f32 %v5818_v60, %v5818_v60  ;;  %2288 = vrsqrt.f32 %v746_v6  ;;  %v831_v39 = vld [vmem:[%s5597_s1 + $0x48] sm:$0xff]  ;;  %v5819_v33 = vld [vmem:[#allocation38_spill] sm:$0xff] }
 0x111   :  { %v2279_v53 = vpop.eup %2278  ;;  %2224 = vst.msk [vmem:[%s5596_s7 + $0x78] sm:$0xff] %vm1956_vm1, %v2182_v1  ;;  %v2141_v34 = vmul.f32 0.1, %v2099_v25  ;;  %v2101_v32 = vmul.f32 1.0051283, %v4192_v40  ;;  %v827_v28 = vld [vmem:[%s5597_s1 + $0x28] sm:$0xff]  ;;  %v451_v19 = vpop.xlane.xlu0 %450  ;;  %v4219_v6 = vmul.f32 %v5819_v33, %v5819_v33  ;;  %2290 = vrsqrt.f32 %v753_v2 }
 0x112   :  { %v748_v51 = vadd.f32 0.001, %v4094_v46  ;;  %2223 = vst.msk [vmem:[%s5596_s7 + $0x70] sm:$0xff] %vm1956_vm1, %v2181_v57  ;;  %2226 = vst.msk [vmem:[%s5596_s7 + $0x88] sm:$0xff] %vm1956_vm1, %v2184_v22  ;;  %v2144_v1 = vmul.f32 0.1, %v2102_v35  ;;  %v2281_v31 = vpop.eup %2280  ;;  %2292 = vrsqrt.f32 %v755_v21  ;;  %v4236_v17 = vmul.f32 %v2279_v53, %v831_v39  ;;  %v463_v22 = vpop.xlane.xlu1 %462 }
 0x113   :  { %v591_v25 = vmul.f32 0.0051020407, %v447_v43  ;;  %v2183_v11 = vadd.f32 %v2141_v34, %v3744_v23  ;;  %v2143_v33 = vmul.f32 0.1, %v2101_v32  ;;  %v590_v60 = vmul.f32 0.0051020407, %v443_v48 }
 0x114   :  { %v833_v46 = vld [vmem:[%s5597_s1 + $0x58] sm:$0xff]  ;;  %v2186_v2 = vadd.f32 %v2144_v1, %v3752_v38  ;;  %v4238_v7 = vmul.f32 %v2277_v47, %v827_v28  ;;  %v2283_v43 = vpop.eup %2282  ;;  %v593_v48 = vmul.f32 0.0051020407, %v455_v26  ;;  %v592_v35 = vmul.f32 0.0051020407, %v451_v19  ;;  %v828_v38 = vld [vmem:[%s5597_s1 + $0x30] sm:$0xff]  ;;  %1079 = vperm.xlu0 %2264, %v4236_v17  }
 0x115   :  { %v675_v57 = vsub.f32 %v591_v25, %v3961_v59  ;;  %2225 = vst.msk [vmem:[%s5596_s7 + $0x80] sm:$0xff] %vm1956_vm1, %v2183_v11  ;;  %v2185_v23 = vadd.f32 %v2143_v33, %v3770_v61  ;;  %v674_v21 = vsub.f32 %v590_v60, %v3972_v63  ;;  %v459_v59 = vpop.xlane.xlu0 %458  ;;  %2294 = vrsqrt.f32 %v748_v51 }
 0x116   :  { %v750_v47 = vadd.f32 0.001, %v4122_v8  ;;  %2228 = vst.msk [vmem:[%s5596_s7 + $0x98] sm:$0xff] %vm1956_vm1, %v2186_v2  ;;  %1059 = vperm.xlu1 %2265, %v4238_v7   ;;  %v4256_v61 = vmul.f32 %v2281_v31, %v833_v46  ;;  %v752_v63 = vadd.f32 0.001, %v4167_v4  ;;  %v677_v26 = vsub.f32 %v593_v48, %v3978_v42  ;;  %v471_v33 = vpop.xlane.xlu1 %470  ;;  %v5820_v31 = vld [vmem:[#allocation41_spill] sm:$0xff] }
 0x117   :  { %v717_v53 = vmax.f32 %v675_v57, 0.0  ;;  %2227 = vst.msk [vmem:[%s5596_s7 + $0x90] sm:$0xff] %vm1956_vm1, %v2185_v23  ;;  %v716_v8 = vmax.f32 %v674_v21, 0.0  ;;  %v676_v60 = vsub.f32 %v592_v35, %v3985_v27  ;;  %v2285_v34 = vpop.eup %2284  ;;  %v757_v32 = vadd.f32 0.001, %v4190_v45  ;;  %v5821_v57 = vld [vmem:[#allocation42_spill] sm:$0xff] }
 0x118   :  { %v4266_v28 = vmul.f32 %v2283_v43, %v828_v38  ;;  %v595_v19 = vmul.f32 0.0051020407, %v463_v22  ;;  %v719_v4 = vmax.f32 %v677_v26, 0.0  ;;  %v4272_v11 = vmul.f32 %v5820_v31, %v5820_v31  ;;  %1089 = vperm.xlu0 %2264, %v4256_v61   ;;  %v5822_v23 = vld [vmem:[#allocation43_spill] sm:$0xff] }
 0x119   :  { %v2104_v39 = vmul.f32 1.0051283, %v717_v53  ;;  %v2103_v51 = vmul.f32 1.0051283, %v716_v8  ;;  %v4268_v1 = vmax.f32 %v676_v60, 0.0  ;;  %v467_v25 = vpop.xlane.xlu0 %466  ;;  %2296 = vrsqrt.f32 %v750_v47  ;;  %v835_v38 = vld [vmem:[%s5597_s1 + $0x68] sm:$0xff] }
 0x11a   :  { %v759_v42 = vadd.f32 0.001, %v717_v53  ;;  %1064 = vperm.xlu1 %2265, %v4266_v28   ;;  %v679_v45 = vsub.f32 %v595_v19, %v3995_v14  ;;  %2298 = vrsqrt.f32 %v752_v63  ;;  %v2106_v2 = vmul.f32 1.0051283, %v719_v4  ;;  %v829_v14 = vld [vmem:[%s5597_s1 + $0x38] sm:$0xff]  ;;  %v479_v47 = vpop.xlane.xlu1 %478 }
 0x11b   :  { %v2146_v27 = vmul.f32 0.1, %v2104_v39  ;;  %v2145_v46 = vmul.f32 0.1, %v2103_v51  ;;  %v4279_v22 = vmul.f32 %v5821_v57, %v5821_v57  ;;  %v2287_v43 = vpop.eup %2286  ;;  %2300 = vrsqrt.f32 %v757_v32 }
 0x11c   :  { %v2105_v48 = vmul.f32 1.0051283, %v4268_v1  ;;  %v721_v35 = vmax.f32 %v679_v45, 0.0  ;;  %v754_v53 = vadd.f32 0.001, %v4188_v50  ;;  %2302 = vrsqrt.f32 %v759_v42 }
 0x11d   :  { %v2188_v21 = vadd.f32 %v2146_v27, %v5822_v23  ;;  %v2187_v63 = vadd.f32 %v2145_v46, %v3800_v44  ;;  %v2148_v26 = vmul.f32 0.1, %v2106_v2  ;;  %v594_v60 = vmul.f32 0.0051020407, %v459_v59  ;;  %v475_v32 = vpop.xlane.xlu0 %474  ;;  %v2289_v39 = vpop.eup %2288  ;;  %v5823_v44 = vld [vmem:[#allocation46_spill] sm:$0xff] }
 0x11e   :  { %v761_v19 = vadd.f32 0.001, %v719_v4  ;;  %v2147_v51 = vmul.f32 0.1, %v2105_v48  ;;  %v2108_v27 = vmul.f32 1.0051283, %v721_v35  ;;  %v2291_v45 = vpop.eup %2290  ;;  %v4301_v46 = vmul.f32 %v2287_v43, %v835_v38 }
 0x11f   :  { %2230 = vst.msk [vmem:[%s5596_s7 + $0xa8] sm:$0xff] %vm1956_vm1, %v2188_v21  ;;  %2229 = vst.msk [vmem:[%s5596_s7 + $0xa0] sm:$0xff] %vm1956_vm1, %v2187_v63  ;;  %v2190_v50 = vadd.f32 %v2148_v26, %v5823_v44  ;;  %v678_v59 = vsub.f32 %v594_v60, %v3999_v18  ;;  %v4303_v42 = vmul.f32 %v2285_v34, %v829_v14  ;;  %v837_v4 = vld [vmem:[%s5597_s1 + $0x78] sm:$0xff]  ;;  %v830_v2 = vld [vmem:[%s5597_s1 + $0x40] sm:$0xff]  ;;  %v2293_v23 = vpop.eup %2292  ;;  %v756_v21 = vadd.f32 0.001, %v4192_v40  ;;  %v487_v18 = vpop.xlane.xlu1 %486 }
 0x120   :  { %v5824_v48 = vld [vmem:[#allocation47_spill] sm:$0xff]  ;;  %v2150_v26 = vmul.f32 0.1, %v2108_v27  ;;  %v597_v44 = vmul.f32 0.0051020407, %v471_v33  ;;  %2304 = vrsqrt.f32 %v754_v53  ;;  %1099 = vperm.xlu0 %2264, %v4301_v46   ;;  %v5825_v40 = vld [vmem:[#allocation48_spill] sm:$0xff]  ;;  %v4325_v53 = vmul.f32 %v2291_v45, %v837_v4 }
 0x121   :  { %v2189_v63 = vadd.f32 %v2147_v51, %v5824_v48  ;;  %v758_v43 = vadd.f32 0.001, %v716_v8  ;;  %2232 = vst.msk [vmem:[%s5596_s7 + $0xb8] sm:$0xff] %vm1956_vm1, %v2190_v50  ;;  %v720_v34 = vmax.f32 %v678_v59, 0.0  ;;  %1069 = vperm.xlu1 %2265, %v4303_v42   ;;  %v596_v38 = vmul.f32 0.0051020407, %v467_v25  ;;  %v483_v14 = vpop.xlane.xlu0 %482 }
 0x122   :  { %2306 = vrsqrt.f32 %v761_v19  ;;  %v2192_v8 = vadd.f32 %v2150_v26, %v5825_v40  ;;  %v681_v33 = vsub.f32 %v597_v44, %v4038_v37  ;;  %v839_v60 = vld [vmem:[%s5597_s1 + $0x88] sm:$0xff]  ;;  %v2295_v51 = vpop.eup %2294  ;;  %v4331_v19 = vmul.f32 %v2289_v39, %v830_v2 }
 0x123   :  { %2231 = vst.msk [vmem:[%s5596_s7 + $0xb0] sm:$0xff] %vm1956_vm1, %v2189_v63  ;;  %v2107_v27 = vmul.f32 1.0051283, %v720_v34  ;;  %v680_v25 = vsub.f32 %v596_v38, %v4063_v41  ;;  %v599_v50 = vmul.f32 0.0051020407, %v479_v47  ;;  %2308 = vrsqrt.f32 %v756_v21  ;;  %v495_v4 = vpop.xlane.xlu1 %494  ;;  %v5826_v21 = vld [vmem:[#allocation44_spill] sm:$0xff] }
 0x124   :  { %v763_v59 = vadd.f32 0.001, %v721_v35  ;;  %2234 = vst.msk [vmem:[%s5596_s7 + $0xc8] sm:$0xff] %vm1956_vm1, %v2192_v8  ;;  %v723_v37 = vmax.f32 %v681_v33, 0.0  ;;  %v598_v45 = vmul.f32 0.0051020407, %v475_v32  ;;  %1109 = vperm.xlu0 %2264, %v4325_v53   ;;  %v4342_v47 = vmul.f32 %v2293_v23, %v839_v60 }
 0x125   :  { %v2149_v48 = vmul.f32 0.1, %v2107_v27  ;;  %v4337_v63 = vmax.f32 %v680_v25, 0.0  ;;  %1074 = vperm.xlu1 %2265, %v4331_v19   ;;  %v683_v41 = vsub.f32 %v599_v50, %v4080_v13  ;;  %v832_v35 = vld [vmem:[%s5597_s1 + $0x50] sm:$0xff]  ;;  %v491_v39 = vpop.xlane.xlu0 %490  ;;  %2310 = vrsqrt.f32 %v758_v43  ;;  %v5827_v50 = vld [vmem:[#allocation45_spill] sm:$0xff] }
 0x126   :  { %v2110_v2 = vmul.f32 1.0051283, %v723_v37  ;;  %v682_v32 = vsub.f32 %v598_v45, %v4088_v55  ;;  %v4350_v26 = vmul.f32 %v5826_v21, %v5826_v21  ;;  %v2297_v44 = vpop.eup %2296  ;;  %v765_v40 = vadd.f32 0.001, %v723_v37 }
 0x127   :  { %v2191_v38 = vadd.f32 %v2149_v48, %v3863_v15  ;;  %v2109_v13 = vmul.f32 1.0051283, %v4337_v63  ;;  %v725_v23 = vmax.f32 %v683_v41, 0.0  ;;  %v2299_v8 = vpop.eup %2298  ;;  %v760_v33 = vadd.f32 0.001, %v4268_v1  ;;  %v841_v1 = vld [vmem:[%s5597_s1 + $0x98] sm:$0xff] }
 0x128   :  { %v2152_v60 = vmul.f32 0.1, %v2110_v2  ;;  %v4355_v27 = vmax.f32 %v682_v32, 0.0  ;;  %v4357_v43 = vmul.f32 %v2295_v51, %v832_v35  ;;  %v2301_v55 = vpop.eup %2300  ;;  %2312 = vrsqrt.f32 %v763_v59  ;;  %1119 = vperm.xlu0 %2264, %v4342_v47   ;;  %v834_v51 = vld [vmem:[%s5597_s1 + $0x60] sm:$0xff]  ;;  %v503_v35 = vpop.xlane.xlu1 %502  ;;  %v5828_v32 = vld [vmem:[#allocation51_spill] sm:$0xff] }
 0x129   :  { %2233 = vst.msk [vmem:[%s5596_s7 + $0xc0] sm:$0xff] %vm1956_vm1, %v2191_v38  ;;  %v2151_v15 = vmul.f32 0.1, %v2109_v13  ;;  %v2112_v25 = vmul.f32 1.0051283, %v725_v23  ;;  %v4372_v59 = vmul.f32 %v5827_v50, %v5827_v50  ;;  %v2303_v2 = vpop.eup %2302  ;;  %2314 = vrsqrt.f32 %v765_v40  ;;  %v499_v21 = vpop.xlane.xlu0 %498  ;;  %v5836_v50 = vld [vmem:[#allocation57_spill] sm:$0xff] }
 0x12a   :  { %v762_v37 = vadd.f32 0.001, %v720_v34  ;;  %v2194_v45 = vadd.f32 %v2152_v60, %v3875_v16  ;;  %v2111_v48 = vmul.f32 1.0051283, %v4355_v27  ;;  %1084 = vperm.xlu1 %2265, %v4357_v43   ;;  %v601_v41 = vmul.f32 0.0051020407, %v487_v18 }
 0x12b   :  { %v2193_v38 = vadd.f32 %v2151_v15, %v5828_v32  ;;  %v2154_v13 = vmul.f32 0.1, %v2112_v25  ;;  %v600_v57 = vmul.f32 0.0051020407, %v483_v14  ;;  %2316 = vrsqrt.f32 %v760_v33  ;;  %v843_v18 = vld [vmem:[%s5597_s1 + $0xa8] sm:$0xff]  ;;  %v5829_v14 = vld [vmem:[#allocation52_spill] sm:$0xff] }
 0x12c   :  { %2236 = vst.msk [vmem:[%s5596_s7 + $0xd8] sm:$0xff] %vm1956_vm1, %v2194_v45  ;;  %v2153_v16 = vmul.f32 0.1, %v2111_v48  ;;  %v685_v34 = vsub.f32 %v601_v41, %v4116_v20  ;;  %v4383_v60 = vmul.f32 %v2301_v55, %v841_v1  ;;  %v4394_v15 = vmul.f32 %v2297_v44, %v834_v51  ;;  %v5830_v20 = vld [vmem:[#allocation53_spill] sm:$0xff]  ;;  %v836_v41 = vld [vmem:[%s5597_s1 + $0x70] sm:$0xff] }
 0x12d   :  { %2235 = vst.msk [vmem:[%s5596_s7 + $0xd0] sm:$0xff] %vm1956_vm1, %v2193_v38  ;;  %v2196_v40 = vadd.f32 %v2154_v13, %v5829_v14  ;;  %v684_v33 = vsub.f32 %v600_v57, %v4142_v12  ;;  %v603_v25 = vmul.f32 0.0051020407, %v495_v4  ;;  %v2305_v45 = vpop.eup %2304  ;;  %2318 = vrsqrt.f32 %v762_v37  ;;  %v511_v13 = vpop.xlane.xlu1 %510 }
 0x12e   :  { %v2195_v55 = vadd.f32 %v2153_v16, %v5830_v20  ;;  %v727_v1 = vmax.f32 %v685_v34, 0.0  ;;  %1129 = vperm.xlu0 %2264, %v4383_v60   ;;  %v602_v48 = vmul.f32 0.0051020407, %v491_v39  ;;  %v767_v38 = vadd.f32 0.001, %v725_v23  ;;  %1094 = vperm.xlu1 %2265, %v4394_v15   ;;  %v845_v39 = vld [vmem:[%s5597_s1 + $0xb8] sm:$0xff]  ;;  %v507_v14 = vpop.xlane.xlu0 %506 }
 0x12f   :  { %v2307_v32 = vpop.eup %2306  ;;  %2238 = vst.msk [vmem:[%s5596_s7 + $0xe8] sm:$0xff] %vm1956_vm1, %v2196_v40  ;;  %v4405_v12 = vmax.f32 %v684_v33, 0.0  ;;  %v687_v57 = vsub.f32 %v603_v25, %v4161_v10  ;;  %v4409_v4 = vmul.f32 %v2303_v2, %v843_v18  ;;  %v764_v44 = vadd.f32 0.001, %v4337_v63 }
 0x130   :  { %2237 = vst.msk [vmem:[%s5596_s7 + $0xe0] sm:$0xff] %vm1956_vm1, %v2195_v55  ;;  %v2114_v23 = vmul.f32 1.0051283, %v727_v1  ;;  %v686_v51 = vsub.f32 %v602_v48, %v4178_v52  ;;  %v605_v37 = vmul.f32 0.0051020407, %v503_v35  ;;  %v4420_v16 = vpop.eup %2308  ;;  %v4423_v18 = vmul.f32 %v2299_v8, %v836_v41  ;;  %v5831_v55 = vld [vmem:[#allocation49_spill] sm:$0xff] }
 0x131   :  { %v769_v10 = vadd.f32 0.001, %v727_v1  ;;  %v2113_v2 = vmul.f32 1.0051283, %v4405_v12  ;;  %v729_v34 = vmax.f32 %v687_v57, 0.0  ;;  %v4429_v25 = vmul.f32 %v2307_v32, %v845_v39  ;;  %v5832_v1 = vld [vmem:[#allocation54_spill] sm:$0xff] }
 0x132   :  { %v2156_v63 = vmul.f32 0.1, %v2114_v23  ;;  %v4425_v40 = vmax.f32 %v686_v51, 0.0  ;;  %1139 = vperm.xlu0 %2264, %v4409_v4   ;;  %v689_v33 = vsub.f32 %v605_v37, %v4204_v56  ;;  %v4431_v52 = vpop.eup %2310  ;;  %2320 = vrsqrt.f32 %v767_v38  ;;  %1104 = vperm.xlu1 %2265, %v4423_v18   ;;  %v838_v56 = vld [vmem:[%s5597_s1 + $0x80] sm:$0xff]  ;;  %v5833_v32 = vld [vmem:[#allocation55_spill] sm:$0xff] }
 0x133   :  { %v2155_v35 = vmul.f32 0.1, %v2113_v2  ;;  %v2116_v20 = vmul.f32 1.0051283, %v729_v34  ;;  %v4436_v8 = vmul.f32 %v5831_v55, %v5831_v55  ;;  %v771_v41 = vadd.f32 0.001, %v729_v34 }
 0x134   :  { %v2198_v48 = vadd.f32 %v2156_v63, %v5832_v1  ;;  %v2115_v57 = vmul.f32 1.0051283, %v4425_v40  ;;  %v731_v23 = vmax.f32 %v689_v33, 0.0  ;;  %2322 = vrsqrt.f32 %v769_v10  ;;  %v847_v63 = vld [vmem:[%s5597_s1 + $0xc8] sm:$0xff]  ;;  %v519_v10 = vpop.xlane.xlu1 %518  ;;  %v5834_v33 = vld [vmem:[#allocation50_spill] sm:$0xff] }
 0x135   :  { %v2197_v38 = vadd.f32 %v2155_v35, %v5833_v32  ;;  %v2158_v39 = vmul.f32 0.1, %v2116_v20  ;;  %v604_v51 = vmul.f32 0.0051020407, %v499_v21  ;;  %v2313_v37 = vpop.eup %2312  ;;  %2324 = vrsqrt.f32 %v764_v44  ;;  %v5835_v21 = vld [vmem:[#allocation56_spill] sm:$0xff] }
 0x136   :  { %2240 = vst.msk [vmem:[%s5596_s7 + $0xf8] sm:$0xff] %vm1956_vm1, %v2198_v48  ;;  %v2157_v2 = vmul.f32 0.1, %v2115_v57  ;;  %v2118_v34 = vmul.f32 1.0051283, %v731_v23  ;;  %1149 = vperm.xlu0 %2264, %v4429_v25   ;;  %v4454_v35 = vmul.f32 %v5834_v33, %v5834_v33  ;;  %v4462_v1 = vmul.f32 %v2305_v45, %v838_v56  ;;  %v515_v57 = vpop.xlane.xlu0 %514  ;;  %v2315_v32 = vpop.eup %2314 }
 0x137   :  { %2239 = vst.msk [vmem:[%s5596_s7 + $0xf0] sm:$0xff] %vm1956_vm1, %v2197_v38  ;;  %v2200_v44 = vadd.f32 %v2158_v39, %v5835_v21  ;;  %v688_v20 = vsub.f32 %v604_v51, %v4219_v6  ;;  %v607_v48 = vmul.f32 0.0051020407, %v511_v13  ;;  %2326 = vrsqrt.f32 %v771_v41  ;;  %v849_v38 = vld [vmem:[%s5597_s1 + $0xd8] sm:$0xff] }
 0x138   :  { %v2199_v55 = vadd.f32 %v2157_v2, %v5836_v50  ;;  %v2160_v31 = vmul.f32 0.1, %v2118_v34  ;;  %v606_v33 = vmul.f32 0.0051020407, %v507_v14  ;;  %v4471_v39 = vpop.eup %2316  ;;  %v773_v6 = vadd.f32 0.001, %v731_v23  ;;  %1114 = vperm.xlu1 %2265, %v4462_v1  }
 0x139   :  { %2242 = vst.msk [vmem:[%s5596_s7 + $0x108] sm:$0xff] %vm1956_vm1, %v2200_v44  ;;  %v4477_v45 = vmax.f32 %v688_v20, 0.0  ;;  %v691_v50 = vsub.f32 %v607_v48, %v4272_v11  ;;  %v4481_v13 = vmul.f32 %v2313_v37, %v847_v63  ;;  %v5837_v14 = vld [vmem:[#allocation58_spill] sm:$0xff]  ;;  %v609_v51 = vmul.f32 0.0051020407, %v519_v10 }
 0x13a   :  { %2241 = vst.msk [vmem:[%s5596_s7 + $0x100] sm:$0xff] %vm1956_vm1, %v2199_v55  ;;  %v2202_v41 = vadd.f32 %v2160_v31, %v5837_v14  ;;  %v690_v56 = vsub.f32 %v606_v33, %v4279_v22  ;;  %v608_v2 = vmul.f32 0.0051020407, %v515_v57  ;;  %v4489_v23 = vpop.eup %2318  ;;  %v4494_v11 = vmul.f32 %v4420_v16, %v840_v9  ;;  %v842_v9 = vld [vmem:[%s5597_s1 + $0xa0] sm:$0xff]  ;;  %v527_v16 = vpop.xlane.xlu1 %526  ;;  %v851_v14 = vld [vmem:[%s5597_s1 + $0xe8] sm:$0xff] }
 0x13b   :  { %v2117_v34 = vmul.f32 1.0051283, %v4477_v45  ;;  %v733_v21 = vmax.f32 %v691_v50, 0.0  ;;  %1159 = vperm.xlu0 %2264, %v4481_v13   ;;  %v4496_v37 = vmul.f32 %v2315_v32, %v849_v38  ;;  %v766_v55 = vadd.f32 0.001, %v4355_v27  ;;  %v523_v50 = vpop.xlane.xlu0 %522 }
 0x13c   :  { %2244 = vst.msk [vmem:[%s5596_s7 + $0x118] sm:$0xff] %vm1956_vm1, %v2202_v41  ;;  %v4503_v31 = vmax.f32 %v690_v56, 0.0  ;;  %v693_v22 = vsub.f32 %v609_v51, %v4350_v26  ;;  %v692_v63 = vsub.f32 %v608_v2, %v4372_v59  ;;  %2328 = vrsqrt.f32 %v773_v6  ;;  %1124 = vperm.xlu1 %2265, %v4494_v11   ;;  %v5838_v26 = vld [vmem:[#allocation59_spill] sm:$0xff]  ;;  %v5839_v2 = vld [vmem:[#allocation60_spill] sm:$0xff] }
 0x13d   :  { %v2159_v10 = vmul.f32 0.1, %v2117_v34  ;;  %v775_v33 = vadd.f32 0.001, %v733_v21  ;;  %v2120_v27 = vmul.f32 1.0051283, %v733_v21  ;;  %v4518_v38 = vmul.f32 %v4431_v52, %v842_v9 }
 0x13e   :  { %v768_v44 = vadd.f32 0.001, %v4405_v12  ;;  %v2119_v20 = vmul.f32 1.0051283, %v4503_v31  ;;  %v735_v48 = vmax.f32 %v693_v22, 0.0  ;;  %v4513_v57 = vmax.f32 %v692_v63, 0.0 }
 0x13f   :  { %v2201_v59 = vadd.f32 %v2159_v10, %v5838_v26  ;;  %v2162_v32 = vmul.f32 0.1, %v2120_v27  ;;  %1169 = vperm.xlu0 %2264, %v4496_v37   ;;  %v611_v6 = vmul.f32 0.0051020407, %v527_v16  ;;  %v2321_v12 = vpop.eup %2320  ;;  %2330 = vrsqrt.f32 %v766_v55  ;;  %v844_v55 = vld [vmem:[%s5597_s1 + $0xb0] sm:$0xff]  ;;  %v853_v10 = vld [vmem:[%s5597_s1 + $0xf8] sm:$0xff] }
 0x140   :  { %v2161_v41 = vmul.f32 0.1, %v2119_v20  ;;  %v777_v56 = vadd.f32 0.001, %v735_v48  ;;  %v2122_v51 = vmul.f32 1.0051283, %v735_v48  ;;  %2332 = vrsqrt.f32 %v775_v33  ;;  %1134 = vperm.xlu1 %2265, %v4518_v38  }
 0x141   :  { %2243 = vst.msk [vmem:[%s5596_s7 + $0x110] sm:$0xff] %vm1956_vm1, %v2201_v59  ;;  %v2204_v52 = vadd.f32 %v2162_v32, %v5839_v2  ;;  %v2121_v34 = vmul.f32 1.0051283, %v4513_v57  ;;  %v695_v21 = vsub.f32 %v611_v6, %v4436_v8  ;;  %v2323_v22 = vpop.eup %2322  ;;  %2334 = vrsqrt.f32 %v768_v44 }
 0x142   :  { %v2203_v63 = vadd.f32 %v2161_v41, %v4003_v36  ;;  %v2164_v9 = vmul.f32 0.1, %v2122_v51  ;;  %v610_v16 = vmul.f32 0.0051020407, %v523_v50  ;;  %v2325_v33 = vpop.eup %2324  ;;  %v770_v27 = vadd.f32 0.001, %v4425_v40 }
 0x143   :  { %2246 = vst.msk [vmem:[%s5596_s7 + $0x128] sm:$0xff] %vm1956_vm1, %v2204_v52  ;;  %v2163_v8 = vmul.f32 0.1, %v2121_v34  ;;  %v737_v20 = vmax.f32 %v695_v21, 0.0  ;;  %v4543_v48 = vmul.f32 %v2321_v12, %v851_v14  ;;  %2336 = vrsqrt.f32 %v777_v56  ;;  %v2039_v40 = vld [vmem:[%s5595_s4 + $0x140] sm:$0xff]  ;;  %v848_v34 = vld [vmem:[%s5597_s1 + $0xd0] sm:$0xff] }
 0x144   :  { %2245 = vst.msk [vmem:[%s5596_s7 + $0x120] sm:$0xff] %vm1956_vm1, %v2203_v63  ;;  %v2206_v36 = vadd.f32 %v2164_v9, %v4023_v62  ;;  %v694_v44 = vsub.f32 %v610_v16, %v4454_v35  ;;  %v4555_v26 = vmul.f32 %v4471_v39, %v844_v55  ;;  %v2327_v59 = vpop.eup %2326  ;;  %v4559_v14 = vmul.f32 %v2323_v22, %v853_v10  ;;  %v846_v62 = vld [vmem:[%s5597_s1 + $0xc0] sm:$0xff] }
 0x145   :  { %v2205_v32 = vadd.f32 %v2163_v8, %v4049_v29  ;;  %v779_v6 = vadd.f32 0.001, %v737_v20  ;;  %v2124_v50 = vmul.f32 1.0051283, %v737_v20  ;;  %1179 = vperm.xlu0 %2264, %v4543_v48   ;;  %v855_v29 = vld [vmem:[%s5597_s1 + $0x108] sm:$0xff]  ;;  %2338 = vrsqrt.f32 %v770_v27  ;;  %v850_v16 = vld [vmem:[%s5597_s1 + $0xe0] sm:$0xff] }
 0x146   :  { %2248 = vst.msk [vmem:[%s5596_s7 + $0x138] sm:$0xff] %vm1956_vm1, %v2206_v36  ;;  %v736_v35 = vmax.f32 %v694_v44, 0.0  ;;  %1144 = vperm.xlu1 %2265, %v4555_v26   ;;  %v2081_v12 = vmul.f32 0.9, %v2039_v40  ;;  %v772_v41 = vadd.f32 0.001, %v4477_v45  ;;  %v4578_v51 = vmul.f32 %v4489_v23, %v846_v62 }
 0x147   :  { %2247 = vst.msk [vmem:[%s5596_s7 + $0x130] sm:$0xff] %vm1956_vm1, %v2205_v32  ;;  %v2166_v39 = vmul.f32 0.1, %v2124_v50  ;;  %2340 = vrsqrt.f32 %v779_v6  ;;  %v4582_v52 = vmul.f32 %v2327_v59, %v855_v29  ;;  %v857_v45 = vld [vmem:[%s5597_s1 + $0x118] sm:$0xff]  ;;  %v4596_v22 = vmul.f32 %v2325_v33, %v848_v34  ;;  %v852_v40 = vld [vmem:[%s5597_s1 + $0xf0] sm:$0xff]  ;;  %v854_v50 = vld [vmem:[%s5597_s1 + $0x100] sm:$0xff] }
 0x148   :  { %v2123_v56 = vmul.f32 1.0051283, %v736_v35  ;;  %2342 = vrsqrt.f32 %v772_v41  ;;  %v776_v27 = vadd.f32 0.001, %v4513_v57  ;;  %v861_v44 = vld [vmem:[%s5597_s1 + $0x138] sm:$0xff]  ;;  %v863_v29 = vld [vmem:[%s5597_s1 + $0x148] sm:$0xff] }
 0x149   :  { %v2208_v2 = vadd.f32 %v2166_v39, %v4073_v49  ;;  %1189 = vperm.xlu0 %2264, %v4559_v14   ;;  %v2329_v21 = vpop.eup %2328  ;;  %v774_v49 = vadd.f32 0.001, %v4503_v31  ;;  %v859_v31 = vld [vmem:[%s5597_s1 + $0x128] sm:$0xff]  ;;  %v778_v59 = vadd.f32 0.001, %v736_v35  ;;  %v856_v41 = vld [vmem:[%s5597_s1 + $0x110] sm:$0xff] }
 0x14a   :  { %v2165_v55 = vmul.f32 0.1, %v2123_v56  ;;  %1154 = vperm.xlu1 %2265, %v4578_v51   ;;  %v4599_v9 = vmul.f32 %v2329_v21, %v857_v45  ;;  %v5840_v56 = vld [vmem:[#allocation5_spill] sm:$0xff]  ;;  %v907_v21 = vld [vmem:[%s5598_s2 + $0x8] sm:$0xff]  ;;  %v858_v45 = vld [vmem:[%s5597_s1 + $0x120] sm:$0xff] }
 0x14b   :  { %2250 = vst.msk [vmem:[%s5596_s7 + $0x148] sm:$0xff] %vm1956_vm1, %v2208_v2  ;;  %2344 = vrsqrt.f32 %v774_v49  ;;  %v949_v2 = vmul.f32 %v4112_v0, %v5840_v56  ;;  %v5841_v49 = vld [vmem:[#allocation4_spill] sm:$0xff]  ;;  %v906_v56 = vld [vmem:[%s5598_s2] sm:$0xff] }
 0x14c   :  { %v2207_v23 = vadd.f32 %v2165_v55, %v2081_v12  ;;  %v2331_v63 = vpop.eup %2330  ;;  %2346 = vrsqrt.f32 %v776_v27 }
 0x14d   :  { %1199 = vperm.xlu0 %2264, %v4582_v52   ;;  %v2333_v10 = vpop.eup %2332  ;;  %v4613_v8 = vmul.f32 %v2331_v63, %v850_v16  ;;  %2348 = vrsqrt.f32 %v778_v59  ;;  %v991_v63 = vsub.f32 %v907_v21, %v949_v2  ;;  %v909_v16 = vld [vmem:[%s5598_s2 + $0x18] sm:$0xff]  ;;  %v862_v59 = vld [vmem:[%s5597_s1 + $0x140] sm:$0xff] }
 0x14e   :  { %2249 = vst.msk [vmem:[%s5596_s7 + $0x140] sm:$0xff] %vm1956_vm1, %v2207_v23  ;;  %1164 = vperm.xlu1 %2265, %v4596_v22   ;;  %v2335_v33 = vpop.eup %2334  ;;  %v4616_v36 = vmul.f32 %v2333_v10, %v859_v31  ;;  %v951_v23 = vmul.f32 %v4174_v30, %v5841_v49  ;;  %v860_v31 = vld [vmem:[%s5597_s1 + $0x130] sm:$0xff]  ;;  %v5845_v2 = vld [vmem:[#allocation10_spill] sm:$0xff]  ;;  %v915_v49 = vld [vmem:[%s5598_s2 + $0x48] sm:$0xff] }
 0x14f   :  { %v4625_v57 = vmul.f32 %v2335_v33, %v852_v40  ;;  %v5842_v33 = vld [vmem:[#allocation6_spill] sm:$0xff]  ;;  %v911_v40 = vld [vmem:[%s5598_s2 + $0x28] sm:$0xff] }
 0x150   :  { %v2337_v20 = vpop.eup %2336  ;;  %v953_v27 = vmul.f32 %v4238_v7, %v5842_v33  ;;  %v5844_v7 = vld [vmem:[#allocation3_spill] sm:$0xff] }
 0x151   :  { %1209 = vperm.xlu0 %2264, %v4599_v9   ;;  %v4628_v6 = vmul.f32 %v2337_v20, %v861_v44  ;;  %v993_v20 = vsub.f32 %v909_v16, %v951_v23  ;;  %v908_v23 = vld [vmem:[%s5598_s2 + $0x10] sm:$0xff] }
 0x152   :  { %1174 = vperm.xlu1 %2265, %v4613_v8   ;;  %v2339_v32 = vpop.eup %2338 }
 0x153   :  { %v4637_v35 = vmul.f32 %v2339_v32, %v854_v50  ;;  %v5843_v32 = vld [vmem:[#allocation8_spill] sm:$0xff] }
 0x154   :  { %v2341_v62 = vpop.eup %2340  ;;  %v955_v50 = vmul.f32 %v4303_v42, %v5843_v32  ;;  %v957_v42 = vmul.f32 %v4236_v17, %v5845_v2  ;;  %v5848_v17 = vld [vmem:[#allocation7_spill] sm:$0xff]  ;;  %v914_v2 = vld [vmem:[%s5598_s2 + $0x40] sm:$0xff] }
 0x155   :  { %1219 = vperm.xlu0 %2264, %v4616_v36   ;;  %v2343_v39 = vpop.eup %2342  ;;  %v4640_v12 = vmul.f32 %v2341_v62, %v863_v29  ;;  %v995_v62 = vsub.f32 %v911_v40, %v953_v27  ;;  %v948_v29 = vmul.f32 %v4124_v54, %v5844_v7  ;;  %v910_v27 = vld [vmem:[%s5598_s2 + $0x20] sm:$0xff] }
 0x156   :  { %1184 = vperm.xlu1 %2265, %v4625_v57   ;;  %v4648_v34 = vmul.f32 %v2343_v39, %v856_v41  ;;  %v913_v41 = vld [vmem:[%s5598_s2 + $0x38] sm:$0xff] }
 0x157   :  { %v997_v21 = vsub.f32 %v913_v41, %v955_v50  ;;  %v912_v50 = vld [vmem:[%s5598_s2 + $0x30] sm:$0xff] }
 0x158   :  { %v2345_v55 = vpop.eup %2344  ;;  %v5852_v41 = vld [vmem:[#allocation12_spill] sm:$0xff] }
 0x159   :  { %1229 = vperm.xlu0 %2264, %v4628_v6   ;;  %v4660_v0 = vmul.f32 %v2345_v55, %v858_v45  ;;  %v2347_v10 = vpop.eup %2346  ;;  %v5846_v55 = vld [vmem:[#allocation2_spill] sm:$0xff]  ;;  %v990_v45 = vsub.f32 %v906_v56, %v948_v29  ;;  %v956_v56 = vmul.f32 %v4331_v19, %v5852_v41  ;;  %v916_v19 = vld [vmem:[%s5598_s2 + $0x50] sm:$0xff] }
 0x15a   :  { %1194 = vperm.xlu1 %2265, %v4637_v35   ;;  %v4671_v30 = vmul.f32 %v2347_v10, %v860_v31  ;;  %v2349_v44 = vpop.eup %2348  ;;  %v950_v54 = vmul.f32 %v4148_v5, %v5846_v55  ;;  %v999_v10 = vsub.f32 %v915_v49, %v957_v42  ;;  %v952_v31 = vmul.f32 %v4194_v24, %v5848_v17  ;;  %v917_v5 = vld [vmem:[%s5598_s2 + $0x58] sm:$0xff]  ;;  %v919_v24 = vld [vmem:[%s5598_s2 + $0x68] sm:$0xff]  ;;  %v5853_v42 = vld [vmem:[#allocation18_spill] sm:$0xff] }
 0x15b   :  { %v4684_v39 = vmul.f32 %v2349_v44, %v862_v59  ;;  %v925_v17 = vld [vmem:[%s5598_s2 + $0x98] sm:$0xff]  ;;  %v5861_v41 = vld [vmem:[#allocation26_spill] sm:$0xff] }
 0x15c   :  { %v992_v33 = vsub.f32 %v908_v23, %v950_v54  ;;  %v994_v32 = vsub.f32 %v910_v27, %v952_v31  ;;  %v923_v54 = vld [vmem:[%s5598_s2 + $0x88] sm:$0xff]  ;;  %v5857_v27 = vld [vmem:[#allocation22_spill] sm:$0xff] }
 0x15d   :  { %1239 = vperm.xlu0 %2264, %v4640_v12   ;;  %v5856_v31 = vld [vmem:[#allocation15_spill] sm:$0xff] }
 0x15e   :  { %1204 = vperm.xlu1 %2265, %v4648_v34  }
 0x161   :  { %1333 = vperm.xlu0 %2264, %v991_v63   ;;  %v5847_v63 = vld [vmem:[#allocation11_spill] sm:$0xff] }
 0x162   :  { %1214 = vperm.xlu1 %2265, %v4660_v0   ;;  %v959_v16 = vmul.f32 %v4256_v61, %v5847_v63  ;;  %v5850_v61 = vld [vmem:[#allocation9_spill] sm:$0xff]  ;;  %v5855_v63 = vld [vmem:[#allocation20_spill] sm:$0xff] }
 0x163   :  { %v954_v59 = vmul.f32 %v4266_v28, %v5850_v61  ;;  %v921_v28 = vld [vmem:[%s5598_s2 + $0x78] sm:$0xff] }
 0x164   :  { %v1001_v44 = vsub.f32 %v917_v5, %v959_v16  ;;  %v5858_v61 = vld [vmem:[#allocation17_spill] sm:$0xff] }
 0x165   :  { %1343 = vperm.xlu0 %2264, %v993_v20   ;;  %v5849_v20 = vld [vmem:[#allocation14_spill] sm:$0xff] }
 0x166   :  { %1224 = vperm.xlu1 %2265, %v4671_v30   ;;  %v961_v40 = vmul.f32 %v4301_v46, %v5849_v20  ;;  %v996_v46 = vsub.f32 %v912_v50, %v954_v59  ;;  %v969_v20 = vmul.f32 %v4409_v4, %v5857_v27  ;;  %v920_v59 = vld [vmem:[%s5598_s2 + $0x70] sm:$0xff] }
 0x168   :  { %v1003_v29 = vsub.f32 %v919_v24, %v961_v40  ;;  %v5859_v24 = vld [vmem:[#allocation24_spill] sm:$0xff] }
 0x169   :  { %1353 = vperm.xlu0 %2264, %v995_v62   ;;  %v5851_v62 = vld [vmem:[#allocation16_spill] sm:$0xff]  ;;  %v971_v4 = vmul.f32 %v4429_v25, %v5859_v24  ;;  %v973_v25 = vmul.f32 %v4481_v13, %v5861_v41  ;;  %v975_v13 = vmul.f32 %v4496_v37, %v3562_v58  ;;  %v977_v58 = vmul.f32 %v4543_v48, %v3598_v3  ;;  %v5865_v3 = vld [vmem:[#allocation30_spill] sm:$0xff] }
 0x16a   :  { %1234 = vperm.xlu1 %2265, %v4684_v39   ;;  %v963_v7 = vmul.f32 %v4325_v53, %v5851_v62  ;;  %v998_v53 = vsub.f32 %v914_v2, %v956_v56  ;;  %v979_v48 = vmul.f32 %v4559_v14, %v5865_v3 }
 0x16c   :  { %v1005_v55 = vsub.f32 %v921_v28, %v963_v7  ;;  %v929_v7 = vld [vmem:[%s5598_s2 + $0xb8] sm:$0xff] }
 0x16d   :  { %1363 = vperm.xlu0 %2264, %v997_v21   ;;  %v965_v21 = vmul.f32 %v4342_v47, %v5853_v42  ;;  %v967_v47 = vmul.f32 %v4383_v60, %v5855_v63  ;;  %v1013_v28 = vsub.f32 %v929_v7, %v971_v4  ;;  %v931_v42 = vld [vmem:[%s5598_s2 + $0xc8] sm:$0xff]  ;;  %v926_v63 = vld [vmem:[%s5598_s2 + $0xa0] sm:$0xff] }
 0x16e   :  { %1328 = vperm.xlu1 %2265, %v990_v45   ;;  %v5854_v45 = vld [vmem:[#allocation13_spill] sm:$0xff] }
 0x16f   :  { %v958_v49 = vmul.f32 %v4357_v43, %v5854_v45  ;;  %v1007_v16 = vsub.f32 %v923_v54, %v965_v21  ;;  %v960_v43 = vmul.f32 %v4394_v15, %v5856_v31  ;;  %v1009_v5 = vsub.f32 %v925_v17, %v967_v47  ;;  %v5862_v21 = vld [vmem:[#allocation21_spill] sm:$0xff]  ;;  %v935_v17 = vld [vmem:[%s5598_s2 + $0xe8] sm:$0xff] }
 0x170   :  { %v962_v15 = vmul.f32 %v4423_v18, %v5858_v61  ;;  %v1015_v54 = vsub.f32 %v931_v42, %v973_v25  ;;  %v1019_v27 = vsub.f32 %v935_v17, %v977_v58  ;;  %v930_v61 = vld [vmem:[%s5598_s2 + $0xc0] sm:$0xff] }
 0x171   :  { %1373 = vperm.xlu0 %2264, %v999_v10   ;;  %v1000_v10 = vsub.f32 %v916_v19, %v958_v49  ;;  %v933_v49 = vld [vmem:[%s5598_s2 + $0xd8] sm:$0xff]  ;;  %v5863_v19 = vld [vmem:[#allocation23_spill] sm:$0xff]  ;;  %v5874_v17 = vld [vmem:[#allocation34_spill] sm:$0xff] }
 0x172   :  { %1338 = vperm.xlu1 %2265, %v992_v33   ;;  %v918_v33 = vld [vmem:[%s5598_s2 + $0x60] sm:$0xff]  ;;  %v1004_v62 = vsub.f32 %v920_v59, %v962_v15  ;;  %v5867_v59 = vld [vmem:[#allocation33_spill] sm:$0xff] }
 0x173   :  { %v1002_v40 = vsub.f32 %v918_v33, %v960_v43  ;;  %v928_v43 = vld [vmem:[%s5598_s2 + $0xb0] sm:$0xff] }
 0x175   :  { %1383 = vperm.xlu0 %2264, %v1001_v44   ;;  %v927_v44 = vld [vmem:[%s5598_s2 + $0xa8] sm:$0xff] }
 0x176   :  { %1348 = vperm.xlu1 %2265, %v994_v32   ;;  %v1011_v32 = vsub.f32 %v927_v44, %v969_v20 }
 0x179   :  { %1393 = vperm.xlu0 %2264, %v1003_v29   ;;  %v5860_v29 = vld [vmem:[#allocation19_spill] sm:$0xff] }
 0x17a   :  { %1358 = vperm.xlu1 %2265, %v996_v46   ;;  %v964_v18 = vmul.f32 %v4462_v1, %v5860_v29  ;;  %v922_v46 = vld [vmem:[%s5598_s2 + $0x80] sm:$0xff]  ;;  %v966_v1 = vmul.f32 %v4494_v11, %v5862_v21  ;;  %v968_v11 = vmul.f32 %v4518_v38, %v5863_v19  ;;  %v5864_v38 = vld [vmem:[#allocation25_spill] sm:$0xff]  ;;  %v932_v29 = vld [vmem:[%s5598_s2 + $0xd0] sm:$0xff] }
 0x17b   :  { %v970_v31 = vmul.f32 %v4555_v26, %v5864_v38  ;;  %v5866_v26 = vld [vmem:[#allocation27_spill] sm:$0xff]  ;;  %v934_v21 = vld [vmem:[%s5598_s2 + $0xe0] sm:$0xff] }
 0x17c   :  { %v1006_v2 = vsub.f32 %v922_v46, %v964_v18  ;;  %v1010_v37 = vsub.f32 %v926_v63, %v968_v11  ;;  %v972_v44 = vmul.f32 %v4578_v51, %v5866_v26  ;;  %v5868_v51 = vld [vmem:[#allocation28_spill] sm:$0xff] }
 0x17d   :  { %1403 = vperm.xlu0 %2264, %v1005_v55   ;;  %v1012_v20 = vsub.f32 %v928_v43, %v970_v31  ;;  %v974_v7 = vmul.f32 %v4596_v22, %v5868_v51  ;;  %v5870_v22 = vld [vmem:[#allocation29_spill] sm:$0xff]  ;;  %v936_v11 = vld [vmem:[%s5598_s2 + $0xf0] sm:$0xff]  ;;  %v938_v31 = vld [vmem:[%s5598_s2 + $0x100] sm:$0xff] }
 0x17e   :  { %1368 = vperm.xlu1 %2265, %v998_v53   ;;  %v4743_v23 = vpop.permute.xlu1 %1039  ;;  %v924_v53 = vld [vmem:[%s5598_s2 + $0x90] sm:$0xff]  ;;  %v1014_v24 = vsub.f32 %v930_v61, %v972_v44  ;;  %v976_v42 = vmul.f32 %v4613_v8, %v5870_v22  ;;  %v946_v22 = vld [vmem:[%s5598_s2 + $0x140] sm:$0xff] }
 0x17f   :  { %v4788_v55 = vpop.permute.xlu0 %1034  ;;  %v1008_v45 = vsub.f32 %v924_v53, %v966_v1  ;;  %v940_v44 = vld [vmem:[%s5598_s2 + $0x110] sm:$0xff] }
 0x181   :  { %1413 = vperm.xlu0 %2264, %v1007_v16  }
 0x182   :  { %1378 = vperm.xlu1 %2265, %v1000_v10   ;;  %v1017_v10 = vsub.f32 %v933_v49, %v975_v13  ;;  %v5872_v49 = vld [vmem:[#allocation31_spill] sm:$0xff] }
 0x183   :  { %v4757_v60 = vpop.permute.xlu1 %1044  ;;  %v978_v8 = vmul.f32 %v4625_v57, %v5872_v49  ;;  %v980_v57 = vmul.f32 %v4637_v35, %v5874_v17  ;;  %v5876_v35 = vld [vmem:[#allocation38_spill] sm:$0xff]  ;;  %v2350_v17 = vld [vmem:[%s5592_s0 + $0x10] sm:$0xff] }
 0x185   :  { %1423 = vperm.xlu0 %2264, %v1009_v5   ;;  %v1020_v58 = vsub.f32 %v936_v11, %v978_v8 }
 0x186   :  { %1388 = vperm.xlu1 %2265, %v1002_v40   ;;  %v937_v40 = vld [vmem:[%s5598_s2 + $0xf8] sm:$0xff] }
 0x187   :  { %v4769_v50 = vpop.permute.xlu1 %1049  ;;  %v1021_v15 = vsub.f32 %v937_v40, %v979_v48  ;;  %v1022_v48 = vsub.f32 %v938_v31, %v980_v57  ;;  %v982_v40 = vmul.f32 %v4648_v34, %v5876_v35  ;;  %v942_v34 = vld [vmem:[%s5598_s2 + $0x120] sm:$0xff]  ;;  %v1244_v57 = vmul.f32 %v2350_v17, %v4743_v23  ;;  %v2351_v31 = vld [vmem:[%s5592_s0 + $0x18] sm:$0xff]  ;;  %v2352_v35 = vld [vmem:[%s5592_s0 + $0x30] sm:$0xff] }
 0x189   :  { %1433 = vperm.xlu0 %2264, %v1011_v32   ;;  %v981_v32 = vmul.f32 %v4582_v52, %v5867_v59  ;;  %v5869_v52 = vld [vmem:[#allocation37_spill] sm:$0xff]  ;;  %v5877_v59 = vld [vmem:[#allocation42_spill] sm:$0xff] }
 0x18a   :  { %1398 = vperm.xlu1 %2265, %v1004_v62   ;;  %v939_v62 = vld [vmem:[%s5598_s2 + $0x108] sm:$0xff]  ;;  %v983_v46 = vmul.f32 %v4599_v9, %v5869_v52  ;;  %v5871_v9 = vld [vmem:[#allocation41_spill] sm:$0xff] }
 0x18b   :  { %v4781_v56 = vpop.permute.xlu1 %1054  ;;  %v1023_v18 = vsub.f32 %v939_v62, %v981_v32  ;;  %v985_v53 = vmul.f32 %v4616_v36, %v5871_v9  ;;  %v5873_v36 = vld [vmem:[#allocation44_spill] sm:$0xff]  ;;  %v984_v32 = vmul.f32 %v4660_v0, %v5877_v59 }
 0x18d   :  { %1443 = vperm.xlu0 %2264, %v1013_v28   ;;  %v1016_v28 = vsub.f32 %v932_v29, %v974_v7  ;;  %v1026_v51 = vsub.f32 %v942_v34, %v984_v32  ;;  %v5878_v7 = vld [vmem:[#allocation45_spill] sm:$0xff] }
 0x18e   :  { %1408 = vperm.xlu1 %2265, %v1006_v2   ;;  %v941_v2 = vld [vmem:[%s5598_s2 + $0x118] sm:$0xff]  ;;  %v986_v29 = vmul.f32 %v4671_v30, %v5878_v7 }
 0x18f   :  { %v4805_v16 = vpop.permute.xlu0 %1079  ;;  %v1025_v1 = vsub.f32 %v941_v2, %v983_v46 }
 0x191   :  { %1453 = vperm.xlu0 %2264, %v1015_v54   ;;  %v4803_v47 = vpop.permute.xlu1 %1059  ;;  %v1018_v54 = vsub.f32 %v934_v21, %v976_v42 }
 0x192   :  { %1418 = vperm.xlu1 %2265, %v1008_v45   ;;  %v943_v45 = vld [vmem:[%s5598_s2 + $0x128] sm:$0xff] }
 0x193   :  { %v4819_v5 = vpop.permute.xlu0 %1089  ;;  %v1027_v63 = vsub.f32 %v943_v45, %v985_v53 }
 0x195   :  { %1463 = vperm.xlu0 %2264, %v1017_v10   ;;  %v4817_v33 = vpop.permute.xlu1 %1064  ;;  %v987_v10 = vmul.f32 %v4628_v6, %v5873_v36  ;;  %v5875_v6 = vld [vmem:[#allocation49_spill] sm:$0xff] }
 0x196   :  { %1428 = vperm.xlu1 %2265, %v1010_v37   ;;  %v945_v37 = vld [vmem:[%s5598_s2 + $0x138] sm:$0xff]  ;;  %v989_v3 = vmul.f32 %v4640_v12, %v5875_v6  ;;  %v1024_v12 = vsub.f32 %v940_v44, %v982_v40  ;;  %v1248_v40 = vmul.f32 %v2352_v35, %v4769_v50 }
 0x197   :  { %v2353_v44 = vld [vmem:[%s5592_s0 + $0x38] sm:$0xff] }
 0x199   :  { %1473 = vperm.xlu0 %2264, %v1019_v27   ;;  %v1029_v27 = vsub.f32 %v945_v37, %v987_v10 }
 0x19a   :  { %1438 = vperm.xlu1 %2265, %v1012_v20   ;;  %v947_v20 = vld [vmem:[%s5598_s2 + $0x148] sm:$0xff] }
 0x19b   :  { %v4835_v4 = vpop.permute.xlu0 %1099 }
 0x19c   :  { %v4833_v14 = vpop.permute.xlu1 %1069 }
 0x19d   :  { %1483 = vperm.xlu0 %2264, %v1021_v15   ;;  %v1031_v15 = vsub.f32 %v947_v20, %v989_v3 }
 0x19e   :  { %1448 = vperm.xlu1 %2265, %v1014_v24  }
 0x19f   :  { %v4849_v25 = vpop.permute.xlu0 %1109 }
 0x1a0   :  { %v4847_v41 = vpop.permute.xlu1 %1074 }
 0x1a1   :  { %1493 = vperm.xlu0 %2264, %v1023_v18   ;;  %v944_v18 = vld [vmem:[%s5598_s2 + $0x130] sm:$0xff] }
 0x1a2   :  { %1458 = vperm.xlu1 %2265, %v1016_v28   ;;  %v1028_v46 = vsub.f32 %v944_v18, %v986_v29  ;;  %v5879_v28 = vld [vmem:[#allocation50_spill] sm:$0xff]  ;;  %v2355_v29 = vld [vmem:[%s5592_s0 + $0x58] sm:$0xff] }
 0x1a3   :  { %v4861_v13 = vpop.permute.xlu0 %1119  ;;  %v988_v2 = vmul.f32 %v4684_v39, %v5879_v28  ;;  %v1253_v18 = vmul.f32 %v2355_v29, %v4803_v47 }
 0x1a5   :  { %1503 = vperm.xlu0 %2264, %v1025_v1   ;;  %v4868_v19 = vpop.permute.xlu1 %1084  ;;  %v1030_v21 = vsub.f32 %v946_v22, %v988_v2 }
 0x1a6   :  { %1468 = vperm.xlu1 %2265, %v1018_v54  }
 0x1a9   :  { %1513 = vperm.xlu0 %2264, %v1027_v63   ;;  %v4880_v38 = vpop.permute.xlu0 %1129  ;;  %v4885_v43 = vpop.permute.xlu1 %1094 }
 0x1aa   :  { %1478 = vperm.xlu1 %2265, %v1020_v58  }
 0x1ad   :  { %1523 = vperm.xlu0 %2264, %v1029_v27   ;;  %v4894_v26 = vpop.permute.xlu0 %1139  ;;  %v4899_v61 = vpop.permute.xlu1 %1104  ;;  %v1245_v27 = vmul.f32 %v2351_v31, %v4743_v23  ;;  %v2357_v31 = vld [vmem:[%s5592_s0 + $0x78] sm:$0xff] }
 0x1ae   :  { %1488 = vperm.xlu1 %2265, %v1022_v48  }
 0x1b1   :  { %1533 = vperm.xlu0 %2264, %v1031_v15   ;;  %v4903_v24 = vpop.permute.xlu0 %1149  ;;  %v1249_v15 = vmul.f32 %v2353_v44, %v4769_v50  ;;  %v2354_v50 = vld [vmem:[%s5592_s0 + $0x50] sm:$0xff] }
 0x1b2   :  { %1498 = vperm.xlu1 %2265, %v1024_v12   ;;  %v1252_v7 = vmul.f32 %v2354_v50, %v4803_v47  ;;  %v2356_v47 = vld [vmem:[%s5592_s0 + $0x70] sm:$0xff]  ;;  %v2361_v50 = vld [vmem:[%s5592_s0 + $0x98] sm:$0xff] }
 0x1b3   :  { %v4908_v62 = vpop.permute.xlu1 %1114 }
 0x1b6   :  { %1508 = vperm.xlu1 %2265, %v1026_v51   ;;  %v4915_v0 = vpop.permute.xlu0 %1159 }
 0x1b7   :  { %v4917_v52 = vpop.permute.xlu1 %1124 }
 0x1ba   :  { %1518 = vperm.xlu1 %2265, %v1028_v46   ;;  %v4924_v42 = vpop.permute.xlu0 %1169 }
 0x1bb   :  { %v4926_v30 = vpop.permute.xlu1 %1134 }
 0x1be   :  { %1528 = vperm.xlu1 %2265, %v1030_v21  }
 0x1c0   :  { %v4928_v1 = vpop.permute.xlu0 %1179 }
 0x1c1   :  { %v4930_v9 = vpop.permute.xlu1 %1144 }
 0x1c4   :  { %v4932_v53 = vpop.permute.xlu0 %1189 }
 0x1c5   :  { %v4934_v54 = vpop.permute.xlu1 %1154 }
 0x1c8   :  { %v4936_v39 = vpop.permute.xlu0 %1199 }
 0x1c9   :  { %v4938_v45 = vpop.permute.xlu1 %1164 }
 0x1cc   :  { %v4940_v49 = vpop.permute.xlu0 %1209 }
 0x1cd   :  { %v4942_v8 = vpop.permute.xlu1 %1174 }
 0x1d0   :  { %v4944_v11 = vpop.permute.xlu0 %1219 }
 0x1d1   :  { %v4946_v63 = vpop.permute.xlu1 %1184 }
 0x1d4   :  { %v4948_v36 = vpop.permute.xlu0 %1229 }
 0x1d5   :  { %v4950_v10 = vpop.permute.xlu1 %1194 }
 0x1d8   :  { %v4952_v58 = vpop.permute.xlu0 %1239 }
 0x1d9   :  { %v4954_v37 = vpop.permute.xlu1 %1204 }
 0x1dc   :  { %v1334_v6 = vpop.permute.xlu0 %1333 }
 0x1dd   :  { %v4964_v3 = vpop.permute.xlu1 %1214  ;;  %v1538_v48 = vadd.f32 %v1334_v6, %v1244_v57  ;;  %v1539_v20 = vadd.f32 %v1334_v6, %v1245_v27  ;;  %v1256_v57 = vmul.f32 %v2356_v47, %v4833_v14  ;;  %v1257_v27 = vmul.f32 %v2357_v31, %v4833_v14 }
 0x1df   :  { %v1622_v12 = vmax.f32 %v1538_v48, 0.0  ;;  %v1623_v59 = vmax.f32 %v1539_v20, 0.0  ;;  %v2358_v20 = vld [vmem:[%s5592_s0] sm:$0xff] }
 0x1e0   :  { %v1344_v23 = vpop.permute.xlu0 %1343  ;;  %v1242_v35 = vmul.f32 %v2358_v20, %v4788_v55 }
 0x1e1   :  { %1706 = vst [vmem:[%s5599_s5 + $0x10] sm:$0xff] %v1622_v12  ;;  %1707 = vst.msk [vmem:[%s5599_s5 + $0x18] sm:$0xff] %vm107_vm0, %v1623_v59  ;;  %v4981_v32 = vpop.permute.xlu1 %1224  ;;  %v1542_v34 = vadd.f32 %v1344_v23, %v1248_v40  ;;  %v1543_v51 = vadd.f32 %v1344_v23, %v1249_v15  ;;  %v2359_v40 = vld [vmem:[%s5592_s0 + $0x8] sm:$0xff] }
 0x1e2   :  { %v1243_v44 = vmul.f32 %v2359_v40, %v4788_v55 }
 0x1e3   :  { %v1626_v46 = vmax.f32 %v1542_v34, 0.0  ;;  %v1627_v28 = vmax.f32 %v1543_v51, 0.0  ;;  %v2360_v51 = vld [vmem:[%s5592_s0 + $0x90] sm:$0xff] }
 0x1e4   :  { %v1354_v2 = vpop.permute.xlu0 %1353  ;;  %v1260_v55 = vmul.f32 %v2360_v51, %v4805_v16 }
 0x1e5   :  { %1710 = vst [vmem:[%s5599_s5 + $0x30] sm:$0xff] %v1626_v46  ;;  %1711 = vst.msk [vmem:[%s5599_s5 + $0x38] sm:$0xff] %vm107_vm0, %v1627_v28  ;;  %v4998_v22 = vpop.permute.xlu1 %1234  ;;  %v1546_v21 = vadd.f32 %v1354_v2, %v1252_v7  ;;  %v1547_v17 = vadd.f32 %v1354_v2, %v1253_v18  ;;  %v1261_v7 = vmul.f32 %v2361_v50, %v4805_v16  ;;  %v2362_v46 = vld [vmem:[%s5592_s0 + $0x20] sm:$0xff]  ;;  %v2363_v2 = vld [vmem:[%s5592_s0 + $0x28] sm:$0xff] }
 0x1e6   :  { %v1246_v28 = vmul.f32 %v2362_v46, %v4757_v60 }
 0x1e7   :  { %v1630_v6 = vmax.f32 %v1546_v21, 0.0  ;;  %v1631_v48 = vmax.f32 %v1547_v17, 0.0  ;;  %v1247_v21 = vmul.f32 %v2363_v2, %v4757_v60 }
 0x1e8   :  { %v1364_v15 = vpop.permute.xlu0 %1363 }
 0x1e9   :  { %1714 = vst [vmem:[%s5599_s5 + $0x50] sm:$0xff] %v1630_v6  ;;  %1715 = vst.msk [vmem:[%s5599_s5 + $0x58] sm:$0xff] %vm107_vm0, %v1631_v48  ;;  %v1329_v14 = vpop.permute.xlu1 %1328  ;;  %v1550_v12 = vadd.f32 %v1364_v15, %v1256_v57  ;;  %v1551_v59 = vadd.f32 %v1364_v15, %v1257_v27  ;;  %v2364_v48 = vld [vmem:[%s5592_s0 + $0xb0] sm:$0xff] }
 0x1ea   :  { %v1536_v23 = vadd.f32 %v1329_v14, %v1242_v35  ;;  %v1537_v34 = vadd.f32 %v1329_v14, %v1243_v44  ;;  %v1264_v20 = vmul.f32 %v2364_v48, %v4819_v5  ;;  %v2365_v35 = vld [vmem:[%s5592_s0 + $0xb8] sm:$0xff]  ;;  %v2366_v14 = vld [vmem:[%s5592_s0 + $0x40] sm:$0xff] }
 0x1eb   :  { %v1634_v29 = vmax.f32 %v1550_v12, 0.0  ;;  %v1635_v18 = vmax.f32 %v1551_v59, 0.0  ;;  %v1265_v40 = vmul.f32 %v2365_v35, %v4819_v5  ;;  %v1250_v12 = vmul.f32 %v2366_v14, %v4781_v56  ;;  %v2367_v59 = vld [vmem:[%s5592_s0 + $0x48] sm:$0xff] }
 0x1ec   :  { %v1620_v17 = vmax.f32 %v1536_v23, 0.0  ;;  %v1621_v47 = vmax.f32 %v1537_v34, 0.0  ;;  %v1374_v57 = vpop.permute.xlu0 %1373  ;;  %v1251_v23 = vmul.f32 %v2367_v59, %v4781_v56 }
 0x1ed   :  { %1718 = vst [vmem:[%s5599_s5 + $0x70] sm:$0xff] %v1634_v29  ;;  %1719 = vst.msk [vmem:[%s5599_s5 + $0x78] sm:$0xff] %vm107_vm0, %v1635_v18  ;;  %v1339_v16 = vpop.permute.xlu1 %1338  ;;  %v1554_v31 = vadd.f32 %v1374_v57, %v1260_v55  ;;  %v1555_v27 = vadd.f32 %v1374_v57, %v1261_v7  ;;  %v2368_v18 = vld [vmem:[%s5592_s0 + $0xd0] sm:$0xff] }
 0x1ee   :  { %1704 = vst [vmem:[%s5599_s5] sm:$0xff] %v1620_v17  ;;  %1705 = vst.msk [vmem:[%s5599_s5 + $0x8] sm:$0xff] %vm107_vm0, %v1621_v47  ;;  %v1540_v60 = vadd.f32 %v1339_v16, %v1246_v28  ;;  %v1541_v6 = vadd.f32 %v1339_v16, %v1247_v21  ;;  %v1268_v46 = vmul.f32 %v2368_v18, %v4835_v4  ;;  %v2369_v28 = vld [vmem:[%s5592_s0 + $0xd8] sm:$0xff]  ;;  %v2370_v47 = vld [vmem:[%s5592_s0 + $0x60] sm:$0xff] }
 0x1ef   :  { %v1638_v44 = vmax.f32 %v1554_v31, 0.0  ;;  %v1639_v15 = vmax.f32 %v1555_v27, 0.0  ;;  %v1269_v2 = vmul.f32 %v2369_v28, %v4835_v4  ;;  %v1254_v57 = vmul.f32 %v2370_v47, %v4817_v33  ;;  %v2371_v16 = vld [vmem:[%s5592_s0 + $0x68] sm:$0xff] }
 0x1f0   :  { %v1624_v34 = vmax.f32 %v1540_v60, 0.0  ;;  %v1625_v51 = vmax.f32 %v1541_v6, 0.0  ;;  %v1384_v55 = vpop.permute.xlu0 %1383  ;;  %v1255_v31 = vmul.f32 %v2371_v16, %v4817_v33 }
 0x1f1   :  { %1722 = vst [vmem:[%s5599_s5 + $0x90] sm:$0xff] %v1638_v44  ;;  %1723 = vst.msk [vmem:[%s5599_s5 + $0x98] sm:$0xff] %vm107_vm0, %v1639_v15  ;;  %v1349_v5 = vpop.permute.xlu1 %1348  ;;  %v1558_v50 = vadd.f32 %v1384_v55, %v1264_v20  ;;  %v1559_v7 = vadd.f32 %v1384_v55, %v1265_v40  ;;  %v2372_v40 = vld [vmem:[%s5592_s0 + $0xf0] sm:$0xff]  ;;  %v2373_v15 = vld [vmem:[%s5592_s0 + $0xf8] sm:$0xff] }
 0x1f2   :  { %1708 = vst [vmem:[%s5599_s5 + $0x20] sm:$0xff] %v1624_v34  ;;  %1709 = vst.msk [vmem:[%s5599_s5 + $0x28] sm:$0xff] %vm107_vm0, %v1625_v51  ;;  %v1544_v56 = vadd.f32 %v1349_v5, %v1250_v12  ;;  %v1545_v29 = vadd.f32 %v1349_v5, %v1251_v23  ;;  %v1272_v44 = vmul.f32 %v2372_v40, %v4849_v25  ;;  %v2374_v23 = vld [vmem:[%s5592_s0 + $0x80] sm:$0xff]  ;;  %v2375_v51 = vld [vmem:[%s5592_s0 + $0x88] sm:$0xff] }
 0x1f3   :  { %v1642_v21 = vmax.f32 %v1558_v50, 0.0  ;;  %v1643_v17 = vmax.f32 %v1559_v7, 0.0  ;;  %v1273_v14 = vmul.f32 %v2373_v15, %v4849_v25  ;;  %v1258_v34 = vmul.f32 %v2374_v23, %v4847_v41 }
 0x1f4   :  { %v1628_v27 = vmax.f32 %v1544_v56, 0.0  ;;  %v1629_v60 = vmax.f32 %v1545_v29, 0.0  ;;  %v1394_v6 = vpop.permute.xlu0 %1393  ;;  %v1259_v55 = vmul.f32 %v2375_v51, %v4847_v41 }
 0x1f5   :  { %1726 = vst [vmem:[%s5599_s5 + $0xb0] sm:$0xff] %v1642_v21  ;;  %1727 = vst.msk [vmem:[%s5599_s5 + $0xb8] sm:$0xff] %vm107_vm0, %v1643_v17  ;;  %v1359_v4 = vpop.permute.xlu1 %1358  ;;  %v1562_v48 = vadd.f32 %v1394_v6, %v1268_v46  ;;  %v1563_v20 = vadd.f32 %v1394_v6, %v1269_v2  ;;  %v2376_v46 = vld [vmem:[%s5592_s0 + $0x110] sm:$0xff]  ;;  %v2377_v2 = vld [vmem:[%s5592_s0 + $0x118] sm:$0xff] }
 0x1f6   :  { %1712 = vst [vmem:[%s5599_s5 + $0x40] sm:$0xff] %v1628_v27  ;;  %1713 = vst.msk [vmem:[%s5599_s5 + $0x48] sm:$0xff] %vm107_vm0, %v1629_v60  ;;  %v1548_v33 = vadd.f32 %v1359_v4, %v1254_v57  ;;  %v1549_v35 = vadd.f32 %v1359_v4, %v1255_v31  ;;  %v1276_v28 = vmul.f32 %v2376_v46, %v4861_v13  ;;  %v2378_v57 = vld [vmem:[%s5592_s0 + $0xa0] sm:$0xff]  ;;  %v2379_v31 = vld [vmem:[%s5592_s0 + $0xa8] sm:$0xff] }
 0x1f7   :  { %v1646_v12 = vmax.f32 %v1562_v48, 0.0  ;;  %v1647_v59 = vmax.f32 %v1563_v20, 0.0  ;;  %v1277_v21 = vmul.f32 %v2377_v2, %v4861_v13  ;;  %v1262_v16 = vmul.f32 %v2378_v57, %v4868_v19 }
 0x1f8   :  { %v1632_v5 = vmax.f32 %v1548_v33, 0.0  ;;  %v1633_v50 = vmax.f32 %v1549_v35, 0.0  ;;  %v1404_v7 = vpop.permute.xlu0 %1403  ;;  %v1263_v27 = vmul.f32 %v2379_v31, %v4868_v19  ;;  %v2380_v35 = vld [vmem:[%s5592_s0 + $0x130] sm:$0xff] }
 0x1f9   :  { %1730 = vst [vmem:[%s5599_s5 + $0xd0] sm:$0xff] %v1646_v12  ;;  %1731 = vst.msk [vmem:[%s5599_s5 + $0xd8] sm:$0xff] %vm107_vm0, %v1647_v59  ;;  %v1369_v25 = vpop.permute.xlu1 %1368  ;;  %v1566_v56 = vadd.f32 %v1404_v7, %v1272_v44  ;;  %v1567_v29 = vadd.f32 %v1404_v7, %v1273_v14  ;;  %v1280_v40 = vmul.f32 %v2380_v35, %v4880_v38  ;;  %v2381_v44 = vld [vmem:[%s5592_s0 + $0x138] sm:$0xff]  ;;  %v2382_v59 = vld [vmem:[%s5592_s0 + $0xc0] sm:$0xff] }
 0x1fa   :  { %1716 = vst [vmem:[%s5599_s5 + $0x60] sm:$0xff] %v1632_v5  ;;  %1717 = vst.msk [vmem:[%s5599_s5 + $0x68] sm:$0xff] %vm107_vm0, %v1633_v50  ;;  %v1552_v41 = vadd.f32 %v1369_v25, %v1258_v34  ;;  %v1553_v18 = vadd.f32 %v1369_v25, %v1259_v55  ;;  %v1281_v15 = vmul.f32 %v2381_v44, %v4880_v38  ;;  %v2383_v34 = vld [vmem:[%s5592_s0 + $0xc8] sm:$0xff] }
 0x1fb   :  { %v1650_v17 = vmax.f32 %v1566_v56, 0.0  ;;  %v1651_v47 = vmax.f32 %v1567_v29, 0.0  ;;  %v1266_v23 = vmul.f32 %v2382_v59, %v4885_v43  ;;  %v1267_v51 = vmul.f32 %v2383_v34, %v4885_v43  ;;  %v2384_v29 = vld [vmem:[%s5592_s0 + $0x150] sm:$0xff] }
 0x1fc   :  { %v1636_v60 = vmax.f32 %v1552_v41, 0.0  ;;  %v1637_v6 = vmax.f32 %v1553_v18, 0.0  ;;  %v1414_v4 = vpop.permute.xlu0 %1413  ;;  %v1284_v41 = vmul.f32 %v2384_v29, %v4894_v26  ;;  %v2385_v18 = vld [vmem:[%s5592_s0 + $0x158] sm:$0xff] }
 0x1fd   :  { %1734 = vst [vmem:[%s5599_s5 + $0xf0] sm:$0xff] %v1650_v17  ;;  %1735 = vst.msk [vmem:[%s5599_s5 + $0xf8] sm:$0xff] %vm107_vm0, %v1651_v47  ;;  %v1379_v13 = vpop.permute.xlu1 %1378  ;;  %v1570_v48 = vadd.f32 %v1414_v4, %v1276_v28  ;;  %v1571_v20 = vadd.f32 %v1414_v4, %v1277_v21  ;;  %v1285_v46 = vmul.f32 %v2385_v18, %v4894_v26  ;;  %v2386_v21 = vld [vmem:[%s5592_s0 + $0xe0] sm:$0xff]  ;;  %v2387_v47 = vld [vmem:[%s5592_s0 + $0xe8] sm:$0xff] }
 0x1fe   :  { %1720 = vst [vmem:[%s5599_s5 + $0x80] sm:$0xff] %v1636_v60  ;;  %1721 = vst.msk [vmem:[%s5599_s5 + $0x88] sm:$0xff] %vm107_vm0, %v1637_v6  ;;  %v1556_v19 = vadd.f32 %v1379_v13, %v1262_v16  ;;  %v1557_v33 = vadd.f32 %v1379_v13, %v1263_v27  ;;  %v1270_v17 = vmul.f32 %v2386_v21, %v4899_v61  ;;  %v2388_v13 = vld [vmem:[%s5592_s0 + $0x170] sm:$0xff] }
 0x1ff   :  { %v1654_v14 = vmax.f32 %v1570_v48, 0.0  ;;  %v1655_v12 = vmax.f32 %v1571_v20, 0.0  ;;  %v1271_v57 = vmul.f32 %v2387_v47, %v4899_v61  ;;  %v1288_v48 = vmul.f32 %v2388_v13, %v4903_v24  ;;  %v2389_v20 = vld [vmem:[%s5592_s0 + $0x178] sm:$0xff] }
 0x200   :  { %v1640_v55 = vmax.f32 %v1556_v19, 0.0  ;;  %v1641_v5 = vmax.f32 %v1557_v33, 0.0  ;;  %v1424_v50 = vpop.permute.xlu0 %1423  ;;  %v1289_v19 = vmul.f32 %v2389_v20, %v4903_v24 }
 0x201   :  { %1738 = vst [vmem:[%s5599_s5 + $0x110] sm:$0xff] %v1654_v14  ;;  %1739 = vst.msk [vmem:[%s5599_s5 + $0x118] sm:$0xff] %vm107_vm0, %v1655_v12  ;;  %v1389_v38 = vpop.permute.xlu1 %1388  ;;  %v1574_v7 = vadd.f32 %v1424_v50, %v1280_v40  ;;  %v1575_v25 = vadd.f32 %v1424_v50, %v1281_v15  ;;  %v2390_v40 = vld [vmem:[%s5592_s0 + $0x100] sm:$0xff]  ;;  %v2391_v15 = vld [vmem:[%s5592_s0 + $0x108] sm:$0xff] }
 0x202   :  { %1724 = vst [vmem:[%s5599_s5 + $0xa0] sm:$0xff] %v1640_v55  ;;  %1725 = vst.msk [vmem:[%s5599_s5 + $0xa8] sm:$0xff] %vm107_vm0, %v1641_v5  ;;  %v1560_v43 = vadd.f32 %v1389_v38, %v1266_v23  ;;  %v1561_v56 = vadd.f32 %v1389_v38, %v1267_v51  ;;  %v1274_v44 = vmul.f32 %v2390_v40, %v4908_v62  ;;  %v2392_v5 = vld [vmem:[%s5592_s0 + $0x190] sm:$0xff]  ;;  %v2393_v38 = vld [vmem:[%s5592_s0 + $0x198] sm:$0xff] }
 0x203   :  { %v1658_v28 = vmax.f32 %v1574_v7, 0.0  ;;  %v1659_v2 = vmax.f32 %v1575_v25, 0.0  ;;  %v1275_v14 = vmul.f32 %v2391_v15, %v4908_v62  ;;  %v1292_v50 = vmul.f32 %v2392_v5, %v4915_v0 }
 0x204   :  { %v1644_v16 = vmax.f32 %v1560_v43, 0.0  ;;  %v1645_v31 = vmax.f32 %v1561_v56, 0.0  ;;  %v1434_v27 = vpop.permute.xlu0 %1433  ;;  %v1293_v7 = vmul.f32 %v2393_v38, %v4915_v0  ;;  %v2394_v56 = vld [vmem:[%s5592_s0 + $0x120] sm:$0xff] }
 0x205   :  { %1742 = vst [vmem:[%s5599_s5 + $0x130] sm:$0xff] %v1658_v28  ;;  %1743 = vst.msk [vmem:[%s5599_s5 + $0x138] sm:$0xff] %vm107_vm0, %v1659_v2  ;;  %v1399_v26 = vpop.permute.xlu1 %1398  ;;  %v1578_v60 = vadd.f32 %v1434_v27, %v1284_v41  ;;  %v1579_v6 = vadd.f32 %v1434_v27, %v1285_v46  ;;  %v1278_v29 = vmul.f32 %v2394_v56, %v4917_v52  ;;  %v2395_v41 = vld [vmem:[%s5592_s0 + $0x128] sm:$0xff] }
 0x206   :  { %1728 = vst [vmem:[%s5599_s5 + $0xc0] sm:$0xff] %v1644_v16  ;;  %1729 = vst.msk [vmem:[%s5599_s5 + $0xc8] sm:$0xff] %vm107_vm0, %v1645_v31  ;;  %v1564_v61 = vadd.f32 %v1399_v26, %v1270_v17  ;;  %v1565_v4 = vadd.f32 %v1399_v26, %v1271_v57  ;;  %v1279_v18 = vmul.f32 %v2395_v41, %v4917_v52  ;;  %v2396_v57 = vld [vmem:[%s5592_s0 + $0x1b0] sm:$0xff]  ;;  %v2397_v31 = vld [vmem:[%s5592_s0 + $0x1b8] sm:$0xff] }
 0x207   :  { %v1662_v33 = vmax.f32 %v1578_v60, 0.0  ;;  %v1663_v35 = vmax.f32 %v1579_v6, 0.0  ;;  %v1296_v16 = vmul.f32 %v2396_v57, %v4924_v42  ;;  %v1297_v27 = vmul.f32 %v2397_v31, %v4924_v42  ;;  %v2398_v6 = vld [vmem:[%s5592_s0 + $0x140] sm:$0xff] }
 0x208   :  { %v1648_v12 = vmax.f32 %v1564_v61, 0.0  ;;  %v1649_v59 = vmax.f32 %v1565_v4, 0.0  ;;  %v1444_v23 = vpop.permute.xlu0 %1443  ;;  %v1282_v61 = vmul.f32 %v2398_v6, %v4926_v30  ;;  %v2399_v4 = vld [vmem:[%s5592_s0 + $0x148] sm:$0xff] }
 0x209   :  { %1746 = vst [vmem:[%s5599_s5 + $0x150] sm:$0xff] %v1662_v33  ;;  %1747 = vst.msk [vmem:[%s5599_s5 + $0x158] sm:$0xff] %vm107_vm0, %v1663_v35  ;;  %v1409_v24 = vpop.permute.xlu1 %1408  ;;  %v1582_v34 = vadd.f32 %v1444_v23, %v1288_v48  ;;  %v1583_v51 = vadd.f32 %v1444_v23, %v1289_v19  ;;  %v1283_v13 = vmul.f32 %v2399_v4, %v4926_v30 }
 0x20a   :  { %1732 = vst [vmem:[%s5599_s5 + $0xe0] sm:$0xff] %v1648_v12  ;;  %1733 = vst.msk [vmem:[%s5599_s5 + $0xe8] sm:$0xff] %vm107_vm0, %v1649_v59  ;;  %v1568_v62 = vadd.f32 %v1409_v24, %v1274_v44  ;;  %v1569_v55 = vadd.f32 %v1409_v24, %v1275_v14  ;;  %v2400_v44 = vld [vmem:[%s5592_s0 + $0x1d0] sm:$0xff]  ;;  %v2401_v14 = vld [vmem:[%s5592_s0 + $0x1d8] sm:$0xff] }
 0x20b   :  { %v1666_v25 = vmax.f32 %v1582_v34, 0.0  ;;  %v1667_v43 = vmax.f32 %v1583_v51, 0.0  ;;  %v1300_v15 = vmul.f32 %v2400_v44, %v4928_v1  ;;  %v1301_v12 = vmul.f32 %v2401_v14, %v4928_v1  ;;  %v2402_v24 = vld [vmem:[%s5592_s0 + $0x160] sm:$0xff]  ;;  %v2403_v51 = vld [vmem:[%s5592_s0 + $0x168] sm:$0xff] }
 0x20c   :  { %v1652_v46 = vmax.f32 %v1568_v62, 0.0  ;;  %v1653_v28 = vmax.f32 %v1569_v55, 0.0  ;;  %v1454_v2 = vpop.permute.xlu0 %1453  ;;  %v1286_v34 = vmul.f32 %v2402_v24, %v4930_v9  ;;  %v1287_v62 = vmul.f32 %v2403_v51, %v4930_v9 }
 0x20d   :  { %1750 = vst [vmem:[%s5599_s5 + $0x170] sm:$0xff] %v1666_v25  ;;  %1751 = vst.msk [vmem:[%s5599_s5 + $0x178] sm:$0xff] %vm107_vm0, %v1667_v43  ;;  %v1419_v0 = vpop.permute.xlu1 %1418  ;;  %v1586_v21 = vadd.f32 %v1454_v2, %v1292_v50  ;;  %v1587_v17 = vadd.f32 %v1454_v2, %v1293_v7  ;;  %v2404_v43 = vld [vmem:[%s5592_s0 + $0x1f0] sm:$0xff] }
 0x20e   :  { %1736 = vst [vmem:[%s5599_s5 + $0x100] sm:$0xff] %v1652_v46  ;;  %1737 = vst.msk [vmem:[%s5599_s5 + $0x108] sm:$0xff] %vm107_vm0, %v1653_v28  ;;  %v1572_v52 = vadd.f32 %v1419_v0, %v1278_v29  ;;  %v1573_v47 = vadd.f32 %v1419_v0, %v1279_v18  ;;  %v1304_v56 = vmul.f32 %v2404_v43, %v4932_v53  ;;  %v2405_v29 = vld [vmem:[%s5592_s0 + $0x1f8] sm:$0xff]  ;;  %v2406_v28 = vld [vmem:[%s5592_s0 + $0x180] sm:$0xff] }
 0x20f   :  { %v1670_v26 = vmax.f32 %v1586_v21, 0.0  ;;  %v1671_v60 = vmax.f32 %v1587_v17, 0.0  ;;  %v1305_v41 = vmul.f32 %v2405_v29, %v4932_v53  ;;  %v1290_v2 = vmul.f32 %v2406_v28, %v4934_v54  ;;  %v2407_v0 = vld [vmem:[%s5592_s0 + $0x188] sm:$0xff] }
 0x210   :  { %v1656_v48 = vmax.f32 %v1572_v52, 0.0  ;;  %v1657_v20 = vmax.f32 %v1573_v47, 0.0  ;;  %v1464_v19 = vpop.permute.xlu0 %1463  ;;  %v1291_v21 = vmul.f32 %v2407_v0, %v4934_v54 }
 0x211   :  { %1754 = vst [vmem:[%s5599_s5 + $0x190] sm:$0xff] %v1670_v26  ;;  %1755 = vst.msk [vmem:[%s5599_s5 + $0x198] sm:$0xff] %vm107_vm0, %v1671_v60  ;;  %v1429_v42 = vpop.permute.xlu1 %1428  ;;  %v1590_v33 = vadd.f32 %v1464_v19, %v1296_v16  ;;  %v1591_v35 = vadd.f32 %v1464_v19, %v1297_v27  ;;  %v2408_v27 = vld [vmem:[%s5592_s0 + $0x210] sm:$0xff]  ;;  %v2409_v60 = vld [vmem:[%s5592_s0 + $0x218] sm:$0xff] }
 0x212   :  { %1740 = vst [vmem:[%s5599_s5 + $0x120] sm:$0xff] %v1656_v48  ;;  %1741 = vst.msk [vmem:[%s5599_s5 + $0x128] sm:$0xff] %vm107_vm0, %v1657_v20  ;;  %v1576_v30 = vadd.f32 %v1429_v42, %v1282_v61  ;;  %v1577_v40 = vadd.f32 %v1429_v42, %v1283_v13  ;;  %v1308_v26 = vmul.f32 %v2408_v27, %v4936_v39  ;;  %v2410_v13 = vld [vmem:[%s5592_s0 + $0x1a0] sm:$0xff]  ;;  %v2411_v20 = vld [vmem:[%s5592_s0 + $0x1a8] sm:$0xff] }
 0x213   :  { %v1674_v59 = vmax.f32 %v1590_v33, 0.0  ;;  %v1675_v23 = vmax.f32 %v1591_v35, 0.0  ;;  %v1309_v6 = vmul.f32 %v2409_v60, %v4936_v39  ;;  %v1294_v48 = vmul.f32 %v2410_v13, %v4938_v45 }
 0x214   :  { %v1660_v55 = vmax.f32 %v1576_v30, 0.0  ;;  %v1661_v5 = vmax.f32 %v1577_v40, 0.0  ;;  %v1474_v50 = vpop.permute.xlu0 %1473  ;;  %v1295_v19 = vmul.f32 %v2411_v20, %v4938_v45 }
 0x215   :  { %1758 = vst [vmem:[%s5599_s5 + $0x1b0] sm:$0xff] %v1674_v59  ;;  %1759 = vst.msk [vmem:[%s5599_s5 + $0x1b8] sm:$0xff] %vm107_vm0, %v1675_v23  ;;  %v1439_v1 = vpop.permute.xlu1 %1438  ;;  %v1594_v38 = vadd.f32 %v1474_v50, %v1300_v15  ;;  %v1595_v7 = vadd.f32 %v1474_v50, %v1301_v12  ;;  %v2412_v15 = vld [vmem:[%s5592_s0 + $0x230] sm:$0xff]  ;;  %v2413_v12 = vld [vmem:[%s5592_s0 + $0x238] sm:$0xff] }
 0x216   :  { %1744 = vst [vmem:[%s5599_s5 + $0x140] sm:$0xff] %v1660_v55  ;;  %1745 = vst.msk [vmem:[%s5599_s5 + $0x148] sm:$0xff] %vm107_vm0, %v1661_v5  ;;  %v1580_v9 = vadd.f32 %v1439_v1, %v1286_v34  ;;  %v1581_v25 = vadd.f32 %v1439_v1, %v1287_v62  ;;  %v1312_v14 = vmul.f32 %v2412_v15, %v4940_v49  ;;  %v2414_v34 = vld [vmem:[%s5592_s0 + $0x1c0] sm:$0xff]  ;;  %v2415_v62 = vld [vmem:[%s5592_s0 + $0x1c8] sm:$0xff] }
 0x217   :  { %v1678_v18 = vmax.f32 %v1594_v38, 0.0  ;;  %v1679_v46 = vmax.f32 %v1595_v7, 0.0  ;;  %v1313_v59 = vmul.f32 %v2413_v12, %v4940_v49  ;;  %v1298_v51 = vmul.f32 %v2414_v34, %v4942_v8 }
 0x218   :  { %v1664_v17 = vmax.f32 %v1580_v9, 0.0  ;;  %v1665_v52 = vmax.f32 %v1581_v25, 0.0  ;;  %v1484_v47 = vpop.permute.xlu0 %1483  ;;  %v1299_v55 = vmul.f32 %v2415_v62, %v4942_v8  ;;  %v2416_v25 = vld [vmem:[%s5592_s0 + $0x250] sm:$0xff] }
 0x219   :  { %1762 = vst [vmem:[%s5599_s5 + $0x1d0] sm:$0xff] %v1678_v18  ;;  %1763 = vst.msk [vmem:[%s5599_s5 + $0x1d8] sm:$0xff] %vm107_vm0, %v1679_v46  ;;  %v1449_v53 = vpop.permute.xlu1 %1448  ;;  %v1598_v57 = vadd.f32 %v1484_v47, %v1304_v56  ;;  %v1599_v16 = vadd.f32 %v1484_v47, %v1305_v41  ;;  %v1316_v43 = vmul.f32 %v2416_v25, %v4944_v11  ;;  %v2417_v56 = vld [vmem:[%s5592_s0 + $0x258] sm:$0xff]  ;;  %v2418_v46 = vld [vmem:[%s5592_s0 + $0x1e0] sm:$0xff] }
 0x21a   :  { %1748 = vst [vmem:[%s5599_s5 + $0x160] sm:$0xff] %v1664_v17  ;;  %1749 = vst.msk [vmem:[%s5599_s5 + $0x168] sm:$0xff] %vm107_vm0, %v1665_v52  ;;  %v1584_v54 = vadd.f32 %v1449_v53, %v1290_v2  ;;  %v1585_v31 = vadd.f32 %v1449_v53, %v1291_v21  ;;  %v1317_v29 = vmul.f32 %v2417_v56, %v4944_v11  ;;  %v2419_v2 = vld [vmem:[%s5592_s0 + $0x1e8] sm:$0xff] }
 0x21b   :  { %v1682_v61 = vmax.f32 %v1598_v57, 0.0  ;;  %v1683_v4 = vmax.f32 %v1599_v16, 0.0  ;;  %v1302_v28 = vmul.f32 %v2418_v46, %v4946_v63  ;;  %v1303_v0 = vmul.f32 %v2419_v2, %v4946_v63  ;;  %v2420_v16 = vld [vmem:[%s5592_s0 + $0x270] sm:$0xff] }
 0x21c   :  { %v1668_v42 = vmax.f32 %v1584_v54, 0.0  ;;  %v1669_v33 = vmax.f32 %v1585_v31, 0.0  ;;  %v1494_v35 = vpop.permute.xlu0 %1493  ;;  %v1320_v54 = vmul.f32 %v2420_v16, %v4948_v36  ;;  %v2421_v31 = vld [vmem:[%s5592_s0 + $0x278] sm:$0xff] }
 0x21d   :  { %1766 = vst [vmem:[%s5599_s5 + $0x1f0] sm:$0xff] %v1682_v61  ;;  %1767 = vst.msk [vmem:[%s5599_s5 + $0x1f8] sm:$0xff] %vm107_vm0, %v1683_v4  ;;  %v1459_v39 = vpop.permute.xlu1 %1458  ;;  %v1602_v30 = vadd.f32 %v1494_v35, %v1308_v26  ;;  %v1603_v40 = vadd.f32 %v1494_v35, %v1309_v6  ;;  %v1321_v27 = vmul.f32 %v2421_v31, %v4948_v36  ;;  %v2422_v6 = vld [vmem:[%s5592_s0 + $0x200] sm:$0xff]  ;;  %v2423_v4 = vld [vmem:[%s5592_s0 + $0x208] sm:$0xff] }
 0x21e   :  { %1752 = vst [vmem:[%s5599_s5 + $0x180] sm:$0xff] %v1668_v42  ;;  %1753 = vst.msk [vmem:[%s5599_s5 + $0x188] sm:$0xff] %vm107_vm0, %v1669_v33  ;;  %v1588_v45 = vadd.f32 %v1459_v39, %v1294_v48  ;;  %v1589_v44 = vadd.f32 %v1459_v39, %v1295_v19  ;;  %v1306_v61 = vmul.f32 %v2422_v6, %v4950_v10  ;;  %v2424_v39 = vld [vmem:[%s5592_s0 + $0x290] sm:$0xff] }
 0x21f   :  { %v1686_v23 = vmax.f32 %v1602_v30, 0.0  ;;  %v1687_v24 = vmax.f32 %v1603_v40, 0.0  ;;  %v1307_v13 = vmul.f32 %v2423_v4, %v4950_v10  ;;  %v1324_v30 = vmul.f32 %v2424_v39, %v4952_v58  ;;  %v2425_v40 = vld [vmem:[%s5592_s0 + $0x298] sm:$0xff] }
 0x220   :  { %v1672_v5 = vmax.f32 %v1588_v45, 0.0  ;;  %v1673_v50 = vmax.f32 %v1589_v44, 0.0  ;;  %v1504_v1 = vpop.permute.xlu0 %1503  ;;  %v1325_v45 = vmul.f32 %v2425_v40, %v4952_v58 }
 0x221   :  { %1770 = vst [vmem:[%s5599_s5 + $0x210] sm:$0xff] %v1686_v23  ;;  %1771 = vst.msk [vmem:[%s5599_s5 + $0x218] sm:$0xff] %vm107_vm0, %v1687_v24  ;;  %v1469_v49 = vpop.permute.xlu1 %1468  ;;  %v1606_v38 = vadd.f32 %v1504_v1, %v1312_v14  ;;  %v1607_v7 = vadd.f32 %v1504_v1, %v1313_v59  ;;  %v2426_v14 = vld [vmem:[%s5592_s0 + $0x220] sm:$0xff]  ;;  %v2427_v59 = vld [vmem:[%s5592_s0 + $0x228] sm:$0xff] }
 0x222   :  { %1756 = vst [vmem:[%s5599_s5 + $0x1a0] sm:$0xff] %v1672_v5  ;;  %1757 = vst.msk [vmem:[%s5599_s5 + $0x1a8] sm:$0xff] %vm107_vm0, %v1673_v50  ;;  %v1592_v8 = vadd.f32 %v1469_v49, %v1298_v51  ;;  %v1593_v9 = vadd.f32 %v1469_v49, %v1299_v55  ;;  %v1310_v12 = vmul.f32 %v2426_v14, %v4954_v37  ;;  %v2428_v49 = vld [vmem:[%s5592_s0 + $0x240] sm:$0xff] }
 0x223   :  { %v1690_v41 = vmax.f32 %v1606_v38, 0.0  ;;  %v1691_v18 = vmax.f32 %v1607_v7, 0.0  ;;  %v1311_v23 = vmul.f32 %v2427_v59, %v4954_v37  ;;  %v1314_v38 = vmul.f32 %v2428_v49, %v4964_v3  ;;  %v2429_v7 = vld [vmem:[%s5592_s0 + $0x248] sm:$0xff] }
 0x224   :  { %v1676_v21 = vmax.f32 %v1592_v8, 0.0  ;;  %v1677_v17 = vmax.f32 %v1593_v9, 0.0  ;;  %v1514_v52 = vpop.permute.xlu0 %1513  ;;  %v1315_v8 = vmul.f32 %v2429_v7, %v4964_v3 }
 0x225   :  { %1774 = vst [vmem:[%s5599_s5 + $0x230] sm:$0xff] %v1690_v41  ;;  %1775 = vst.msk [vmem:[%s5599_s5 + $0x238] sm:$0xff] %vm107_vm0, %v1691_v18  ;;  %v1479_v11 = vpop.permute.xlu1 %1478  ;;  %v1610_v47 = vadd.f32 %v1514_v52, %v1316_v43  ;;  %v1611_v53 = vadd.f32 %v1514_v52, %v1317_v29  ;;  %v2430_v29 = vld [vmem:[%s5592_s0 + $0x260] sm:$0xff]  ;;  %v2431_v18 = vld [vmem:[%s5592_s0 + $0x268] sm:$0xff] }
 0x226   :  { %1760 = vst [vmem:[%s5599_s5 + $0x1c0] sm:$0xff] %v1676_v21  ;;  %1761 = vst.msk [vmem:[%s5599_s5 + $0x1c8] sm:$0xff] %vm107_vm0, %v1677_v17  ;;  %v1596_v63 = vadd.f32 %v1479_v11, %v1302_v28  ;;  %v1597_v57 = vadd.f32 %v1479_v11, %v1303_v0  ;;  %v1318_v41 = vmul.f32 %v2430_v29, %v4981_v32  ;;  %v2432_v52 = vld [vmem:[%s5592_s0 + $0x280] sm:$0xff]  ;;  %v2433_v11 = vld [vmem:[%s5592_s0 + $0x288] sm:$0xff] }
 0x227   :  { %v1694_v26 = vmax.f32 %v1610_v47, 0.0  ;;  %v1695_v60 = vmax.f32 %v1611_v53, 0.0  ;;  %v1319_v46 = vmul.f32 %v2431_v18, %v4981_v32  ;;  %v1322_v32 = vmul.f32 %v2432_v52, %v4998_v22 }
 0x228   :  { %v1680_v48 = vmax.f32 %v1596_v63, 0.0  ;;  %v1681_v20 = vmax.f32 %v1597_v57, 0.0  ;;  %v1524_v19 = vpop.permute.xlu0 %1523  ;;  %v1323_v47 = vmul.f32 %v2433_v11, %v4998_v22 }
 0x229   :  { %1778 = vst [vmem:[%s5599_s5 + $0x250] sm:$0xff] %v1694_v26  ;;  %1779 = vst.msk [vmem:[%s5599_s5 + $0x258] sm:$0xff] %vm107_vm0, %v1695_v60  ;;  %v1489_v36 = vpop.permute.xlu1 %1488  ;;  %v1614_v42 = vadd.f32 %v1524_v19, %v1320_v54  ;;  %v1615_v33 = vadd.f32 %v1524_v19, %v1321_v27 }
 0x22a   :  { %1764 = vst [vmem:[%s5599_s5 + $0x1e0] sm:$0xff] %v1680_v48  ;;  %1765 = vst.msk [vmem:[%s5599_s5 + $0x1e8] sm:$0xff] %vm107_vm0, %v1681_v20  ;;  %v1600_v10 = vadd.f32 %v1489_v36, %v1306_v61  ;;  %v1601_v35 = vadd.f32 %v1489_v36, %v1307_v13 }
 0x22b   :  { %v1698_v44 = vmax.f32 %v1614_v42, 0.0  ;;  %v1699_v15 = vmax.f32 %v1615_v33, 0.0 }
 0x22c   :  { %v1684_v24 = vmax.f32 %v1600_v10, 0.0  ;;  %v1685_v34 = vmax.f32 %v1601_v35, 0.0  ;;  %v1534_v51 = vpop.permute.xlu0 %1533 }
 0x22d   :  { %1782 = vst [vmem:[%s5599_s5 + $0x270] sm:$0xff] %v1698_v44  ;;  %1783 = vst.msk [vmem:[%s5599_s5 + $0x278] sm:$0xff] %vm107_vm0, %v1699_v15  ;;  %v1499_v58 = vpop.permute.xlu1 %1498  ;;  %v1618_v62 = vadd.f32 %v1534_v51, %v1324_v30  ;;  %v1619_v55 = vadd.f32 %v1534_v51, %v1325_v45 }
 0x22e   :  { %1768 = vst [vmem:[%s5599_s5 + $0x200] sm:$0xff] %v1684_v24  ;;  %1769 = vst.msk [vmem:[%s5599_s5 + $0x208] sm:$0xff] %vm107_vm0, %v1685_v34  ;;  %v1604_v37 = vadd.f32 %v1499_v58, %v1310_v12  ;;  %v1605_v5 = vadd.f32 %v1499_v58, %v1311_v23 }
 0x22f   :  { %v1702_v50 = vmax.f32 %v1618_v62, 0.0  ;;  %v1703_v1 = vmax.f32 %v1619_v55, 0.0 }
 0x230   :  { %v1688_v9 = vmax.f32 %v1604_v37, 0.0  ;;  %v1689_v25 = vmax.f32 %v1605_v5, 0.0 }
 0x231   :  { %1786 = vst [vmem:[%s5599_s5 + $0x290] sm:$0xff] %v1702_v50  ;;  %1787 = vst.msk [vmem:[%s5599_s5 + $0x298] sm:$0xff] %vm107_vm0, %v1703_v1  ;;  %v1509_v43 = vpop.permute.xlu1 %1508 }
 0x232   :  { %1772 = vst [vmem:[%s5599_s5 + $0x220] sm:$0xff] %v1688_v9  ;;  %1773 = vst.msk [vmem:[%s5599_s5 + $0x228] sm:$0xff] %vm107_vm0, %v1689_v25  ;;  %v1608_v3 = vadd.f32 %v1509_v43, %v1314_v38  ;;  %v1609_v56 = vadd.f32 %v1509_v43, %v1315_v8 }
 0x234   :  { %v1692_v28 = vmax.f32 %v1608_v3, 0.0  ;;  %v1693_v2 = vmax.f32 %v1609_v56, 0.0 }
 0x235   :  { %v1519_v0 = vpop.permute.xlu1 %1518 }
 0x236   :  { %1776 = vst [vmem:[%s5599_s5 + $0x240] sm:$0xff] %v1692_v28  ;;  %1777 = vst.msk [vmem:[%s5599_s5 + $0x248] sm:$0xff] %vm107_vm0, %v1693_v2  ;;  %v1612_v21 = vadd.f32 %v1519_v0, %v1318_v41  ;;  %v1613_v17 = vadd.f32 %v1519_v0, %v1319_v46 }
 0x238   :  { %v1696_v53 = vmax.f32 %v1612_v21, 0.0  ;;  %v1697_v63 = vmax.f32 %v1613_v17, 0.0 }
 0x239   :  { %v1529_v57 = vpop.permute.xlu1 %1528 }
 0x23a   :  { %1780 = vst [vmem:[%s5599_s5 + $0x260] sm:$0xff] %v1696_v53  ;;  %1781 = vst.msk [vmem:[%s5599_s5 + $0x268] sm:$0xff] %vm107_vm0, %v1697_v63  ;;  %v1616_v16 = vadd.f32 %v1529_v57, %v1322_v32  ;;  %v1617_v54 = vadd.f32 %v1529_v57, %v1323_v47 }
 0x23c   :  { %v1700_v31 = vmax.f32 %v1616_v16, 0.0  ;;  %v1701_v27 = vmax.f32 %v1617_v54, 0.0 }
 0x23e   :  { %1784 = vst [vmem:[%s5599_s5 + $0x280] sm:$0xff] %v1700_v31  ;;  %1785 = vst.msk [vmem:[%s5599_s5 + $0x288] sm:$0xff] %vm107_vm0, %v1701_v27 }

</bundles_post_ra>
